<compile_context>
chip_gen: v7x
topology: tpu7x:2x2x1
jax: 0.10.0
libtpu: 0.0.40
codegen_flags: <defaults>
</compile_context>

<pallas_src>
import jax
import jax.numpy as jnp
from jax.experimental import pallas as pl
from jax.experimental.pallas import tpu as pltpu


# ----------------------------------------------------------------------------
# Kernel: one tile of TM pixels (lanes), all 5 linear layers fused.
#   x_ref   : (1, C, TM)    f32   pixels-on-lanes input tile
#   w0t_ref : (nf, C)       bf16  layer-0 weights, transposed
#   wht_ref : (3, nf, nf)   bf16  hidden tanh-layer weights, transposed
#   w4t_ref : (C, nf)       bf16  final projection weights, transposed
#   bh_ref  : (nf, 4)       f32   biases of layer 0 + 3 hidden layers (cols)
#   b4_ref  : (C, 1)        f32   final bias
#   o_ref   : (1, C, TM)    f32
# ----------------------------------------------------------------------------
def _nilut_kernel(x_ref, w0t_ref, wht_ref, w4t_ref, bh_ref, b4_ref, o_ref):
    x = x_ref[0, :, :]                                   # (C, TM) f32
    xb = x.astype(jnp.bfloat16)

    # Layer 0: Linear(C -> nf) + ReLU on the MXU (K = C is tiny; only nf LHS
    # rows stream).  f32 accumulation, f32 bias + ReLU, bf16 carry.
    h = jnp.dot(w0t_ref[...], xb, preferred_element_type=jnp.float32)  # (nf, TM)
    h = jnp.maximum(h + bh_ref[:, 0:1], 0.0).astype(jnp.bfloat16)

    # 3 x (Linear(nf -> nf) + Tanh): bf16 operands, f32 MXU accumulation,
    # f32 bias + tanh (v5e has no bf16 VPU/EUP), single cast back to bf16.
    for k in range(3):                                   # static unroll
        hk = jnp.dot(wht_ref[k], h, preferred_element_type=jnp.float32)
        h = jnp.tanh(hk + bh_ref[:, k + 1:k + 2]).astype(jnp.bfloat16)

    # Final Linear(nf -> C): bf16 operands, f32 accumulation + bias.
    res = jnp.dot(w4t_ref[...], h, preferred_element_type=jnp.float32) \
        + b4_ref[...]                                    # (C, TM) f32

    # Residual + clamp(0, 1) in f32.
    o_ref[0, :, :] = jnp.clip(x + res, 0.0, 1.0).astype(o_ref.dtype)


def _pick_tile(hw, n, tile_m):
    """Pixel-tile width: multiple of 128 (or the full H*W), clamped to the
    image, and halved if needed so the grid has >= 2 steps (v7x has 2 TCs)."""
    if hw % 128 != 0:
        return hw                      # full-extent block (rare, small images)
    tm = max(128, (min(tile_m, hw) // 128) * 128)
    if n * pl.cdiv(hw, tm) < 2 and tm >= 256:
        tm = max(128, ((tm // 2) // 128) * 128)
    return tm


# ----------------------------------------------------------------------------
# Wrapper: NCHW viewed as (N, C, H*W) -> pallas_call -> NCHW (no transposes,
# no padding; all plumbing is reshape-only / zero-copy).
# ----------------------------------------------------------------------------
def nilut_forward(x_nchw, params, *, tile_m=2048):
    """x_nchw: (N, C, H, W) float32.  params: list of 5 (W, b), W: (in, out)."""
    n, c, h, w = x_nchw.shape
    hw = h * w
    x = x_nchw.reshape(n, c, hw)                         # zero-copy view

    (w0, b0), (w1, b1), (w2, b2), (w3, b3), (w4, b4) = params
    in_ch, nf = w0.shape
    out_ch = w4.shape[1]
    assert in_ch == c and out_ch == c, "NILUT residual needs in_ch == out_ch == C"

    # Pack + cast weights once, outside the kernel (transposed: layers do W^T @ h).
    w0t = w0.T.astype(jnp.bfloat16)                                  # (nf, C)
    wht = jnp.stack([w1.T, w2.T, w3.T], axis=0).astype(jnp.bfloat16) # (3, nf, nf)
    w4t = w4.T.astype(jnp.bfloat16)                                  # (C, nf)
    bh = jnp.concatenate([b0, b1, b2, b3], axis=0).T.astype(jnp.float32)  # (nf, 4)
    b4c = b4.T.astype(jnp.float32)                                   # (C, 1)

    tm = _pick_tile(hw, n, tile_m)
    grid = (n, pl.cdiv(hw, tm))

    def const_spec(arr):
        nd = arr.ndim
        return pl.BlockSpec(arr.shape, lambda b, j, _nd=nd: (0,) * _nd)

    # Advisory cost for XLA's scheduler around the custom call.
    p_total = n * hw
    weight_bytes = (w0t.size + wht.size + w4t.size) * 2 + (bh.size + b4c.size) * 4
    cost = pl.CostEstimate(
        flops=2 * p_total * (in_ch * nf + 3 * nf * nf + nf * out_ch),
        transcendentals=3 * p_total * nf,
        bytes_accessed=2 * p_total * c * 4 + weight_bytes)

    out = pl.pallas_call(
        _nilut_kernel,
        out_shape=jax.ShapeDtypeStruct((n, c, hw), x.dtype),
        grid_spec=pltpu.PrefetchScalarGridSpec(
            num_scalar_prefetch=0,
            grid=grid,
            in_specs=[
                pl.BlockSpec((1, c, tm), lambda b, j: (b, 0, j)),    # x tile
                const_spec(w0t),
                const_spec(wht),
                const_spec(w4t),
                const_spec(bh),
                const_spec(b4c),
            ],
            out_specs=pl.BlockSpec((1, c, tm), lambda b, j: (b, 0, j)),
        ),
        compiler_params=pltpu.CompilerParams(
            dimension_semantics=("parallel", "parallel"),
            # Intermediates at tm=2048 are only a few MiB; no vmem_limit bump
            # needed even under v5e's 16 MiB default / v7x's 64 MiB VMEM.
        ),
        cost_estimate=cost,
    )(x, w0t, wht, w4t, bh, b4c)

    return out.reshape(n, c, h, w)


# ----------------------------------------------------------------------------
# Deterministic parameter init (PyTorch nn.Linear default: U(-1/sqrt(fan_in), +)).
# Weights stored as (fan_in, fan_out); biases as (1, fan_out).
# ----------------------------------------------------------------------------
def init_nilut_params(key, in_ch=3, nf=128, n_layer=3, out_ch=3):
    dims = [(in_ch, nf)] + [(nf, nf)] * n_layer + [(nf, out_ch)]
    params = []
    for fan_in, fan_out in dims:
        key, kw, kb = jax.random.split(key, 3)
        bound = 1.0 / jnp.sqrt(jnp.float32(fan_in))
        W = jax.random.uniform(kw, (fan_in, fan_out), jnp.float32, -bound, bound)
        b = jax.random.uniform(kb, (1, fan_out), jnp.float32, -bound, bound)
        params.append((W, b))
    return params


# ----------------------------------------------------------------------------
# Plain-JAX references (mirror the PyTorch NCHW->NHWC path).
# ----------------------------------------------------------------------------
def nilut_reference(x_nchw, params, *, matmul_dtype=jnp.float32):
    n, c, h, w = x_nchw.shape
    x = jnp.transpose(x_nchw, (0, 2, 3, 1)).reshape(n, h * w, c)
    (w0, b0), (w1, b1), (w2, b2), (w3, b3), (w4, b4) = params

    def lin(a, W, b):
        return jnp.dot(a.astype(matmul_dtype), W.astype(matmul_dtype),
                       preferred_element_type=jnp.float32) + b

    y = jnp.maximum(lin(x, w0, b0), 0.0)
    y = jnp.tanh(lin(y, w1, b1))
    y = jnp.tanh(lin(y, w2, b2))
    y = jnp.tanh(lin(y, w3, b3))
    res = lin(y, w4, b4)
    out = jnp.clip(x + res, 0.0, 1.0).reshape(n, h, w, c)
    return jnp.transpose(out, (0, 3, 1, 2))


if __name__ == "__main__":
    key = jax.random.PRNGKey(0)
    k_x, k_p = jax.random.split(key)

    # Small NILUT: 3 input channels (RGB), hidden width 128, 3 hidden tanh layers.
    N, C, H, W = 2, 3, 32, 32                  # H*W = 1024 -> grid (2, 1): 2 steps
    x = jax.random.uniform(k_x, (N, C, H, W), jnp.float32)    # pixel values in [0, 1]
    params = init_nilut_params(k_p, in_ch=C, nf=128, n_layer=3, out_ch=C)

    out = jax.block_until_ready(nilut_forward(x, params, tile_m=2048))

    # Reference with the same matmul operand precision as the kernel (bf16).
    ref_bf16 = jax.block_until_ready(
        nilut_reference(x, params, matmul_dtype=jnp.bfloat16))
    # Full f32 reference (loose tolerance: kernel uses bf16 matmul operands).
    ref_f32 = jax.block_until_ready(
        nilut_reference(x, params, matmul_dtype=jnp.float32))

    assert out.shape == (N, C, H, W)
    assert jnp.allclose(out, ref_bf16, atol=5e-3, rtol=0.0), (
        float(jnp.max(jnp.abs(out - ref_bf16))))
    assert jnp.allclose(out, ref_f32, atol=6e-2, rtol=0.0), (
        float(jnp.max(jnp.abs(out - ref_f32))))
    print("KERNEL_OK")
</pallas_src>

<mosaic_0001>
module attributes {stable_mosaic.version = 11 : i64} {
  func.func @_nilut_kernel(%arg0: i32, %arg1: i32, %arg2: memref<1x3x1024xf32, #tpu.memory_space<vmem>>, %arg3: memref<128x3xbf16, #tpu.memory_space<vmem>>, %arg4: memref<3x128x128xbf16, #tpu.memory_space<vmem>>, %arg5: memref<3x128xbf16, #tpu.memory_space<vmem>>, %arg6: memref<128x4xf32, #tpu.memory_space<vmem>>, %arg7: memref<3x1xf32, #tpu.memory_space<vmem>>, %arg8: memref<1x3x1024xf32, #tpu.memory_space<vmem>>) attributes {dimension_semantics = [#tpu.dimension_semantics<parallel>, #tpu.dimension_semantics<parallel>], iteration_bounds = array<i64: 2, 1>, scalar_prefetch = 0 : i64, scratch_operands = 0 : i64, tpu.core_type = #tpu.core_type<tc>, window_params = [{transform_indices = @transform_0, window_bounds = array<i64: 1, 3, 1024>}, {pipeline_mode = #tpu.pipeline_mode<synchronous>, transform_indices = @transform_1, window_bounds = array<i64: 128, 3>}, {pipeline_mode = #tpu.pipeline_mode<synchronous>, transform_indices = @transform_2, window_bounds = array<i64: 3, 128, 128>}, {pipeline_mode = #tpu.pipeline_mode<synchronous>, transform_indices = @transform_3, window_bounds = array<i64: 3, 128>}, {pipeline_mode = #tpu.pipeline_mode<synchronous>, transform_indices = @transform_4, window_bounds = array<i64: 128, 4>}, {pipeline_mode = #tpu.pipeline_mode<synchronous>, transform_indices = @transform_5, window_bounds = array<i64: 3, 1>}, {transform_indices = @transform_6, window_bounds = array<i64: 1, 3, 1024>}]} {
    %c0 = arith.constant 0 : index
    %c0_0 = arith.constant 0 : index
    %c0_1 = arith.constant 0 : index
    %0 = vector.load %arg2[%c0, %c0_0, %c0_1] : memref<1x3x1024xf32, #tpu.memory_space<vmem>>, vector<1x3x1024xf32>
    %1 = vector.shape_cast %0 : vector<1x3x1024xf32> to vector<3x1024xf32>
    %2 = arith.truncf %1 : vector<3x1024xf32> to vector<3x1024xbf16>
    %c0_2 = arith.constant 0 : index
    %c0_3 = arith.constant 0 : index
    %3 = vector.load %arg3[%c0_2, %c0_3] : memref<128x3xbf16, #tpu.memory_space<vmem>>, vector<128x3xbf16>
    %cst = arith.constant dense<0.000000e+00> : vector<128x1024xf32>
    %4 = tpu.matmul %3, %2, %cst {dimension_numbers = #tpu.dot_dimension_numbers<[1], [0], [0], [1], [0, 0, 1, 1], [], []>} : vector<128x3xbf16>, vector<3x1024xbf16>, vector<128x1024xf32> -> vector<128x1024xf32>
    %c0_4 = arith.constant 0 : index
    %c0_5 = arith.constant 0 : index
    %5 = vector.load %arg6[%c0_4, %c0_5] : memref<128x4xf32, #tpu.memory_space<vmem>>, vector<128x1xf32>
    %6 = vector.broadcast %5 : vector<128x1xf32> to vector<128x1024xf32>
    %7 = arith.addf %4, %6 : vector<128x1024xf32>
    %cst_6 = arith.constant 0.000000e+00 : f32
    %8 = vector.broadcast %cst_6 : f32 to vector<128x1024xf32>
    %9 = arith.maximumf %7, %8 : vector<128x1024xf32>
    %10 = arith.truncf %9 : vector<128x1024xf32> to vector<128x1024xbf16>
    %c0_7 = arith.constant 0 : index
    %c0_8 = arith.constant 0 : index
    %c0_9 = arith.constant 0 : index
    %11 = vector.load %arg4[%c0_7, %c0_8, %c0_9] : memref<3x128x128xbf16, #tpu.memory_space<vmem>>, vector<1x128x128xbf16>
    %12 = vector.shape_cast %11 : vector<1x128x128xbf16> to vector<128x128xbf16>
    %cst_10 = arith.constant dense<0.000000e+00> : vector<128x1024xf32>
    %13 = tpu.matmul %12, %10, %cst_10 {dimension_numbers = #tpu.dot_dimension_numbers<[1], [0], [0], [1], [0, 0, 1, 1], [], []>} : vector<128x128xbf16>, vector<128x1024xbf16>, vector<128x1024xf32> -> vector<128x1024xf32>
    %c0_11 = arith.constant 0 : index
    %c1 = arith.constant 1 : index
    %14 = vector.load %arg6[%c0_11, %c1] : memref<128x4xf32, #tpu.memory_space<vmem>>, vector<128x1xf32>
    %15 = vector.broadcast %14 : vector<128x1xf32> to vector<128x1024xf32>
    %16 = arith.addf %13, %15 : vector<128x1024xf32>
    %17 = math.tanh %16 : vector<128x1024xf32>
    %18 = arith.truncf %17 : vector<128x1024xf32> to vector<128x1024xbf16>
    %c1_12 = arith.constant 1 : index
    %c0_13 = arith.constant 0 : index
    %c0_14 = arith.constant 0 : index
    %19 = vector.load %arg4[%c1_12, %c0_13, %c0_14] : memref<3x128x128xbf16, #tpu.memory_space<vmem>>, vector<1x128x128xbf16>
    %20 = vector.shape_cast %19 : vector<1x128x128xbf16> to vector<128x128xbf16>
    %cst_15 = arith.constant dense<0.000000e+00> : vector<128x1024xf32>
    %21 = tpu.matmul %20, %18, %cst_15 {dimension_numbers = #tpu.dot_dimension_numbers<[1], [0], [0], [1], [0, 0, 1, 1], [], []>} : vector<128x128xbf16>, vector<128x1024xbf16>, vector<128x1024xf32> -> vector<128x1024xf32>
    %c0_16 = arith.constant 0 : index
    %c2 = arith.constant 2 : index
    %22 = vector.load %arg6[%c0_16, %c2] : memref<128x4xf32, #tpu.memory_space<vmem>>, vector<128x1xf32>
    %23 = vector.broadcast %22 : vector<128x1xf32> to vector<128x1024xf32>
    %24 = arith.addf %21, %23 : vector<128x1024xf32>
    %25 = math.tanh %24 : vector<128x1024xf32>
    %26 = arith.truncf %25 : vector<128x1024xf32> to vector<128x1024xbf16>
    %c2_17 = arith.constant 2 : index
    %c0_18 = arith.constant 0 : index
    %c0_19 = arith.constant 0 : index
    %27 = vector.load %arg4[%c2_17, %c0_18, %c0_19] : memref<3x128x128xbf16, #tpu.memory_space<vmem>>, vector<1x128x128xbf16>
    %28 = vector.shape_cast %27 : vector<1x128x128xbf16> to vector<128x128xbf16>
    %cst_20 = arith.constant dense<0.000000e+00> : vector<128x1024xf32>
    %29 = tpu.matmul %28, %26, %cst_20 {dimension_numbers = #tpu.dot_dimension_numbers<[1], [0], [0], [1], [0, 0, 1, 1], [], []>} : vector<128x128xbf16>, vector<128x1024xbf16>, vector<128x1024xf32> -> vector<128x1024xf32>
    %c0_21 = arith.constant 0 : index
    %c3 = arith.constant 3 : index
    %30 = vector.load %arg6[%c0_21, %c3] : memref<128x4xf32, #tpu.memory_space<vmem>>, vector<128x1xf32>
    %31 = vector.broadcast %30 : vector<128x1xf32> to vector<128x1024xf32>
    %32 = arith.addf %29, %31 : vector<128x1024xf32>
    %33 = math.tanh %32 : vector<128x1024xf32>
    %34 = arith.truncf %33 : vector<128x1024xf32> to vector<128x1024xbf16>
    %c0_22 = arith.constant 0 : index
    %c0_23 = arith.constant 0 : index
    %35 = vector.load %arg5[%c0_22, %c0_23] : memref<3x128xbf16, #tpu.memory_space<vmem>>, vector<3x128xbf16>
    %cst_24 = arith.constant dense<0.000000e+00> : vector<3x1024xf32>
    %36 = tpu.matmul %35, %34, %cst_24 {dimension_numbers = #tpu.dot_dimension_numbers<[1], [0], [0], [1], [0, 0, 1, 1], [], []>} : vector<3x128xbf16>, vector<128x1024xbf16>, vector<3x1024xf32> -> vector<3x1024xf32>
    %c0_25 = arith.constant 0 : index
    %c0_26 = arith.constant 0 : index
    %37 = vector.load %arg7[%c0_25, %c0_26] : memref<3x1xf32, #tpu.memory_space<vmem>>, vector<3x1xf32>
    %38 = vector.broadcast %37 : vector<3x1xf32> to vector<3x1024xf32>
    %39 = arith.addf %36, %38 : vector<3x1024xf32>
    %40 = arith.addf %1, %39 : vector<3x1024xf32>
    %cst_27 = arith.constant 0.000000e+00 : f32
    %cst_28 = arith.constant 1.000000e+00 : f32
    %41 = vector.broadcast %cst_27 : f32 to vector<3x1024xf32>
    %42 = arith.maximumf %41, %40 : vector<3x1024xf32>
    %43 = vector.broadcast %cst_28 : f32 to vector<3x1024xf32>
    %44 = arith.minimumf %43, %42 : vector<3x1024xf32>
    %c0_29 = arith.constant 0 : index
    %c0_30 = arith.constant 0 : index
    %c0_31 = arith.constant 0 : index
    %45 = vector.load %arg8[%c0_29, %c0_30, %c0_31] : memref<1x3x1024xf32, #tpu.memory_space<vmem>>, vector<1x3x1024xf32>
    %46 = vector.shape_cast %45 : vector<1x3x1024xf32> to vector<3x1024xf32>
    %47 = vector.shape_cast %44 : vector<3x1024xf32> to vector<1x3x1024xf32>
    tpu.vector_store %arg8[%c0_29, %c0_30, %c0_31], %47 {strides = array<i32>} : memref<1x3x1024xf32, #tpu.memory_space<vmem>>, vector<1x3x1024xf32>,
    return
  }
  func.func @transform_0(%arg0: i32, %arg1: i32) -> (i32, i32, i32) {
    %c0_i32 = arith.constant 0 : i32
    %c0_i32_0 = arith.constant 0 : i32
    return %arg0, %c0_i32, %arg1 : i32, i32, i32
  }
  func.func @transform_1(%arg0: i32, %arg1: i32) -> (i32, i32) {
    %c0_i32 = arith.constant 0 : i32
    %c0_i32_0 = arith.constant 0 : i32
    %c0_i32_1 = arith.constant 0 : i32
    return %c0_i32, %c0_i32_0 : i32, i32
  }
  func.func @transform_2(%arg0: i32, %arg1: i32) -> (i32, i32, i32) {
    %c0_i32 = arith.constant 0 : i32
    %c0_i32_0 = arith.constant 0 : i32
    %c0_i32_1 = arith.constant 0 : i32
    %c0_i32_2 = arith.constant 0 : i32
    return %c0_i32, %c0_i32_0, %c0_i32_1 : i32, i32, i32
  }
  func.func @transform_3(%arg0: i32, %arg1: i32) -> (i32, i32) {
    %c0_i32 = arith.constant 0 : i32
    %c0_i32_0 = arith.constant 0 : i32
    %c0_i32_1 = arith.constant 0 : i32
    return %c0_i32, %c0_i32_0 : i32, i32
  }
  func.func @transform_4(%arg0: i32, %arg1: i32) -> (i32, i32) {
    %c0_i32 = arith.constant 0 : i32
    %c0_i32_0 = arith.constant 0 : i32
    %c0_i32_1 = arith.constant 0 : i32
    return %c0_i32, %c0_i32_0 : i32, i32
  }
  func.func @transform_5(%arg0: i32, %arg1: i32) -> (i32, i32) {
    %c0_i32 = arith.constant 0 : i32
    %c0_i32_0 = arith.constant 0 : i32
    %c0_i32_1 = arith.constant 0 : i32
    return %c0_i32, %c0_i32_0 : i32, i32
  }
  func.func @transform_6(%arg0: i32, %arg1: i32) -> (i32, i32, i32) {
    %c0_i32 = arith.constant 0 : i32
    %c0_i32_0 = arith.constant 0 : i32
    return %arg0, %c0_i32, %arg1 : i32, i32, i32
  }
}

</mosaic_0001>

<bundles_post_ra>
// kernel: tpu_custom_call.1
= control target key start
LH: loop header
LB: loop body
LE: loop exit
PB: predicated region body
PF: predicated region fallthrough
CT: control target
= control target key end

     0   :  { %s4825_s21 = smov 0   ;;  %s4827_s22 = smov 0   ;;  %s6158_s0 = inlined_call_operand.vmem [shape: f32[2,3,1024], index: 0, kind: input, shape index: {}]   ;;  %s6159_s1 = inlined_call_operand.vmem [shape: bf16[128,3], index: 1, kind: input, shape index: {}]   ;;  %s6160_s2 = inlined_call_operand.vmem [shape: bf16[3,128,128], index: 2, kind: input, shape index: {}]   ;;  %s6161_s3 = inlined_call_operand.vmem [shape: bf16[3,128], index: 3, kind: input, shape index: {}]   ;;  %s6162_s4 = inlined_call_operand.vmem [shape: f32[128,4], index: 4, kind: input, shape index: {}]   ;;  %s6163_s5 = inlined_call_operand.vmem [shape: f32[3,1], index: 5, kind: input, shape index: {}]   ;;  %s6164_s6 = inlined_call_operand.vmem [shape: f32[2,3,1024], index: 6, kind: output, shape index: {}]  }
   0x1   :  { %s4829_s23 = smov 0  }
   0x2 LB: > { %s28_s24 = sadd.s32 1, %s4779_s22  ;;  %p3777_p0 = scmp.ge.s32.totalorder %s4783_s23, 1  ;;  %s4783_s23 = sphi %s4829_s23, %s16_s23   ;;  %s4779_s22 = sphi %s4827_s22, %s6166_s22   ;;  %s4775_s21 = sphi %s4825_s21, %s6165_s21  }
   0x3   : > { %p30_p1 = scmp.ge.s32.totalorder %s28_s24, 2  ;;  %p233_p2 = scmp.lt.s32.totalorder %s4783_s23, 3 }
   0x5   : > { %s6168_s24 = smov (%p30_p1, %s28_s24), 0  ;;  %p234_p3 = pnand %p3777_p0, %p233_p2 }
   0x6   : > { %p272_p4 = scmp.lt.s32.totalorder (!%p234_p3), %s4775_s21, 1  ;;  %vm493_vm0 = vcmask (!%p234_p3), 1040384   ;;  %vm494_vm1 = vcmask (!%p234_p3), 1041408   ;;  %v4785_v0 = vmov (!%p234_p3), 0   ;;  %v4786_v1 = vmov (!%p234_p3), 65535   ;;  %v4864_v18 = vld [vmem:[%s6162_s4] sm:$0xff] (!%p234_p3) }
   0x7   : > { %237 = sbr.rel (%p234_p3) target bundleno = 1493 (0x5d5), region = 44  ;;  %553 = vmatprep.mubr.bf16.mxu0 (!%p234_p3), %v4785_v0  ;;  %666 = vmatprep.mubr.bf16.mxu1 (!%p234_p3), %v4785_v0  ;;  %v495_v2 = vsel (!%p234_p3), %vm493_vm0, 4294967295, %v4786_v1  ;;  %v4870_v25 = vld [vmem:[%s6162_s4 + $0x10] sm:$0xff] (!%p234_p3)  ;;  %v4876_v28 = vld [vmem:[%s6159_s1] sm:$0xff] (!%p234_p3)   ;;  %v4881_v29 = vld [vmem:[%s6162_s4 + $0x8] sm:$0xff] (!%p234_p3)  ;;  %vm468_vm2 = vcmask (!%p234_p3), 23552  }
   0x8   : > { %3911 = vset.pattern.permute.xlu0 (!%p234_p3), %v4785_v0  ;;  %3912 = vset.pattern.permute.xlu1 (!%p234_p3), %v4785_v0  ;;  %v496_v3 = vsel (!%p234_p3), %vm494_vm1, %v495_v2, 0  ;;  %v4886_v30 = vld [vmem:[%s6162_s4 + $0x18] sm:$0xff] (!%p234_p3)  ;;  %v4891_v33 = vld [vmem:[%s6162_s4 + $0x20] sm:$0xff] (!%p234_p3)  ;;  %v4896_v34 = vld [vmem:[%s6162_s4 + $0x28] sm:$0xff] (!%p234_p3)  ;;  %v4787_v61 = vmov (!%p234_p3), 1  }
   0x9   : > { %350 = vperm.xlu0 (!%p234_p3), %3911, %v4864_v18   ;;  %360 = vperm.xlu1 (!%p234_p3), %3912, %v4870_v25   ;;  %v3926_v35 = vld [vmem:[%s6159_s1 + $0x8] sm:$0xff] (!%p234_p3)   ;;  %v4912_v36 = vld [vmem:[%s6162_s4 + $0x30] sm:$0xff] (!%p234_p3)  ;;  %v4917_v37 = vld [vmem:[%s6162_s4 + $0x38] sm:$0xff] (!%p234_p3) }
   0xa   : > { %v4924_v38 = vld [vmem:[%s6162_s4 + $0x40] sm:$0xff] (!%p234_p3)  ;;  %v4929_v39 = vld [vmem:[%s6162_s4 + $0x48] sm:$0xff] (!%p234_p3)  ;;  %v3927_v40 = vld [vmem:[%s6159_s1 + $0x10] sm:$0xff] (!%p234_p3)  }
   0xb   : > { %v4943_v41 = vld [vmem:[%s6162_s4 + $0x50] sm:$0xff] (!%p234_p3)  ;;  %v4948_v42 = vld [vmem:[%s6162_s4 + $0x58] sm:$0xff] (!%p234_p3)  ;;  %v4959_v43 = vld [vmem:[%s6162_s4 + $0x60] sm:$0xff] (!%p234_p3) }
   0xc   : > { %v4964_v44 = vld [vmem:[%s6162_s4 + $0x68] sm:$0xff] (!%p234_p3)  ;;  %v3928_v45 = vld [vmem:[%s6159_s1 + $0x18] sm:$0xff] (!%p234_p3)   ;;  %v4976_v46 = vld [vmem:[%s6162_s4 + $0x70] sm:$0xff] (!%p234_p3) }
   0xd   : > { %355 = vperm.xlu0 (!%p234_p3), %3911, %v4881_v29   ;;  %365 = vperm.xlu1 (!%p234_p3), %3912, %v4886_v30   ;;  %v4981_v47 = vld [vmem:[%s6162_s4 + $0x78] sm:$0xff] (!%p234_p3)  ;;  %v3929_v48 = vld [vmem:[%s6159_s1 + $0x20] sm:$0xff] (!%p234_p3)   ;;  %v3930_v49 = vld [vmem:[%s6159_s1 + $0x28] sm:$0xff] (!%p234_p3)  }
   0xe   : > { %s6170_s21 = smov (!%p272_p4, %s4775_s21), 1  ;;  %v3931_v50 = vld [vmem:[%s6159_s1 + $0x30] sm:$0xff]   ;;  %v3932_v51 = vld [vmem:[%s6159_s1 + $0x38] sm:$0xff]  }
   0xf   : > { %s3880_s25 = sshll.u32 %s6170_s21, 5 }
  0x10   : > { %s4855_s28 = scalar_lea.vmem %s6158_s0, %s3880_s25  ;;  %s289_s9 = scalar_lea.vmem %s6164_s6, %s3880_s25 }
  0x11   : > { %v292_v4 = vld [vmem:[%s4855_s28] sm:$0x77]  ;;  %v293_v5 = vld [vmem:[%s4855_s28 + $0x8] sm:$0x77]  ;;  %v294_v6 = vld [vmem:[%s4855_s28 + $0x10] sm:$0x77]  ;;  %370 = vperm.xlu0 %3911, %v4891_v33   ;;  %375 = vperm.xlu1 %3912, %v4896_v34  }
  0x12   : > { %v300_v7 = vcombine.high %v292_v4, %v292_v4  ;;  %v301_v8 = vcombine.high %v293_v5, %v293_v5  ;;  %v308_v9 = vpack.c.bf16 %v292_v4, %v292_v4  ;;  %v310_v10 = vpack.c.bf16 %v293_v5, %v293_v5  ;;  %v295_v11 = vld [vmem:[%s4855_s28 + $0x18] sm:$0x77] }
  0x13   : > { %v302_v12 = vcombine.high %v294_v6, %v294_v6  ;;  %v303_v13 = vcombine.high %v295_v11, %v295_v11  ;;  %v312_v16 = vpack.c.bf16 %v294_v6, %v294_v6  ;;  %v314_v17 = vpack.c.bf16 %v295_v11, %v295_v11 }
  0x14   : > { %v309_v14 = vpack.c.bf16 %v300_v7, %v300_v7  ;;  %v311_v15 = vpack.c.bf16 %v301_v8, %v301_v8  ;;  %v498_v19 = vand.u32 %v496_v3, %v308_v9  ;;  %v504_v20 = vand.u32 %v496_v3, %v310_v10 }
  0x15   : > { %v313_v21 = vpack.c.bf16 %v302_v12, %v302_v12  ;;  %v315_v22 = vpack.c.bf16 %v303_v13, %v303_v13  ;;  %v510_v31 = vand.u32 %v496_v3, %v312_v16  ;;  %v516_v32 = vand.u32 %v496_v3, %v314_v17  ;;  %380 = vperm.xlu0 %3911, %v4912_v36  }
  0x16   : > { %v501_v23 = vand.u32 %v496_v3, %v309_v14  ;;  %v507_v24 = vand.u32 %v496_v3, %v311_v15  ;;  %385 = vperm.xlu1 %3912, %v4917_v37  }
  0x17   : > { %v513_v26 = vand.u32 %v496_v3, %v313_v21  ;;  %v519_v27 = vand.u32 %v496_v3, %v315_v22 }
  0x18   : > { %521 = vmatprep.subr.bf16.mxu0 %v501_v23  ;;  %634 = vmatprep.subr.bf16.mxu1 %v507_v24 }
  0x19   : > { %522 = vmatpush1.bf16.msra.mxu0 %v498_v19  ;;  %635 = vmatpush1.bf16.msra.mxu1 %v504_v20 }
  0x1a   : > { %747 = vmatprep.subr.bf16.mxu0 %v513_v26  ;;  %860 = vmatprep.subr.bf16.mxu1 %v519_v27 }
  0x1b   : > { %390 = vperm.xlu0 %3911, %v4924_v38   ;;  %395 = vperm.xlu1 %3912, %v4929_v39  }
  0x1c   : > { %3790 = vmatmul.mubr.msk.bf16.vlgmr.msra.gmra.mrb[0].mxu0 %vm468_vm2, %v4876_v28  ;;  %3798 = vmatmul.mubr.msk.bf16.vlgmr.msra.gmra.mrb[0].mxu1 %vm468_vm2, %v4876_v28 }
  0x1d   : > { %748 = vmatpush1.bf16.msra.mxu0 %v510_v31  ;;  %861 = vmatpush1.bf16.msra.mxu1 %v516_v32 }
  0x1e   : > { %563 = vmatprep.mubr.bf16.mxu0 %v4785_v0  ;;  %676 = vmatprep.mubr.bf16.mxu1 %v4785_v0 }
  0x1f   : > { %400 = vperm.xlu0 %3911, %v4943_v41   ;;  %405 = vperm.xlu1 %3912, %v4948_v42  }
  0x23   : > { %410 = vperm.xlu0 %3911, %v4959_v43   ;;  %415 = vperm.xlu1 %3912, %v4964_v44  }
  0x24   : > { %3791 = vmatmul.mubr.msk.bf16.gmra.mrb[4].mxu0 %vm468_vm2, %v3926_v35  ;;  %3799 = vmatmul.mubr.msk.bf16.gmra.mrb[4].mxu1 %vm468_vm2, %v3926_v35 }
  0x25   : > { %573 = vmatprep.mubr.bf16.mxu0 %v4785_v0  ;;  %686 = vmatprep.mubr.bf16.mxu1 %v4785_v0 }
  0x27   : > { %420 = vperm.xlu0 %3911, %v4976_v46   ;;  %425 = vperm.xlu1 %3912, %v4981_v47  }
  0x2b   : > { %3914 = vset.pattern.permute.xlu1 %v4787_v61  ;;  %3913 = vset.pattern.permute.xlu0 %v4787_v61 }
  0x2c   : > { %3792 = vmatmul.mubr.msk.bf16.gmra.mrb[8].mxu0 %vm468_vm2, %v3927_v40  ;;  %3800 = vmatmul.mubr.msk.bf16.gmra.mrb[8].mxu1 %vm468_vm2, %v3927_v40 }
  0x2d   : > { %583 = vmatprep.mubr.bf16.mxu0 %v4785_v0  ;;  %696 = vmatprep.mubr.bf16.mxu1 %v4785_v0 }
  0x2e   : > { %1186 = vperm.xlu1 %3914, %v4881_v29   ;;  %1182 = vperm.xlu0 %3913, %v4864_v18  }
  0x32   : > { %1190 = vperm.xlu1 %3914, %v4870_v25   ;;  %1194 = vperm.xlu0 %3913, %v4886_v30  }
  0x34   : > { %3793 = vmatmul.mubr.msk.bf16.gmra.mrb[12].mxu0 %vm468_vm2, %v3928_v45  ;;  %3801 = vmatmul.mubr.msk.bf16.gmra.mrb[12].mxu1 %vm468_vm2, %v3928_v45 }
  0x35   : > { %593 = vmatprep.mubr.bf16.mxu0 %v4785_v0  ;;  %706 = vmatprep.mubr.bf16.mxu1 %v4785_v0 }
  0x36   : > { %1198 = vperm.xlu1 %3914, %v4891_v33   ;;  %1202 = vperm.xlu0 %3913, %v4896_v34  }
  0x3a   : > { %1206 = vperm.xlu1 %3914, %v4912_v36   ;;  %1210 = vperm.xlu0 %3913, %v4917_v37  }
  0x3c   : > { %3794 = vmatmul.mubr.msk.bf16.gmra.mrb[16].mxu0 %vm468_vm2, %v3929_v48  ;;  %3802 = vmatmul.mubr.msk.bf16.gmra.mrb[16].mxu1 %vm468_vm2, %v3929_v48 }
  0x3d   : > { %603 = vmatprep.mubr.bf16.mxu0 %v4785_v0  ;;  %716 = vmatprep.mubr.bf16.mxu1 %v4785_v0 }
  0x3e   : > { %1214 = vperm.xlu1 %3914, %v4924_v38   ;;  %1218 = vperm.xlu0 %3913, %v4929_v39  }
  0x42   : > { %1222 = vperm.xlu1 %3914, %v4943_v41   ;;  %1226 = vperm.xlu0 %3913, %v4948_v42  }
  0x44   : > { %3795 = vmatmul.mubr.msk.bf16.gmra.mrb[20].mxu0 %vm468_vm2, %v3930_v49  ;;  %3803 = vmatmul.mubr.msk.bf16.gmra.mrb[20].mxu1 %vm468_vm2, %v3930_v49 }
  0x45   : > { %613 = vmatprep.mubr.bf16.mxu0 %v4785_v0  ;;  %726 = vmatprep.mubr.bf16.mxu1 %v4785_v0 }
  0x46   : > { %1230 = vperm.xlu1 %3914, %v4959_v43   ;;  %1234 = vperm.xlu0 %3913, %v4964_v44  }
  0x4a   : > { %1238 = vperm.xlu1 %3914, %v4976_v46   ;;  %1242 = vperm.xlu0 %3913, %v4981_v47  }
  0x4c   : > { %3796 = vmatmul.mubr.msk.bf16.gmra.mrb[24].mxu0 %vm468_vm2, %v3931_v50  ;;  %3804 = vmatmul.mubr.msk.bf16.gmra.mrb[24].mxu1 %vm468_vm2, %v3931_v50 }
  0x4d   : > { %623 = vmatprep.mubr.bf16.mxu0 %v4785_v0  ;;  %736 = vmatprep.mubr.bf16.mxu1 %v4785_v0 }
  0x54   : > { %3797 = vmatmul.mubr.msk.bf16.gmra.mrb[28].mxu0 %vm468_vm2, %v3932_v51  ;;  %3805 = vmatmul.mubr.msk.bf16.gmra.mrb[28].mxu1 %vm468_vm2, %v3932_v51 }
  0x55   : > { %779 = vmatprep.mubr.bf16.mxu0 %v4785_v0  ;;  %892 = vmatprep.mubr.bf16.mxu1 %v4785_v0 }
  0x5c   : > { %3806 = vmatmul.mubr.msk.bf16.vlgmr.msra.gmra.mrb[32].mxu0 %vm468_vm2, %v4876_v28  ;;  %3814 = vmatmul.mubr.msk.bf16.vlgmr.msra.gmra.mrb[32].mxu1 %vm468_vm2, %v4876_v28 }
  0x5d   : > { %789 = vmatprep.mubr.bf16.mxu0 %v4785_v0  ;;  %902 = vmatprep.mubr.bf16.mxu1 %v4785_v0 }
  0x64   : > { %3807 = vmatmul.mubr.msk.bf16.gmra.mrb[36].mxu0 %vm468_vm2, %v3926_v35  ;;  %3815 = vmatmul.mubr.msk.bf16.gmra.mrb[36].mxu1 %vm468_vm2, %v3926_v35 }
  0x65   : > { %799 = vmatprep.mubr.bf16.mxu0 %v4785_v0  ;;  %912 = vmatprep.mubr.bf16.mxu1 %v4785_v0 }
  0x6c   : > { %3808 = vmatmul.mubr.msk.bf16.gmra.mrb[40].mxu0 %vm468_vm2, %v3927_v40  ;;  %3816 = vmatmul.mubr.msk.bf16.gmra.mrb[40].mxu1 %vm468_vm2, %v3927_v40 }
  0x6d   : > { %809 = vmatprep.mubr.bf16.mxu0 %v4785_v0  ;;  %922 = vmatprep.mubr.bf16.mxu1 %v4785_v0 }
  0x74   : > { %3809 = vmatmul.mubr.msk.bf16.gmra.mrb[44].mxu0 %vm468_vm2, %v3928_v45  ;;  %3817 = vmatmul.mubr.msk.bf16.gmra.mrb[44].mxu1 %vm468_vm2, %v3928_v45 }
  0x75   : > { %819 = vmatprep.mubr.bf16.mxu0 %v4785_v0  ;;  %932 = vmatprep.mubr.bf16.mxu1 %v4785_v0 }
  0x7c   : > { %3810 = vmatmul.mubr.msk.bf16.gmra.mrb[48].mxu0 %vm468_vm2, %v3929_v48  ;;  %3818 = vmatmul.mubr.msk.bf16.gmra.mrb[48].mxu1 %vm468_vm2, %v3929_v48 }
  0x7d   : > { %829 = vmatprep.mubr.bf16.mxu0 %v4785_v0  ;;  %942 = vmatprep.mubr.bf16.mxu1 %v4785_v0 }
  0x84   : > { %3811 = vmatmul.mubr.msk.bf16.gmra.mrb[52].mxu0 %vm468_vm2, %v3930_v49  ;;  %3819 = vmatmul.mubr.msk.bf16.gmra.mrb[52].mxu1 %vm468_vm2, %v3930_v49 }
  0x85   : > { %839 = vmatprep.mubr.bf16.mxu0 %v4785_v0  ;;  %952 = vmatprep.mubr.bf16.mxu1 %v4785_v0 }
  0x88   : > { %v5051_v52 = vpop.permute.xlu0 %350  ;;  %v5055_v54 = vpop.permute.xlu1 %360 }
  0x8c   : > { %3812 = vmatmul.mubr.msk.bf16.gmra.mrb[56].mxu0 %vm468_vm2, %v3931_v50  ;;  %3820 = vmatmul.mubr.msk.bf16.gmra.mrb[56].mxu1 %vm468_vm2, %v3931_v50  ;;  %v5053_v53 = vpop.permute.xlu0 %355  ;;  %v5069_v17 = vpop.permute.xlu1 %365 }
  0x8d   : > { %849 = vmatprep.mubr.bf16.mxu0 %v4785_v0  ;;  %962 = vmatprep.mubr.bf16.mxu1 %v4785_v0 }
  0x90   : > { %v5081_v61 = vpop.permute.xlu0 %370 }
  0x94   : > { %3813 = vmatmul.mubr.msk.bf16.gmra.mrb[60].mxu0 %vm468_vm2, %v3932_v51  ;;  %3821 = vmatmul.mubr.msk.bf16.gmra.mrb[60].mxu1 %vm468_vm2, %v3932_v51 }
  0x95   : > { %1325 = vmatprep.mubr.bf16.mxu0 %v4785_v0  ;;  %1438 = vmatprep.mubr.bf16.mxu1 %v4785_v0 }
  0xef   : > { %v555_v55 = vpop.f32.mrb[0].mxu0  ;;  %v668_v56 = vpop.f32.mrb[0].mxu1 }
  0xf0   : > { %v556_v57 = vadd.f32 %v555_v55, %v5051_v52  ;;  %v669_v58 = vadd.f32 %v668_v56, %v5051_v52  ;;  %v557_v59 = vpop.f32.mrb[1].mxu0  ;;  %v670_v60 = vpop.f32.mrb[1].mxu1 }
  0xf1   : > { %v558_v62 = vadd.f32 %v557_v59, %v5051_v52  ;;  %v671_v63 = vadd.f32 %v670_v60, %v5051_v52  ;;  %v559_v1 = vpop.f32.mrb[2].mxu0  ;;  %v672_v2 = vpop.f32.mrb[2].mxu1 }
  0xf2   : > { %v560_v3 = vadd.f32 %v559_v1, %v5053_v53  ;;  %v673_v4 = vadd.f32 %v672_v2, %v5053_v53  ;;  %v561_v5 = vpop.f32.mrb[3].mxu0  ;;  %v674_v6 = vpop.f32.mrb[3].mxu1  ;;  %v973_v9 = vmax.f32 %v556_v57, 0.0  ;;  %v975_v10 = vmax.f32 %v669_v58, 0.0 }
  0xf3   : > { %v562_v7 = vadd.f32 %v561_v5, %v5053_v53  ;;  %v675_v8 = vadd.f32 %v674_v6, %v5053_v53  ;;  %v974_v13 = vmax.f32 %v558_v62, 0.0  ;;  %v976_v14 = vmax.f32 %v671_v63, 0.0  ;;  %v5083_v62 = vpop.permute.xlu1 %375 }
  0xf4   : > { %v981_v11 = vmax.f32 %v560_v3, 0.0  ;;  %v983_v12 = vmax.f32 %v673_v4, 0.0 }
  0xf5   : > { %v982_v15 = vmax.f32 %v562_v7, 0.0  ;;  %v984_v16 = vmax.f32 %v675_v8, 0.0 }
  0xf6   : > { %v1101_v18 = vpack.c.bf16 %v981_v11, %v973_v9  ;;  %v1103_v19 = vpack.c.bf16 %v983_v12, %v975_v10 }
  0xf7   : > { %v565_v20 = vpop.f32.mrb[4].mxu0  ;;  %v678_v21 = vpop.f32.mrb[4].mxu1  ;;  %v1102_v22 = vpack.c.bf16 %v982_v15, %v974_v13  ;;  %v1104_v23 = vpack.c.bf16 %v984_v16, %v976_v14 }
  0xf8   : > { %v566_v24 = vadd.f32 %v565_v20, %v5055_v54  ;;  %v679_v26 = vadd.f32 %v678_v21, %v5055_v54  ;;  %v567_v27 = vpop.f32.mrb[5].mxu0  ;;  %v680_v28 = vpop.f32.mrb[5].mxu1 }
  0xf9   : > { %v568_v29 = vadd.f32 %v567_v27, %v5055_v54  ;;  %v681_v25 = vadd.f32 %v680_v28, %v5055_v54  ;;  %v569_v31 = vpop.f32.mrb[6].mxu0  ;;  %v682_v30 = vpop.f32.mrb[6].mxu1  ;;  %1293 = vmatprep.subr.bf16.mxu0 %v1102_v22  ;;  %1406 = vmatprep.subr.bf16.mxu1 %v1104_v23 }
  0xfa   : > { %v570_v32 = vadd.f32 %v569_v31, %v5069_v17  ;;  %v683_v35 = vadd.f32 %v682_v30, %v5069_v17  ;;  %v571_v40 = vpop.f32.mrb[7].mxu0  ;;  %v684_v45 = vpop.f32.mrb[7].mxu1  ;;  %1294 = vmatpush1.bf16.msra.mxu0 %v1101_v18  ;;  %1407 = vmatpush1.bf16.msra.mxu1 %v1103_v19  ;;  %v989_v50 = vmax.f32 %v566_v24, 0.0  ;;  %v991_v51 = vmax.f32 %v679_v26, 0.0 }
  0xfb   : > { %v572_v48 = vadd.f32 %v571_v40, %v5069_v17  ;;  %v685_v49 = vadd.f32 %v684_v45, %v5069_v17  ;;  %v990_v57 = vmax.f32 %v568_v29, 0.0  ;;  %v992_v58 = vmax.f32 %v681_v25, 0.0  ;;  %v5097_v26 = vpop.permute.xlu0 %380  ;;  %v5099_v27 = vpop.permute.xlu1 %385 }
  0xfc   : > { %v997_v55 = vmax.f32 %v570_v32, 0.0  ;;  %v999_v56 = vmax.f32 %v683_v35, 0.0 }
  0xfd   : > { %v998_v59 = vmax.f32 %v572_v48, 0.0  ;;  %v1000_v60 = vmax.f32 %v685_v49, 0.0 }
  0xfe   : > { %v1109_v63 = vpack.c.bf16 %v997_v55, %v989_v50  ;;  %v1111_v1 = vpack.c.bf16 %v999_v56, %v991_v51 }
  0xff   : > { %v575_v2 = vpop.f32.mrb[8].mxu0  ;;  %v688_v3 = vpop.f32.mrb[8].mxu1  ;;  %v1110_v4 = vpack.c.bf16 %v998_v59, %v990_v57  ;;  %v1112_v33 = vpack.c.bf16 %v1000_v60, %v992_v58 }
 0x100   : > { %v576_v34 = vadd.f32 %v575_v2, %v5081_v61  ;;  %v689_v5 = vadd.f32 %v688_v3, %v5081_v61  ;;  %v577_v6 = vpop.f32.mrb[9].mxu0  ;;  %v690_v7 = vpop.f32.mrb[9].mxu1 }
 0x101   : > { %v578_v8 = vadd.f32 %v577_v6, %v5081_v61  ;;  %v691_v9 = vadd.f32 %v690_v7, %v5081_v61  ;;  %v579_v10 = vpop.f32.mrb[10].mxu0  ;;  %v692_v11 = vpop.f32.mrb[10].mxu1  ;;  %1295 = vmatprep.subr.bf16.mxu0 %v1110_v4  ;;  %1408 = vmatprep.subr.bf16.mxu1 %v1112_v33 }
 0x102   : > { %v580_v12 = vadd.f32 %v579_v10, %v5083_v62  ;;  %v693_v36 = vadd.f32 %v692_v11, %v5083_v62  ;;  %v581_v13 = vpop.f32.mrb[11].mxu0  ;;  %v694_v37 = vpop.f32.mrb[11].mxu1  ;;  %1296 = vmatpush1.bf16.msra.mxu0 %v1109_v63  ;;  %1409 = vmatpush1.bf16.msra.mxu1 %v1111_v1  ;;  %v1005_v16 = vmax.f32 %v576_v34, 0.0  ;;  %v1007_v18 = vmax.f32 %v689_v5, 0.0 }
 0x103   : > { %v582_v14 = vadd.f32 %v581_v13, %v5083_v62  ;;  %v695_v15 = vadd.f32 %v694_v37, %v5083_v62  ;;  %v1006_v21 = vmax.f32 %v578_v8, 0.0  ;;  %v1008_v22 = vmax.f32 %v691_v9, 0.0  ;;  %v5113_v33 = vpop.permute.xlu0 %390  ;;  %v5115_v34 = vpop.permute.xlu1 %395 }
 0x104   : > { %v1013_v19 = vmax.f32 %v580_v12, 0.0  ;;  %v1015_v20 = vmax.f32 %v693_v36, 0.0 }
 0x105   : > { %v1014_v23 = vmax.f32 %v582_v14, 0.0  ;;  %v1016_v24 = vmax.f32 %v695_v15, 0.0 }
 0x106   : > { %v1117_v28 = vpack.c.bf16 %v1013_v19, %v1005_v16  ;;  %v1119_v29 = vpack.c.bf16 %v1015_v20, %v1007_v18 }
 0x107   : > { %v1118_v25 = vpack.c.bf16 %v1014_v23, %v1006_v21  ;;  %v1120_v31 = vpack.c.bf16 %v1016_v24, %v1008_v22  ;;  %v585_v30 = vpop.f32.mrb[12].mxu0  ;;  %v698_v38 = vpop.f32.mrb[12].mxu1 }
 0x108   : > { %v586_v39 = vadd.f32 %v585_v30, %v5097_v26  ;;  %v699_v32 = vadd.f32 %v698_v38, %v5097_v26  ;;  %v587_v35 = vpop.f32.mrb[13].mxu0  ;;  %v700_v40 = vpop.f32.mrb[13].mxu1 }
 0x109   : > { %v588_v45 = vadd.f32 %v587_v35, %v5097_v26  ;;  %v701_v48 = vadd.f32 %v700_v40, %v5097_v26  ;;  %v589_v49 = vpop.f32.mrb[14].mxu0  ;;  %v702_v50 = vpop.f32.mrb[14].mxu1  ;;  %1297 = vmatprep.subr.bf16.mxu0 %v1118_v25  ;;  %1410 = vmatprep.subr.bf16.mxu1 %v1120_v31 }
 0x10a   : > { %v590_v51 = vadd.f32 %v589_v49, %v5099_v27  ;;  %v703_v41 = vadd.f32 %v702_v50, %v5099_v27  ;;  %v591_v55 = vpop.f32.mrb[15].mxu0  ;;  %v704_v42 = vpop.f32.mrb[15].mxu1  ;;  %1298 = vmatpush1.bf16.msra.mxu0 %v1117_v28  ;;  %1411 = vmatpush1.bf16.msra.mxu1 %v1119_v29  ;;  %v1021_v58 = vmax.f32 %v586_v39, 0.0  ;;  %v1023_v59 = vmax.f32 %v699_v32, 0.0 }
 0x10b   : > { %v592_v56 = vadd.f32 %v591_v55, %v5099_v27  ;;  %v705_v57 = vadd.f32 %v704_v42, %v5099_v27  ;;  %v1022_v1 = vmax.f32 %v588_v45, 0.0  ;;  %v1024_v2 = vmax.f32 %v701_v48, 0.0  ;;  %v5127_v31 = vpop.permute.xlu0 %400  ;;  %v5129_v30 = vpop.permute.xlu1 %405 }
 0x10c   : > { %v1029_v60 = vmax.f32 %v590_v51, 0.0  ;;  %v1031_v63 = vmax.f32 %v703_v41, 0.0 }
 0x10d   : > { %v1030_v3 = vmax.f32 %v592_v56, 0.0  ;;  %v1032_v4 = vmax.f32 %v705_v57, 0.0 }
 0x10e   : > { %v1125_v5 = vpack.c.bf16 %v1029_v60, %v1021_v58  ;;  %v1127_v6 = vpack.c.bf16 %v1031_v63, %v1023_v59 }
 0x10f   : > { %v1126_v7 = vpack.c.bf16 %v1030_v3, %v1022_v1  ;;  %v1128_v8 = vpack.c.bf16 %v1032_v4, %v1024_v2  ;;  %v595_v9 = vpop.f32.mrb[16].mxu0  ;;  %v708_v43 = vpop.f32.mrb[16].mxu1 }
 0x110   : > { %v596_v44 = vadd.f32 %v595_v9, %v5113_v33  ;;  %v709_v10 = vadd.f32 %v708_v43, %v5113_v33  ;;  %v597_v11 = vpop.f32.mrb[17].mxu0  ;;  %v710_v12 = vpop.f32.mrb[17].mxu1 }
 0x111   : > { %v598_v36 = vadd.f32 %v597_v11, %v5113_v33  ;;  %v711_v13 = vadd.f32 %v710_v12, %v5113_v33  ;;  %v599_v37 = vpop.f32.mrb[18].mxu0  ;;  %v712_v14 = vpop.f32.mrb[18].mxu1  ;;  %1299 = vmatprep.subr.bf16.mxu0 %v1126_v7  ;;  %1412 = vmatprep.subr.bf16.mxu1 %v1128_v8 }
 0x112   : > { %v600_v15 = vadd.f32 %v599_v37, %v5115_v34  ;;  %v713_v46 = vadd.f32 %v712_v14, %v5115_v34  ;;  %v601_v16 = vpop.f32.mrb[19].mxu0  ;;  %v714_v47 = vpop.f32.mrb[19].mxu1  ;;  %1300 = vmatpush1.bf16.msra.mxu0 %v1125_v5  ;;  %1413 = vmatpush1.bf16.msra.mxu1 %v1127_v6  ;;  %v1037_v20 = vmax.f32 %v596_v44, 0.0  ;;  %v1039_v21 = vmax.f32 %v709_v10, 0.0 }
 0x113   : > { %v602_v18 = vadd.f32 %v601_v16, %v5115_v34  ;;  %v715_v19 = vadd.f32 %v714_v47, %v5115_v34  ;;  %v1038_v24 = vmax.f32 %v598_v36, 0.0  ;;  %v1040_v28 = vmax.f32 %v711_v13, 0.0  ;;  %v5139_v43 = vpop.permute.xlu0 %410  ;;  %v5141_v44 = vpop.permute.xlu1 %415 }
 0x114   : > { %v1045_v22 = vmax.f32 %v600_v15, 0.0  ;;  %v1047_v23 = vmax.f32 %v713_v46, 0.0 }
 0x115   : > { %v1046_v29 = vmax.f32 %v602_v18, 0.0  ;;  %v1048_v25 = vmax.f32 %v715_v19, 0.0 }
 0x116   : > { %v1133_v38 = vpack.c.bf16 %v1045_v22, %v1037_v20  ;;  %v1135_v39 = vpack.c.bf16 %v1047_v23, %v1039_v21 }
 0x117   : > { %v1134_v32 = vpack.c.bf16 %v1046_v29, %v1038_v24  ;;  %v1136_v35 = vpack.c.bf16 %v1048_v25, %v1040_v28  ;;  %v605_v40 = vpop.f32.mrb[20].mxu0  ;;  %v718_v45 = vpop.f32.mrb[20].mxu1 }
 0x118   : > { %v606_v48 = vadd.f32 %v605_v40, %v5127_v31  ;;  %v719_v49 = vadd.f32 %v718_v45, %v5127_v31  ;;  %v607_v50 = vpop.f32.mrb[21].mxu0  ;;  %v720_v51 = vpop.f32.mrb[21].mxu1 }
 0x119   : > { %v608_v41 = vadd.f32 %v607_v50, %v5127_v31  ;;  %v721_v55 = vadd.f32 %v720_v51, %v5127_v31  ;;  %v609_v42 = vpop.f32.mrb[22].mxu0  ;;  %v722_v56 = vpop.f32.mrb[22].mxu1  ;;  %1301 = vmatprep.subr.bf16.mxu0 %v1134_v32  ;;  %1414 = vmatprep.subr.bf16.mxu1 %v1136_v35 }
 0x11a   : > { %v610_v57 = vadd.f32 %v609_v42, %v5129_v30  ;;  %v723_v58 = vadd.f32 %v722_v56, %v5129_v30  ;;  %v611_v59 = vpop.f32.mrb[23].mxu0  ;;  %v724_v60 = vpop.f32.mrb[23].mxu1  ;;  %1302 = vmatpush1.bf16.msra.mxu0 %v1133_v38  ;;  %1415 = vmatpush1.bf16.msra.mxu1 %v1135_v39  ;;  %v1053_v2 = vmax.f32 %v606_v48, 0.0  ;;  %v1055_v3 = vmax.f32 %v719_v49, 0.0 }
 0x11b   : > { %v612_v63 = vadd.f32 %v611_v59, %v5129_v30  ;;  %v725_v1 = vadd.f32 %v724_v60, %v5129_v30  ;;  %v1054_v6 = vmax.f32 %v608_v41, 0.0  ;;  %v1056_v7 = vmax.f32 %v721_v55, 0.0  ;;  %v5151_v49 = vpop.permute.xlu0 %420  ;;  %v5153_v50 = vpop.permute.xlu1 %425 }
 0x11c   : > { %v1061_v4 = vmax.f32 %v610_v57, 0.0  ;;  %v1063_v5 = vmax.f32 %v723_v58, 0.0 }
 0x11d   : > { %v1062_v8 = vmax.f32 %v612_v63, 0.0  ;;  %v1064_v9 = vmax.f32 %v725_v1, 0.0 }
 0x11e   : > { %v1141_v10 = vpack.c.bf16 %v1061_v4, %v1053_v2  ;;  %v1143_v11 = vpack.c.bf16 %v1063_v5, %v1055_v3 }
 0x11f   : > { %v1142_v12 = vpack.c.bf16 %v1062_v8, %v1054_v6  ;;  %v1144_v36 = vpack.c.bf16 %v1064_v9, %v1056_v7  ;;  %v615_v13 = vpop.f32.mrb[24].mxu0  ;;  %v728_v37 = vpop.f32.mrb[24].mxu1 }
 0x120   : > { %v616_v14 = vadd.f32 %v615_v13, %v5139_v43  ;;  %v729_v15 = vadd.f32 %v728_v37, %v5139_v43  ;;  %v617_v46 = vpop.f32.mrb[25].mxu0  ;;  %v730_v16 = vpop.f32.mrb[25].mxu1 }
 0x121   : > { %v618_v47 = vadd.f32 %v617_v46, %v5139_v43  ;;  %v731_v18 = vadd.f32 %v730_v16, %v5139_v43  ;;  %v619_v19 = vpop.f32.mrb[26].mxu0  ;;  %v732_v20 = vpop.f32.mrb[26].mxu1  ;;  %1303 = vmatprep.subr.bf16.mxu0 %v1142_v12  ;;  %1416 = vmatprep.subr.bf16.mxu1 %v1144_v36 }
 0x122   : > { %v620_v21 = vadd.f32 %v619_v19, %v5141_v44  ;;  %v733_v22 = vadd.f32 %v732_v20, %v5141_v44  ;;  %v621_v23 = vpop.f32.mrb[27].mxu0  ;;  %v734_v24 = vpop.f32.mrb[27].mxu1  ;;  %1304 = vmatpush1.bf16.msra.mxu0 %v1141_v10  ;;  %1417 = vmatpush1.bf16.msra.mxu1 %v1143_v11  ;;  %v1069_v25 = vmax.f32 %v616_v14, 0.0  ;;  %v1071_v38 = vmax.f32 %v729_v15, 0.0 }
 0x123   : > { %v622_v28 = vadd.f32 %v621_v23, %v5141_v44  ;;  %v735_v29 = vadd.f32 %v734_v24, %v5141_v44  ;;  %v1070_v35 = vmax.f32 %v618_v47, 0.0  ;;  %v1072_v40 = vmax.f32 %v731_v18, 0.0 }
 0x124   : > { %v1077_v39 = vmax.f32 %v620_v21, 0.0  ;;  %v1079_v32 = vmax.f32 %v733_v22, 0.0 }
 0x125   : > { %v1078_v45 = vmax.f32 %v622_v28, 0.0  ;;  %v1080_v48 = vmax.f32 %v735_v29, 0.0 }
 0x126   : > { %v1149_v51 = vpack.c.bf16 %v1077_v39, %v1069_v25  ;;  %v1151_v41 = vpack.c.bf16 %v1079_v32, %v1071_v38  ;;  %v5170_v32 = vld [vmem:[%s6160_s2] sm:$0xff]  }
 0x127   : > { %v1150_v55 = vpack.c.bf16 %v1078_v45, %v1070_v35  ;;  %v1152_v42 = vpack.c.bf16 %v1080_v48, %v1072_v40  ;;  %v625_v56 = vpop.f32.mrb[28].mxu0  ;;  %v738_v57 = vpop.f32.mrb[28].mxu1 }
 0x128   : > { %v626_v58 = vadd.f32 %v625_v56, %v5151_v49  ;;  %v739_v59 = vadd.f32 %v738_v57, %v5151_v49  ;;  %v627_v60 = vpop.f32.mrb[29].mxu0  ;;  %v740_v63 = vpop.f32.mrb[29].mxu1 }
 0x129   : > { %v628_v1 = vadd.f32 %v627_v60, %v5151_v49  ;;  %v741_v2 = vadd.f32 %v740_v63, %v5151_v49  ;;  %v629_v3 = vpop.f32.mrb[30].mxu0  ;;  %v742_v4 = vpop.f32.mrb[30].mxu1  ;;  %1305 = vmatprep.subr.bf16.mxu0 %v1150_v55  ;;  %1418 = vmatprep.subr.bf16.mxu1 %v1152_v42 }
 0x12a   : > { %v630_v5 = vadd.f32 %v629_v3, %v5153_v50  ;;  %v743_v6 = vadd.f32 %v742_v4, %v5153_v50  ;;  %v631_v7 = vpop.f32.mrb[31].mxu0  ;;  %v744_v8 = vpop.f32.mrb[31].mxu1  ;;  %1306 = vmatpush1.bf16.msra.mxu0 %v1149_v51  ;;  %1419 = vmatpush1.bf16.msra.mxu1 %v1151_v41  ;;  %v1085_v11 = vmax.f32 %v626_v58, 0.0  ;;  %v1087_v12 = vmax.f32 %v739_v59, 0.0 }
 0x12b   : > { %v632_v9 = vadd.f32 %v631_v7, %v5153_v50  ;;  %v745_v10 = vadd.f32 %v744_v8, %v5153_v50  ;;  %v1086_v37 = vmax.f32 %v628_v1, 0.0  ;;  %v1088_v14 = vmax.f32 %v741_v2, 0.0 }
 0x12c   : > { %v1093_v36 = vmax.f32 %v630_v5, 0.0  ;;  %v1095_v13 = vmax.f32 %v743_v6, 0.0 }
 0x12d   : > { %v1094_v15 = vmax.f32 %v632_v9, 0.0  ;;  %v1096_v46 = vmax.f32 %v745_v10, 0.0 }
 0x12e   : > { %v1157_v16 = vpack.c.bf16 %v1093_v36, %v1085_v11  ;;  %v1159_v47 = vpack.c.bf16 %v1095_v13, %v1087_v12  ;;  %v5187_v36 = vld [vmem:[%s6160_s2 + $0x8] sm:$0xff]  }
 0x12f   : > { %v1158_v18 = vpack.c.bf16 %v1094_v15, %v1086_v37  ;;  %v1160_v19 = vpack.c.bf16 %v1096_v46, %v1088_v14  ;;  %v781_v20 = vpop.f32.mrb[32].mxu0  ;;  %v894_v21 = vpop.f32.mrb[32].mxu1 }
 0x130   : > { %v782_v22 = vadd.f32 %v781_v20, %v5051_v52  ;;  %v895_v23 = vadd.f32 %v894_v21, %v5051_v52  ;;  %v783_v24 = vpop.f32.mrb[33].mxu0  ;;  %v896_v28 = vpop.f32.mrb[33].mxu1 }
 0x131   : > { %v784_v29 = vadd.f32 %v783_v24, %v5051_v52  ;;  %v897_v25 = vadd.f32 %v896_v28, %v5051_v52  ;;  %v785_v38 = vpop.f32.mrb[34].mxu0  ;;  %v898_v39 = vpop.f32.mrb[34].mxu1  ;;  %1307 = vmatprep.subr.bf16.mxu0 %v1158_v18  ;;  %1420 = vmatprep.subr.bf16.mxu1 %v1160_v19 }
 0x132   : > { %v786_v35 = vadd.f32 %v785_v38, %v5053_v53  ;;  %v899_v40 = vadd.f32 %v898_v39, %v5053_v53  ;;  %v787_v45 = vpop.f32.mrb[35].mxu0  ;;  %v900_v48 = vpop.f32.mrb[35].mxu1  ;;  %1308 = vmatpush1.bf16.msra.mxu0 %v1157_v16  ;;  %1421 = vmatpush1.bf16.msra.mxu1 %v1159_v47  ;;  %v977_v41 = vmax.f32 %v782_v22, 0.0  ;;  %v979_v55 = vmax.f32 %v895_v23, 0.0 }
 0x133   : > { %v788_v51 = vadd.f32 %v787_v45, %v5053_v53  ;;  %v901_v52 = vadd.f32 %v900_v48, %v5053_v53  ;;  %v978_v57 = vmax.f32 %v784_v29, 0.0  ;;  %v980_v58 = vmax.f32 %v897_v25, 0.0 }
 0x134   : > { %v985_v42 = vmax.f32 %v786_v35, 0.0  ;;  %v987_v56 = vmax.f32 %v899_v40, 0.0 }
 0x135   : > { %v986_v59 = vmax.f32 %v788_v51, 0.0  ;;  %v988_v60 = vmax.f32 %v901_v52, 0.0  ;;  %1326 = vmatmul.mubr.bf16.vlgmr.msra.gmra.mrb[64].mxu0 %v5170_v32  ;;  %1439 = vmatmul.mubr.bf16.vlgmr.msra.gmra.mrb[64].mxu1 %v5170_v32 }
 0x136   : > { %v1105_v63 = vpack.c.bf16 %v985_v42, %v977_v41  ;;  %v1107_v1 = vpack.c.bf16 %v987_v56, %v979_v55  ;;  %1335 = vmatprep.mubr.bf16.mxu0 %v4785_v0  ;;  %1448 = vmatprep.mubr.bf16.mxu1 %v4785_v0  ;;  %v5204_v55 = vld [vmem:[%s6160_s2 + $0x10] sm:$0xff]  }
 0x137   : > { %v1106_v2 = vpack.c.bf16 %v986_v59, %v978_v57  ;;  %v1108_v53 = vpack.c.bf16 %v988_v60, %v980_v58  ;;  %v791_v3 = vpop.f32.mrb[36].mxu0  ;;  %v904_v4 = vpop.f32.mrb[36].mxu1 }
 0x138   : > { %v792_v5 = vadd.f32 %v791_v3, %v5055_v54  ;;  %v905_v6 = vadd.f32 %v904_v4, %v5055_v54  ;;  %v793_v7 = vpop.f32.mrb[37].mxu0  ;;  %v906_v8 = vpop.f32.mrb[37].mxu1 }
 0x139   : > { %v794_v9 = vadd.f32 %v793_v7, %v5055_v54  ;;  %v907_v10 = vadd.f32 %v906_v8, %v5055_v54  ;;  %v795_v11 = vpop.f32.mrb[38].mxu0  ;;  %v908_v12 = vpop.f32.mrb[38].mxu1  ;;  %1519 = vmatprep.subr.bf16.mxu0 %v1106_v2  ;;  %1632 = vmatprep.subr.bf16.mxu1 %v1108_v53 }
 0x13a   : > { %v796_v13 = vadd.f32 %v795_v11, %v5069_v17  ;;  %v909_v37 = vadd.f32 %v908_v12, %v5069_v17  ;;  %v797_v14 = vpop.f32.mrb[39].mxu0  ;;  %v910_v15 = vpop.f32.mrb[39].mxu1  ;;  %1520 = vmatpush1.bf16.msra.mxu0 %v1105_v63  ;;  %1633 = vmatpush1.bf16.msra.mxu1 %v1107_v1  ;;  %v993_v16 = vmax.f32 %v792_v5, 0.0  ;;  %v995_v47 = vmax.f32 %v905_v6, 0.0 }
 0x13b   : > { %v798_v46 = vadd.f32 %v797_v14, %v5069_v17  ;;  %v911_v54 = vadd.f32 %v910_v15, %v5069_v17  ;;  %v994_v20 = vmax.f32 %v794_v9, 0.0  ;;  %v996_v21 = vmax.f32 %v907_v10, 0.0 }
 0x13c   : > { %v1001_v18 = vmax.f32 %v796_v13, 0.0  ;;  %v1003_v19 = vmax.f32 %v909_v37, 0.0 }
 0x13d   : > { %v1002_v22 = vmax.f32 %v798_v46, 0.0  ;;  %v1004_v23 = vmax.f32 %v911_v54, 0.0  ;;  %1336 = vmatmul.mubr.bf16.gmra.mrb[68].mxu0 %v5187_v36  ;;  %1449 = vmatmul.mubr.bf16.gmra.mrb[68].mxu1 %v5187_v36 }
 0x13e   : > { %v1113_v24 = vpack.c.bf16 %v1001_v18, %v993_v16  ;;  %v1115_v28 = vpack.c.bf16 %v1003_v19, %v995_v47  ;;  %1345 = vmatprep.mubr.bf16.mxu0 %v4785_v0  ;;  %1458 = vmatprep.mubr.bf16.mxu1 %v4785_v0  ;;  %v5221_v16 = vld [vmem:[%s6160_s2 + $0x18] sm:$0xff]  }
 0x13f   : > { %v1114_v29 = vpack.c.bf16 %v1002_v22, %v994_v20  ;;  %v1116_v17 = vpack.c.bf16 %v1004_v23, %v996_v21  ;;  %v801_v25 = vpop.f32.mrb[40].mxu0  ;;  %v914_v38 = vpop.f32.mrb[40].mxu1 }
 0x140   : > { %v802_v39 = vadd.f32 %v801_v25, %v5081_v61  ;;  %v915_v35 = vadd.f32 %v914_v38, %v5081_v61  ;;  %v803_v40 = vpop.f32.mrb[41].mxu0  ;;  %v916_v45 = vpop.f32.mrb[41].mxu1 }
 0x141   : > { %v804_v48 = vadd.f32 %v803_v40, %v5081_v61  ;;  %v917_v51 = vadd.f32 %v916_v45, %v5081_v61  ;;  %v805_v52 = vpop.f32.mrb[42].mxu0  ;;  %v918_v41 = vpop.f32.mrb[42].mxu1  ;;  %1521 = vmatprep.subr.bf16.mxu0 %v1114_v29  ;;  %1634 = vmatprep.subr.bf16.mxu1 %v1116_v17 }
 0x142   : > { %v806_v42 = vadd.f32 %v805_v52, %v5083_v62  ;;  %v919_v56 = vadd.f32 %v918_v41, %v5083_v62  ;;  %v807_v57 = vpop.f32.mrb[43].mxu0  ;;  %v920_v58 = vpop.f32.mrb[43].mxu1  ;;  %1522 = vmatpush1.bf16.msra.mxu0 %v1113_v24  ;;  %1635 = vmatpush1.bf16.msra.mxu1 %v1115_v28  ;;  %v1009_v60 = vmax.f32 %v802_v39, 0.0  ;;  %v1011_v63 = vmax.f32 %v915_v35, 0.0 }
 0x143   : > { %v808_v59 = vadd.f32 %v807_v57, %v5083_v62  ;;  %v921_v61 = vadd.f32 %v920_v58, %v5083_v62  ;;  %v1010_v53 = vmax.f32 %v804_v48, 0.0  ;;  %v1012_v3 = vmax.f32 %v917_v51, 0.0 }
 0x144   : > { %v1017_v1 = vmax.f32 %v806_v42, 0.0  ;;  %v1019_v2 = vmax.f32 %v919_v56, 0.0 }
 0x145   : > { %v1018_v4 = vmax.f32 %v808_v59, 0.0  ;;  %v1020_v5 = vmax.f32 %v921_v61, 0.0  ;;  %1346 = vmatmul.mubr.bf16.gmra.mrb[72].mxu0 %v5204_v55  ;;  %1459 = vmatmul.mubr.bf16.gmra.mrb[72].mxu1 %v5204_v55  ;;  %v5238_v61 = vld [vmem:[%s6160_s2 + $0x20] sm:$0xff]  }
 0x146   : > { %v1121_v6 = vpack.c.bf16 %v1017_v1, %v1009_v60  ;;  %v1123_v7 = vpack.c.bf16 %v1019_v2, %v1011_v63  ;;  %1355 = vmatprep.mubr.bf16.mxu0 %v4785_v0  ;;  %1468 = vmatprep.mubr.bf16.mxu1 %v4785_v0 }
 0x147   : > { %v1122_v8 = vpack.c.bf16 %v1018_v4, %v1010_v53  ;;  %v1124_v62 = vpack.c.bf16 %v1020_v5, %v1012_v3  ;;  %v811_v9 = vpop.f32.mrb[44].mxu0  ;;  %v924_v10 = vpop.f32.mrb[44].mxu1 }
 0x148   : > { %v812_v11 = vadd.f32 %v811_v9, %v5097_v26  ;;  %v925_v12 = vadd.f32 %v924_v10, %v5097_v26  ;;  %v813_v13 = vpop.f32.mrb[45].mxu0  ;;  %v926_v37 = vpop.f32.mrb[45].mxu1 }
 0x149   : > { %v814_v14 = vadd.f32 %v813_v13, %v5097_v26  ;;  %v927_v15 = vadd.f32 %v926_v37, %v5097_v26  ;;  %v815_v46 = vpop.f32.mrb[46].mxu0  ;;  %v928_v54 = vpop.f32.mrb[46].mxu1  ;;  %1523 = vmatprep.subr.bf16.mxu0 %v1122_v8  ;;  %1636 = vmatprep.subr.bf16.mxu1 %v1124_v62 }
 0x14a   : > { %v816_v47 = vadd.f32 %v815_v46, %v5099_v27  ;;  %v929_v18 = vadd.f32 %v928_v54, %v5099_v27  ;;  %v817_v19 = vpop.f32.mrb[47].mxu0  ;;  %v930_v20 = vpop.f32.mrb[47].mxu1  ;;  %1524 = vmatpush1.bf16.msra.mxu0 %v1121_v6  ;;  %1637 = vmatpush1.bf16.msra.mxu1 %v1123_v7  ;;  %v1025_v22 = vmax.f32 %v812_v11, 0.0  ;;  %v1027_v23 = vmax.f32 %v925_v12, 0.0 }
 0x14b   : > { %v818_v21 = vadd.f32 %v817_v19, %v5099_v27  ;;  %v931_v26 = vadd.f32 %v930_v20, %v5099_v27  ;;  %v1026_v29 = vmax.f32 %v814_v14, 0.0  ;;  %v1028_v17 = vmax.f32 %v927_v15, 0.0 }
 0x14c   : > { %v1033_v24 = vmax.f32 %v816_v47, 0.0  ;;  %v1035_v28 = vmax.f32 %v929_v18, 0.0 }
 0x14d   : > { %v1034_v25 = vmax.f32 %v818_v21, 0.0  ;;  %v1036_v38 = vmax.f32 %v931_v26, 0.0  ;;  %1356 = vmatmul.mubr.bf16.gmra.mrb[76].mxu0 %v5221_v16  ;;  %1469 = vmatmul.mubr.bf16.gmra.mrb[76].mxu1 %v5221_v16  ;;  %v5255_v21 = vld [vmem:[%s6160_s2 + $0x28] sm:$0xff]  }
 0x14e   : > { %v1129_v39 = vpack.c.bf16 %v1033_v24, %v1025_v22  ;;  %v1131_v35 = vpack.c.bf16 %v1035_v28, %v1027_v23  ;;  %1365 = vmatprep.mubr.bf16.mxu0 %v4785_v0  ;;  %1478 = vmatprep.mubr.bf16.mxu1 %v4785_v0 }
 0x14f   : > { %v1130_v40 = vpack.c.bf16 %v1034_v25, %v1026_v29  ;;  %v1132_v27 = vpack.c.bf16 %v1036_v38, %v1028_v17  ;;  %v821_v45 = vpop.f32.mrb[48].mxu0  ;;  %v934_v48 = vpop.f32.mrb[48].mxu1 }
 0x150   : > { %v822_v51 = vadd.f32 %v821_v45, %v5113_v33  ;;  %v935_v52 = vadd.f32 %v934_v48, %v5113_v33  ;;  %v823_v41 = vpop.f32.mrb[49].mxu0  ;;  %v936_v42 = vpop.f32.mrb[49].mxu1 }
 0x151   : > { %v824_v56 = vadd.f32 %v823_v41, %v5113_v33  ;;  %v937_v57 = vadd.f32 %v936_v42, %v5113_v33  ;;  %v825_v58 = vpop.f32.mrb[50].mxu0  ;;  %v938_v59 = vpop.f32.mrb[50].mxu1  ;;  %1525 = vmatprep.subr.bf16.mxu0 %v1130_v40  ;;  %1638 = vmatprep.subr.bf16.mxu1 %v1132_v27 }
 0x152   : > { %v826_v60 = vadd.f32 %v825_v58, %v5115_v34  ;;  %v939_v63 = vadd.f32 %v938_v59, %v5115_v34  ;;  %v827_v1 = vpop.f32.mrb[51].mxu0  ;;  %v940_v2 = vpop.f32.mrb[51].mxu1  ;;  %1526 = vmatpush1.bf16.msra.mxu0 %v1129_v39  ;;  %1639 = vmatpush1.bf16.msra.mxu1 %v1131_v35  ;;  %v1041_v3 = vmax.f32 %v822_v51, 0.0  ;;  %v1043_v4 = vmax.f32 %v935_v52, 0.0 }
 0x153   : > { %v828_v53 = vadd.f32 %v827_v1, %v5115_v34  ;;  %v941_v33 = vadd.f32 %v940_v2, %v5115_v34  ;;  %v1042_v7 = vmax.f32 %v824_v56, 0.0  ;;  %v1044_v8 = vmax.f32 %v937_v57, 0.0  ;;  %v5272_v2 = vld [vmem:[%s6160_s2 + $0x30] sm:$0xff]  }
 0x154   : > { %v1049_v5 = vmax.f32 %v826_v60, 0.0  ;;  %v1051_v6 = vmax.f32 %v939_v63, 0.0 }
 0x155   : > { %v1050_v62 = vmax.f32 %v828_v53, 0.0  ;;  %v1052_v9 = vmax.f32 %v941_v33, 0.0  ;;  %1366 = vmatmul.mubr.bf16.gmra.mrb[80].mxu0 %v5238_v61  ;;  %1479 = vmatmul.mubr.bf16.gmra.mrb[80].mxu1 %v5238_v61 }
 0x156   : > { %v1137_v10 = vpack.c.bf16 %v1049_v5, %v1041_v3  ;;  %v1139_v11 = vpack.c.bf16 %v1051_v6, %v1043_v4  ;;  %1375 = vmatprep.mubr.bf16.mxu0 %v4785_v0  ;;  %1488 = vmatprep.mubr.bf16.mxu1 %v4785_v0 }
 0x157   : > { %v1138_v12 = vpack.c.bf16 %v1050_v62, %v1042_v7  ;;  %v1140_v34 = vpack.c.bf16 %v1052_v9, %v1044_v8  ;;  %v831_v13 = vpop.f32.mrb[52].mxu0  ;;  %v944_v37 = vpop.f32.mrb[52].mxu1 }
 0x158   : > { %v832_v14 = vadd.f32 %v831_v13, %v5127_v31  ;;  %v945_v15 = vadd.f32 %v944_v37, %v5127_v31  ;;  %v833_v46 = vpop.f32.mrb[53].mxu0  ;;  %v946_v54 = vpop.f32.mrb[53].mxu1 }
 0x159   : > { %v834_v47 = vadd.f32 %v833_v46, %v5127_v31  ;;  %v947_v18 = vadd.f32 %v946_v54, %v5127_v31  ;;  %v835_v19 = vpop.f32.mrb[54].mxu0  ;;  %v948_v20 = vpop.f32.mrb[54].mxu1  ;;  %1527 = vmatprep.subr.bf16.mxu0 %v1138_v12  ;;  %1640 = vmatprep.subr.bf16.mxu1 %v1140_v34 }
 0x15a   : > { %v836_v26 = vadd.f32 %v835_v19, %v5129_v30  ;;  %v949_v22 = vadd.f32 %v948_v20, %v5129_v30  ;;  %v837_v23 = vpop.f32.mrb[55].mxu0  ;;  %v950_v24 = vpop.f32.mrb[55].mxu1  ;;  %1528 = vmatpush1.bf16.msra.mxu0 %v1137_v10  ;;  %1641 = vmatpush1.bf16.msra.mxu1 %v1139_v11  ;;  %v1057_v29 = vmax.f32 %v832_v14, 0.0  ;;  %v1059_v17 = vmax.f32 %v945_v15, 0.0 }
 0x15b   : > { %v838_v28 = vadd.f32 %v837_v23, %v5129_v30  ;;  %v951_v31 = vadd.f32 %v950_v24, %v5129_v30  ;;  %v1058_v39 = vmax.f32 %v834_v47, 0.0  ;;  %v1060_v35 = vmax.f32 %v947_v18, 0.0  ;;  %v3940_v23 = vld [vmem:[%s6160_s2 + $0x38] sm:$0xff]  }
 0x15c   : > { %v1065_v25 = vmax.f32 %v836_v26, 0.0  ;;  %v1067_v38 = vmax.f32 %v949_v22, 0.0 }
 0x15d   : > { %v1066_v40 = vmax.f32 %v838_v28, 0.0  ;;  %v1068_v27 = vmax.f32 %v951_v31, 0.0  ;;  %1376 = vmatmul.mubr.bf16.gmra.mrb[84].mxu0 %v5255_v21  ;;  %1489 = vmatmul.mubr.bf16.gmra.mrb[84].mxu1 %v5255_v21 }
 0x15e   : > { %v1145_v45 = vpack.c.bf16 %v1065_v25, %v1057_v29  ;;  %v1147_v48 = vpack.c.bf16 %v1067_v38, %v1059_v17  ;;  %1385 = vmatprep.mubr.bf16.mxu0 %v4785_v0  ;;  %1498 = vmatprep.mubr.bf16.mxu1 %v4785_v0 }
 0x15f   : > { %v1146_v51 = vpack.c.bf16 %v1066_v40, %v1058_v39  ;;  %v1148_v30 = vpack.c.bf16 %v1068_v27, %v1060_v35  ;;  %v841_v52 = vpop.f32.mrb[56].mxu0  ;;  %v954_v41 = vpop.f32.mrb[56].mxu1 }
 0x160   : > { %v842_v42 = vadd.f32 %v841_v52, %v5139_v43  ;;  %v955_v56 = vadd.f32 %v954_v41, %v5139_v43  ;;  %v843_v57 = vpop.f32.mrb[57].mxu0  ;;  %v956_v58 = vpop.f32.mrb[57].mxu1 }
 0x161   : > { %v844_v59 = vadd.f32 %v843_v57, %v5139_v43  ;;  %v957_v60 = vadd.f32 %v956_v58, %v5139_v43  ;;  %v845_v63 = vpop.f32.mrb[58].mxu0  ;;  %v958_v1 = vpop.f32.mrb[58].mxu1  ;;  %1529 = vmatprep.subr.bf16.mxu0 %v1146_v51  ;;  %1642 = vmatprep.subr.bf16.mxu1 %v1148_v30 }
 0x162   : > { %v846_v53 = vadd.f32 %v845_v63, %v5141_v44  ;;  %v959_v33 = vadd.f32 %v958_v1, %v5141_v44  ;;  %v847_v3 = vpop.f32.mrb[59].mxu0  ;;  %v960_v4 = vpop.f32.mrb[59].mxu1  ;;  %1530 = vmatpush1.bf16.msra.mxu0 %v1145_v45  ;;  %1643 = vmatpush1.bf16.msra.mxu1 %v1147_v48  ;;  %v1073_v6 = vmax.f32 %v842_v42, 0.0  ;;  %v1075_v7 = vmax.f32 %v955_v56, 0.0 }
 0x163   : > { %v848_v5 = vadd.f32 %v847_v3, %v5141_v44  ;;  %v961_v43 = vadd.f32 %v960_v4, %v5141_v44  ;;  %v1074_v9 = vmax.f32 %v844_v59, 0.0  ;;  %v1076_v10 = vmax.f32 %v957_v60, 0.0 }
 0x164   : > { %v1081_v8 = vmax.f32 %v846_v53, 0.0  ;;  %v1083_v62 = vmax.f32 %v959_v33, 0.0 }
 0x165   : > { %v1082_v11 = vmax.f32 %v848_v5, 0.0  ;;  %v1084_v12 = vmax.f32 %v961_v43, 0.0  ;;  %1386 = vmatmul.mubr.bf16.gmra.mrb[88].mxu0 %v5272_v2  ;;  %1499 = vmatmul.mubr.bf16.gmra.mrb[88].mxu1 %v5272_v2 }
 0x166   : > { %v1153_v34 = vpack.c.bf16 %v1081_v8, %v1073_v6  ;;  %v1155_v13 = vpack.c.bf16 %v1083_v62, %v1075_v7  ;;  %1395 = vmatprep.mubr.bf16.mxu0 %v4785_v0  ;;  %1508 = vmatprep.mubr.bf16.mxu1 %v4785_v0 }
 0x167   : > { %v1154_v37 = vpack.c.bf16 %v1082_v11, %v1074_v9  ;;  %v1156_v44 = vpack.c.bf16 %v1084_v12, %v1076_v10  ;;  %v851_v14 = vpop.f32.mrb[60].mxu0  ;;  %v964_v15 = vpop.f32.mrb[60].mxu1  ;;  %v4788_v9 = vmov 2  }
 0x168   : > { %v852_v46 = vadd.f32 %v851_v14, %v5151_v49  ;;  %v965_v54 = vadd.f32 %v964_v15, %v5151_v49  ;;  %v853_v47 = vpop.f32.mrb[61].mxu0  ;;  %v966_v18 = vpop.f32.mrb[61].mxu1  ;;  %3915 = vset.pattern.permute.xlu1 %v4788_v9  ;;  %3916 = vset.pattern.permute.xlu0 %v4788_v9 }
 0x169   : > { %v854_v19 = vadd.f32 %v853_v47, %v5151_v49  ;;  %v967_v20 = vadd.f32 %v966_v18, %v5151_v49  ;;  %v855_v26 = vpop.f32.mrb[62].mxu0  ;;  %v968_v22 = vpop.f32.mrb[62].mxu1  ;;  %1531 = vmatprep.subr.bf16.mxu0 %v1154_v37  ;;  %1644 = vmatprep.subr.bf16.mxu1 %v1156_v44  ;;  %v4726_v37 = vld [vmem:[%s6162_s4 + $0x8] sm:$0xff] }
 0x16a   : > { %v856_v24 = vadd.f32 %v855_v26, %v5153_v50  ;;  %v969_v28 = vadd.f32 %v968_v22, %v5153_v50  ;;  %v857_v31 = vpop.f32.mrb[63].mxu0  ;;  %v970_v29 = vpop.f32.mrb[63].mxu1  ;;  %1532 = vmatpush1.bf16.msra.mxu0 %v1153_v34  ;;  %1645 = vmatpush1.bf16.msra.mxu1 %v1155_v13  ;;  %v1089_v25 = vmax.f32 %v852_v46, 0.0  ;;  %v1091_v38 = vmax.f32 %v965_v54, 0.0  ;;  %v4725_v13 = vld [vmem:[%s6162_s4] sm:$0xff] }
 0x16b   : > { %v858_v17 = vadd.f32 %v857_v31, %v5153_v50  ;;  %v971_v49 = vadd.f32 %v970_v29, %v5153_v50  ;;  %v1090_v40 = vmax.f32 %v854_v19, 0.0  ;;  %v1092_v27 = vmax.f32 %v967_v20, 0.0  ;;  %v5325_v50 = vpop.permute.xlu0 %1182  ;;  %1955 = vperm.xlu1 %3915, %v4725_v13   ;;  %1959 = vperm.xlu0 %3916, %v4726_v37   ;;  %v4727_v20 = vld [vmem:[%s6162_s4 + $0x10] sm:$0xff]  ;;  %v4728_v26 = vld [vmem:[%s6162_s4 + $0x20] sm:$0xff] }
 0x16c   : > { %v1097_v39 = vmax.f32 %v856_v24, 0.0  ;;  %v1099_v35 = vmax.f32 %v969_v28, 0.0 }
 0x16d   : > { %v1098_v45 = vmax.f32 %v858_v17, 0.0  ;;  %v1100_v48 = vmax.f32 %v971_v49, 0.0  ;;  %1396 = vmatmul.mubr.bf16.gmra.mrb[92].mxu0 %v3940_v23  ;;  %1509 = vmatmul.mubr.bf16.gmra.mrb[92].mxu1 %v3940_v23 }
 0x16e   : > { %v1161_v51 = vpack.c.bf16 %v1097_v39, %v1089_v25  ;;  %v1163_v30 = vpack.c.bf16 %v1099_v35, %v1091_v38  ;;  %1551 = vmatprep.mubr.bf16.mxu0 %v4785_v0  ;;  %1664 = vmatprep.mubr.bf16.mxu1 %v4785_v0 }
 0x16f   : > { %v1162_v52 = vpack.c.bf16 %v1098_v45, %v1090_v40  ;;  %v1164_v41 = vpack.c.bf16 %v1100_v48, %v1092_v27  ;;  %v5339_v4 = vpop.permute.xlu0 %1194  ;;  %1963 = vperm.xlu1 %3915, %v4727_v20   ;;  %1971 = vperm.xlu0 %3916, %v4728_v26  }
 0x171   : > { %1533 = vmatprep.subr.bf16.mxu0 %v1162_v52  ;;  %1646 = vmatprep.subr.bf16.mxu1 %v1164_v41  ;;  %v4730_v52 = vld [vmem:[%s6162_s4 + $0x30] sm:$0xff] }
 0x172   : > { %1534 = vmatpush1.bf16.msra.mxu0 %v1161_v51  ;;  %1647 = vmatpush1.bf16.msra.mxu1 %v1163_v30  ;;  %v4729_v30 = vld [vmem:[%s6162_s4 + $0x18] sm:$0xff] }
 0x173   : > { %v5363_v24 = vpop.permute.xlu0 %1202  ;;  %1967 = vperm.xlu1 %3915, %v4729_v30   ;;  %1979 = vperm.xlu0 %3916, %v4730_v52  }
 0x175   : > { %1552 = vmatmul.mubr.bf16.vlgmr.msra.gmra.mrb[96].mxu0 %v5170_v32  ;;  %1665 = vmatmul.mubr.bf16.vlgmr.msra.gmra.mrb[96].mxu1 %v5170_v32  ;;  %v5327_v32 = vpop.permute.xlu1 %1186 }
 0x176   : > { %1561 = vmatprep.mubr.bf16.mxu0 %v4785_v0  ;;  %1674 = vmatprep.mubr.bf16.mxu1 %v4785_v0 }
 0x179   : > { %v5336_v33 = vpop.permute.xlu1 %1190 }
 0x17d   : > { %1562 = vmatmul.mubr.bf16.gmra.mrb[100].mxu0 %v5187_v36  ;;  %1675 = vmatmul.mubr.bf16.gmra.mrb[100].mxu1 %v5187_v36 }
 0x17e   : > { %1571 = vmatprep.mubr.bf16.mxu0 %v4785_v0  ;;  %1684 = vmatprep.mubr.bf16.mxu1 %v4785_v0 }
 0x185   : > { %1572 = vmatmul.mubr.bf16.gmra.mrb[104].mxu0 %v5204_v55  ;;  %1685 = vmatmul.mubr.bf16.gmra.mrb[104].mxu1 %v5204_v55 }
 0x186   : > { %1581 = vmatprep.mubr.bf16.mxu0 %v4785_v0  ;;  %1694 = vmatprep.mubr.bf16.mxu1 %v4785_v0 }
 0x18d   : > { %1582 = vmatmul.mubr.bf16.gmra.mrb[108].mxu0 %v5221_v16  ;;  %1695 = vmatmul.mubr.bf16.gmra.mrb[108].mxu1 %v5221_v16 }
 0x18e   : > { %1591 = vmatprep.mubr.bf16.mxu0 %v4785_v0  ;;  %1704 = vmatprep.mubr.bf16.mxu1 %v4785_v0 }
 0x195   : > { %1592 = vmatmul.mubr.bf16.gmra.mrb[112].mxu0 %v5238_v61  ;;  %1705 = vmatmul.mubr.bf16.gmra.mrb[112].mxu1 %v5238_v61 }
 0x196   : > { %1601 = vmatprep.mubr.bf16.mxu0 %v4785_v0  ;;  %1714 = vmatprep.mubr.bf16.mxu1 %v4785_v0 }
 0x19d   : > { %1602 = vmatmul.mubr.bf16.gmra.mrb[116].mxu0 %v5255_v21  ;;  %1715 = vmatmul.mubr.bf16.gmra.mrb[116].mxu1 %v5255_v21 }
 0x19e   : > { %1611 = vmatprep.mubr.bf16.mxu0 %v4785_v0  ;;  %1724 = vmatprep.mubr.bf16.mxu1 %v4785_v0 }
 0x1a5   : > { %1612 = vmatmul.mubr.bf16.gmra.mrb[120].mxu0 %v5272_v2  ;;  %1725 = vmatmul.mubr.bf16.gmra.mrb[120].mxu1 %v5272_v2 }
 0x1a6   : > { %1621 = vmatprep.mubr.bf16.mxu0 %v4785_v0  ;;  %1734 = vmatprep.mubr.bf16.mxu1 %v4785_v0 }
 0x1ad   : > { %1622 = vmatmul.mubr.bf16.gmra.mrb[124].mxu0 %v3940_v23  ;;  %1735 = vmatmul.mubr.bf16.gmra.mrb[124].mxu1 %v3940_v23  ;;  %v5361_v23 = vpop.permute.xlu1 %1198 }
 0x1ae   : > { %2098 = vmatprep.mubr.bf16.mxu0 %v4785_v0  ;;  %2211 = vmatprep.mubr.bf16.mxu1 %v4785_v0 }
 0x208   : > { %v1327_v36 = vpop.f32.mrb[64].mxu0  ;;  %v1440_v55 = vpop.f32.mrb[64].mxu1 }
 0x209   : > { %v1328_v16 = vadd.f32 %v1327_v36, %v5325_v50  ;;  %v1441_v61 = vadd.f32 %v1440_v55, %v5325_v50  ;;  %v1329_v21 = vpop.f32.mrb[65].mxu0  ;;  %v1442_v42 = vpop.f32.mrb[65].mxu1 }
 0x20a   : > { %v1330_v56 = vadd.f32 %v1329_v21, %v5325_v50  ;;  %v1443_v57 = vadd.f32 %v1442_v42, %v5325_v50  ;;  %v1331_v58 = vpop.f32.mrb[66].mxu0  ;;  %v1444_v59 = vpop.f32.mrb[66].mxu1 }
 0x20b   : > { %3957 = vtanh.f32 %v1328_v16  ;;  %v1332_v60 = vadd.f32 %v1331_v58, %v5327_v32  ;;  %v1333_v63 = vpop.f32.mrb[67].mxu0  ;;  %v1446_v1 = vpop.f32.mrb[67].mxu1  ;;  %v1445_v2 = vadd.f32 %v1444_v59, %v5327_v32 }
 0x20c   : > { %3959 = vtanh.f32 %v1441_v61  ;;  %v1334_v53 = vadd.f32 %v1333_v63, %v5327_v32  ;;  %v1447_v3 = vadd.f32 %v1446_v1, %v5327_v32  ;;  %v4731_v1 = vld [vmem:[%s6162_s4 + $0x28] sm:$0xff] }
 0x20d   : > { %3961 = vtanh.f32 %v1330_v56  ;;  %1975 = vperm.xlu1 %3915, %v4731_v1  }
 0x20e   : > { %3963 = vtanh.f32 %v1443_v57 }
 0x20f   : > { %3965 = vtanh.f32 %v1332_v60 }
 0x210   : > { %3967 = vtanh.f32 %v1445_v2  ;;  %v1337_v5 = vpop.f32.mrb[68].mxu0  ;;  %v1450_v43 = vpop.f32.mrb[68].mxu1 }
 0x211   : > { %3969 = vtanh.f32 %v1334_v53  ;;  %v1338_v6 = vadd.f32 %v1337_v5, %v5336_v33  ;;  %v1451_v7 = vadd.f32 %v1450_v43, %v5336_v33  ;;  %v1339_v8 = vpop.f32.mrb[69].mxu0  ;;  %v1452_v62 = vpop.f32.mrb[69].mxu1 }
 0x212   : > { %3971 = vtanh.f32 %v1447_v3  ;;  %v1340_v10 = vadd.f32 %v1339_v8, %v5336_v33  ;;  %v1453_v11 = vadd.f32 %v1452_v62, %v5336_v33  ;;  %v1341_v12 = vpop.f32.mrb[70].mxu0  ;;  %v1454_v34 = vpop.f32.mrb[70].mxu1 }
 0x213   : > { %3973 = vtanh.f32 %v1338_v6  ;;  %v1342_v44 = vadd.f32 %v1341_v12, %v5339_v4  ;;  %v1343_v14 = vpop.f32.mrb[71].mxu0  ;;  %v1456_v15 = vpop.f32.mrb[71].mxu1  ;;  %v1455_v46 = vadd.f32 %v1454_v34, %v5339_v4 }
 0x214   : > { %3975 = vtanh.f32 %v1451_v7  ;;  %v1344_v47 = vadd.f32 %v1343_v14, %v5339_v4  ;;  %v1457_v19 = vadd.f32 %v1456_v15, %v5339_v4  ;;  %v5386_v53 = vpop.permute.xlu1 %1206  ;;  %v5388_v3 = vpop.permute.xlu0 %1210  ;;  %v4732_v7 = vld [vmem:[%s6162_s4 + $0x40] sm:$0xff]  ;;  %v4733_v15 = vld [vmem:[%s6162_s4 + $0x38] sm:$0xff] }
 0x215   : > { %v3958_v54 = vpop.eup %3957  ;;  %3977 = vtanh.f32 %v1340_v10  ;;  %1987 = vperm.xlu0 %3916, %v4732_v7   ;;  %1983 = vperm.xlu1 %3915, %v4733_v15   ;;  %v4738_v7 = vld [vmem:[%s6162_s4 + $0x70] sm:$0xff] }
 0x216   : > { %v3960_v18 = vpop.eup %3959  ;;  %3979 = vtanh.f32 %v1453_v11 }
 0x217   : > { %v3962_v22 = vpop.eup %3961  ;;  %3981 = vtanh.f32 %v1342_v44 }
 0x218   : > { %v3964_v28 = vpop.eup %3963  ;;  %3983 = vtanh.f32 %v1455_v46  ;;  %v1347_v31 = vpop.f32.mrb[72].mxu0 }
 0x219   : > { %v1460_v29 = vpop.f32.mrb[72].mxu1  ;;  %v3966_v17 = vpop.eup %3965  ;;  %3985 = vtanh.f32 %v1344_v47  ;;  %v1348_v49 = vadd.f32 %v1347_v31, %v5361_v23 }
 0x21a   : > { %v1461_v25 = vadd.f32 %v1460_v29, %v5361_v23  ;;  %v1349_v38 = vpop.f32.mrb[73].mxu0  ;;  %v1462_v39 = vpop.f32.mrb[73].mxu1  ;;  %3987 = vtanh.f32 %v1457_v19  ;;  %v1873_v51 = vpack.c.bf16 %v3966_v17, %v3958_v54 }
 0x21b   : > { %v3968_v35 = vpop.eup %3967  ;;  %v1350_v40 = vadd.f32 %v1349_v38, %v5361_v23  ;;  %v1463_v27 = vadd.f32 %v1462_v39, %v5361_v23  ;;  %v1351_v45 = vpop.f32.mrb[74].mxu0  ;;  %3989 = vtanh.f32 %v1348_v49  ;;  %v4735_v38 = vld [vmem:[%s6162_s4 + $0x48] sm:$0xff] }
 0x21c   : > { %v1464_v48 = vpop.f32.mrb[74].mxu1  ;;  %v3970_v41 = vpop.eup %3969  ;;  %v1352_v36 = vadd.f32 %v1351_v45, %v5363_v24  ;;  %v1875_v61 = vpack.c.bf16 %v3968_v35, %v3960_v18  ;;  %3991 = vtanh.f32 %v1461_v25  ;;  %1991 = vperm.xlu1 %3915, %v4735_v38  }
 0x21d   : > { %v1353_v55 = vpop.f32.mrb[75].mxu0  ;;  %v1466_v16 = vpop.f32.mrb[75].mxu1  ;;  %v1465_v42 = vadd.f32 %v1464_v48, %v5363_v24  ;;  %v1874_v56 = vpack.c.bf16 %v3970_v41, %v3962_v22  ;;  %3993 = vtanh.f32 %v1350_v40 }
 0x21e   : > { %v3972_v21 = vpop.eup %3971  ;;  %v1354_v58 = vadd.f32 %v1353_v55, %v5363_v24  ;;  %3995 = vtanh.f32 %v1463_v27  ;;  %v1467_v63 = vadd.f32 %v1466_v16, %v5363_v24  ;;  %v5416_v35 = vpop.permute.xlu1 %1214 }
 0x21f   : > { %v5377_v57 = vpop.eup %3973  ;;  %v1876_v59 = vpack.c.bf16 %v3972_v21, %v3964_v28  ;;  %2066 = vmatprep.subr.bf16.mxu0 %v1874_v56  ;;  %3997 = vtanh.f32 %v1352_v36  ;;  %v4734_v28 = vld [vmem:[%s6162_s4 + $0x50] sm:$0xff]  ;;  %v5418_v40 = vpop.permute.xlu0 %1218 }
 0x220   : > { %v5380_v60 = vpop.eup %3975  ;;  %2067 = vmatpush1.bf16.msra.mxu0 %v1873_v51  ;;  %3999 = vtanh.f32 %v1465_v42  ;;  %v1357_v43 = vpop.f32.mrb[76].mxu0  ;;  %1995 = vperm.xlu0 %3916, %v4734_v28   ;;  %v4736_v51 = vld [vmem:[%s6162_s4 + $0x60] sm:$0xff] }
 0x221   : > { %v3978_v2 = vpop.eup %3977  ;;  %2179 = vmatprep.subr.bf16.mxu1 %v1876_v59  ;;  %v1470_v6 = vpop.f32.mrb[76].mxu1  ;;  %4001 = vtanh.f32 %v1354_v58  ;;  %v1358_v62 = vadd.f32 %v1357_v43, %v5386_v53  ;;  %v4737_v58 = vld [vmem:[%s6162_s4 + $0x58] sm:$0xff] }
 0x222   : > { %v3980_v5 = vpop.eup %3979  ;;  %2180 = vmatpush1.bf16.msra.mxu1 %v1875_v61  ;;  %v1471_v9 = vadd.f32 %v1470_v6, %v5386_v53  ;;  %v1359_v10 = vpop.f32.mrb[77].mxu0  ;;  %4003 = vtanh.f32 %v1467_v63  ;;  %1999 = vperm.xlu1 %3915, %v4737_v58  }
 0x223   : > { %v3982_v8 = vpop.eup %3981  ;;  %v1472_v11 = vpop.f32.mrb[77].mxu1  ;;  %v1360_v34 = vadd.f32 %v1359_v10, %v5386_v53  ;;  %4005 = vtanh.f32 %v1358_v62 }
 0x224   : > { %v3984_v12 = vpop.eup %3983  ;;  %v1473_v13 = vadd.f32 %v1472_v11, %v5386_v53  ;;  %v1361_v37 = vpop.f32.mrb[78].mxu0  ;;  %v1881_v14 = vpack.c.bf16 %v3982_v8, %v5377_v57  ;;  %4007 = vtanh.f32 %v1471_v9  ;;  %2003 = vperm.xlu0 %3916, %v4736_v51  }
 0x225   : > { %v1474_v44 = vpop.f32.mrb[78].mxu1  ;;  %v3986_v46 = vpop.eup %3985  ;;  %v1362_v54 = vadd.f32 %v1361_v37, %v5388_v3  ;;  %v1883_v19 = vpack.c.bf16 %v3984_v12, %v5380_v60  ;;  %4009 = vtanh.f32 %v1360_v34  ;;  %v4739_v12 = vld [vmem:[%s6162_s4 + $0x68] sm:$0xff] }
 0x226   : > { %v1363_v47 = vpop.f32.mrb[79].mxu0  ;;  %v1476_v18 = vpop.f32.mrb[79].mxu1  ;;  %v1475_v26 = vadd.f32 %v1474_v44, %v5388_v3  ;;  %v1882_v22 = vpack.c.bf16 %v3986_v46, %v3978_v2  ;;  %4011 = vtanh.f32 %v1473_v13  ;;  %2007 = vperm.xlu1 %3915, %v4739_v12  }
 0x227   : > { %v3988_v20 = vpop.eup %3987  ;;  %v1364_v29 = vadd.f32 %v1363_v47, %v5388_v3  ;;  %v1477_v25 = vadd.f32 %v1476_v18, %v5388_v3  ;;  %4013 = vtanh.f32 %v1362_v54  ;;  %v5442_v13 = vpop.permute.xlu1 %1222 }
 0x228   : > { %v5407_v31 = vpop.eup %3989  ;;  %v1884_v17 = vpack.c.bf16 %v3988_v20, %v3980_v5  ;;  %2068 = vmatprep.subr.bf16.mxu0 %v1882_v22  ;;  %4015 = vtanh.f32 %v1475_v26  ;;  %v1367_v45 = vpop.f32.mrb[80].mxu0  ;;  %2011 = vperm.xlu0 %3916, %v4738_v7  }
 0x229   : > { %v5410_v49 = vpop.eup %3991  ;;  %2069 = vmatpush1.bf16.msra.mxu0 %v1881_v14  ;;  %v1480_v48 = vpop.f32.mrb[80].mxu1  ;;  %4017 = vtanh.f32 %v1364_v29  ;;  %v1368_v52 = vadd.f32 %v1367_v45, %v5416_v35 }
 0x22a   : > { %v3994_v39 = vpop.eup %3993  ;;  %2181 = vmatprep.subr.bf16.mxu1 %v1884_v17  ;;  %v1481_v41 = vadd.f32 %v1480_v48, %v5416_v35  ;;  %v1369_v36 = vpop.f32.mrb[81].mxu0  ;;  %4019 = vtanh.f32 %v1477_v25  ;;  %v4740_v17 = vld [vmem:[%s6162_s4 + $0x78] sm:$0xff] }
 0x22b   : > { %v3996_v27 = vpop.eup %3995  ;;  %2182 = vmatpush1.bf16.msra.mxu1 %v1883_v19  ;;  %v1482_v55 = vpop.f32.mrb[81].mxu1  ;;  %v1370_v61 = vadd.f32 %v1369_v36, %v5416_v35  ;;  %4021 = vtanh.f32 %v1368_v52  ;;  %2015 = vperm.xlu1 %3915, %v4740_v17  }
 0x22c   : > { %v3998_v30 = vpop.eup %3997  ;;  %v1483_v21 = vadd.f32 %v1482_v55, %v5416_v35  ;;  %v1371_v42 = vpop.f32.mrb[82].mxu0  ;;  %4023 = vtanh.f32 %v1481_v41 }
 0x22d   : > { %v4000_v16 = vpop.eup %3999  ;;  %v1484_v56 = vpop.f32.mrb[82].mxu1  ;;  %v1889_v57 = vpack.c.bf16 %v3998_v30, %v5407_v31  ;;  %v1372_v60 = vadd.f32 %v1371_v42, %v5418_v40  ;;  %4025 = vtanh.f32 %v1370_v61 }
 0x22e   : > { %v4002_v59 = vpop.eup %4001  ;;  %v1373_v63 = vpop.f32.mrb[83].mxu0  ;;  %v1891_v2 = vpack.c.bf16 %v4000_v16, %v5410_v49  ;;  %v1485_v43 = vadd.f32 %v1484_v56, %v5418_v40  ;;  %4027 = vtanh.f32 %v1483_v21 }
 0x22f   : > { %v1486_v1 = vpop.f32.mrb[83].mxu1  ;;  %v4004_v5 = vpop.eup %4003  ;;  %v1890_v6 = vpack.c.bf16 %v4002_v59, %v3994_v39  ;;  %v1374_v62 = vadd.f32 %v1373_v63, %v5418_v40  ;;  %4029 = vtanh.f32 %v1372_v60 }
 0x230   : > { %v4006_v8 = vpop.eup %4005  ;;  %v1892_v9 = vpack.c.bf16 %v4004_v5, %v3996_v27  ;;  %v1487_v11 = vadd.f32 %v1486_v1, %v5418_v40  ;;  %v5444_v37 = vpop.permute.xlu0 %1226  ;;  %4031 = vtanh.f32 %v1485_v43 }
 0x231   : > { %v4008_v10 = vpop.eup %4007  ;;  %2070 = vmatprep.subr.bf16.mxu0 %v1890_v6  ;;  %v1377_v14 = vpop.f32.mrb[84].mxu0  ;;  %4033 = vtanh.f32 %v1374_v62 }
 0x232   : > { %v4010_v34 = vpop.eup %4009  ;;  %2183 = vmatprep.subr.bf16.mxu1 %v1892_v9  ;;  %2071 = vmatpush1.bf16.msra.mxu0 %v1889_v57  ;;  %v1490_v15 = vpop.f32.mrb[84].mxu1  ;;  %v1378_v54 = vadd.f32 %v1377_v14, %v5442_v13  ;;  %4035 = vtanh.f32 %v1487_v11 }
 0x233   : > { %v4012_v44 = vpop.eup %4011  ;;  %2184 = vmatpush1.bf16.msra.mxu1 %v1891_v2  ;;  %v1491_v47 = vadd.f32 %v1490_v15, %v5442_v13  ;;  %v1379_v18 = vpop.f32.mrb[85].mxu0 }
 0x234   : > { %v4014_v46 = vpop.eup %4013  ;;  %v1492_v19 = vpop.f32.mrb[85].mxu1  ;;  %v1380_v26 = vadd.f32 %v1379_v18, %v5442_v13  ;;  %4037 = vtanh.f32 %v1378_v54 }
 0x235   : > { %v4016_v20 = vpop.eup %4015  ;;  %v1493_v22 = vadd.f32 %v1492_v19, %v5442_v13  ;;  %v1381_v28 = vpop.f32.mrb[86].mxu0  ;;  %v1897_v29 = vpack.c.bf16 %v4014_v46, %v4006_v8  ;;  %4039 = vtanh.f32 %v1491_v47 }
 0x236   : > { %v1494_v31 = vpop.f32.mrb[86].mxu1  ;;  %v4018_v49 = vpop.eup %4017  ;;  %v1382_v25 = vadd.f32 %v1381_v28, %v5444_v37  ;;  %v1899_v27 = vpack.c.bf16 %v4016_v20, %v4008_v10  ;;  %4041 = vtanh.f32 %v1380_v26 }
 0x237   : > { %v1383_v38 = vpop.f32.mrb[87].mxu0  ;;  %v1496_v39 = vpop.f32.mrb[87].mxu1  ;;  %v1495_v48 = vadd.f32 %v1494_v31, %v5444_v37  ;;  %v1898_v51 = vpack.c.bf16 %v4018_v49, %v4010_v34  ;;  %4043 = vtanh.f32 %v1493_v22 }
 0x238   : > { %v4020_v45 = vpop.eup %4019  ;;  %v1384_v52 = vadd.f32 %v1383_v38, %v5444_v37  ;;  %v1497_v55 = vadd.f32 %v1496_v39, %v5444_v37  ;;  %v5457_v61 = vpop.permute.xlu1 %1230  ;;  %4045 = vtanh.f32 %v1382_v25 }
 0x239   : > { %v4022_v30 = vpop.eup %4021  ;;  %v1900_v41 = vpack.c.bf16 %v4020_v45, %v4012_v44  ;;  %2072 = vmatprep.subr.bf16.mxu0 %v1898_v51  ;;  %v5459_v21 = vpop.permute.xlu0 %1234  ;;  %4047 = vtanh.f32 %v1495_v48 }
 0x23a   : > { %v4024_v36 = vpop.eup %4023  ;;  %2073 = vmatpush1.bf16.msra.mxu0 %v1897_v29  ;;  %v1387_v56 = vpop.f32.mrb[88].mxu0  ;;  %4049 = vtanh.f32 %v1384_v52 }
 0x23b   : > { %v4026_v16 = vpop.eup %4025  ;;  %2185 = vmatprep.subr.bf16.mxu1 %v1900_v41  ;;  %v1500_v57 = vpop.f32.mrb[88].mxu1  ;;  %v1388_v59 = vadd.f32 %v1387_v56, %v5457_v61  ;;  %4051 = vtanh.f32 %v1497_v55 }
 0x23c   : > { %v4028_v42 = vpop.eup %4027  ;;  %2186 = vmatpush1.bf16.msra.mxu1 %v1899_v27  ;;  %v1501_v60 = vadd.f32 %v1500_v57, %v5457_v61  ;;  %v1389_v63 = vpop.f32.mrb[89].mxu0 }
 0x23d   : > { %v4030_v58 = vpop.eup %4029  ;;  %v1502_v1 = vpop.f32.mrb[89].mxu1  ;;  %v1390_v5 = vadd.f32 %v1389_v63, %v5457_v61  ;;  %4053 = vtanh.f32 %v1388_v59 }
 0x23e   : > { %v4032_v2 = vpop.eup %4031  ;;  %v1503_v43 = vadd.f32 %v1502_v1, %v5457_v61  ;;  %v1391_v6 = vpop.f32.mrb[90].mxu0  ;;  %v1905_v8 = vpack.c.bf16 %v4030_v58, %v4022_v30  ;;  %4055 = vtanh.f32 %v1501_v60 }
 0x23f   : > { %v1504_v7 = vpop.f32.mrb[90].mxu1  ;;  %v4034_v62 = vpop.eup %4033  ;;  %v1392_v9 = vadd.f32 %v1391_v6, %v5459_v21  ;;  %v1907_v12 = vpack.c.bf16 %v4032_v2, %v4024_v36  ;;  %4057 = vtanh.f32 %v1390_v5 }
 0x240   : > { %v1393_v10 = vpop.f32.mrb[91].mxu0  ;;  %v1506_v11 = vpop.f32.mrb[91].mxu1  ;;  %v1505_v44 = vadd.f32 %v1504_v7, %v5459_v21  ;;  %v1906_v14 = vpack.c.bf16 %v4034_v62, %v4026_v16  ;;  %4059 = vtanh.f32 %v1503_v43 }
 0x241   : > { %v4036_v34 = vpop.eup %4035  ;;  %v1394_v46 = vadd.f32 %v1393_v10, %v5459_v21  ;;  %v1507_v18 = vadd.f32 %v1506_v11, %v5459_v21  ;;  %v5469_v20 = vpop.permute.xlu1 %1238  ;;  %4061 = vtanh.f32 %v1392_v9 }
 0x242   : > { %v4038_v15 = vpop.eup %4037  ;;  %v1908_v54 = vpack.c.bf16 %v4036_v34, %v4028_v42  ;;  %2074 = vmatprep.subr.bf16.mxu0 %v1906_v14  ;;  %v5471_v26 = vpop.permute.xlu0 %1242  ;;  %4063 = vtanh.f32 %v1505_v44 }
 0x243   : > { %v4040_v47 = vpop.eup %4039  ;;  %2075 = vmatpush1.bf16.msra.mxu0 %v1905_v8  ;;  %v1397_v28 = vpop.f32.mrb[92].mxu0  ;;  %4065 = vtanh.f32 %v1394_v46 }
 0x244   : > { %v4042_v19 = vpop.eup %4041  ;;  %2187 = vmatprep.subr.bf16.mxu1 %v1908_v54  ;;  %v1510_v31 = vpop.f32.mrb[92].mxu1  ;;  %v1398_v17 = vadd.f32 %v1397_v28, %v5469_v20  ;;  %4067 = vtanh.f32 %v1507_v18 }
 0x245   : > { %v4044_v22 = vpop.eup %4043  ;;  %2188 = vmatpush1.bf16.msra.mxu1 %v1907_v12  ;;  %v1511_v49 = vadd.f32 %v1510_v31, %v5469_v20  ;;  %v1399_v25 = vpop.f32.mrb[93].mxu0 }
 0x246   : > { %v4046_v29 = vpop.eup %4045  ;;  %v1512_v38 = vpop.f32.mrb[93].mxu1  ;;  %v1400_v27 = vadd.f32 %v1399_v25, %v5469_v20  ;;  %4069 = vtanh.f32 %v1398_v17 }
 0x247   : > { %v4048_v39 = vpop.eup %4047  ;;  %v1513_v45 = vadd.f32 %v1512_v38, %v5469_v20  ;;  %v1401_v48 = vpop.f32.mrb[94].mxu0  ;;  %v1913_v30 = vpack.c.bf16 %v4046_v29, %v4038_v15  ;;  %4071 = vtanh.f32 %v1511_v49 }
 0x248   : > { %v1514_v51 = vpop.f32.mrb[94].mxu1  ;;  %v4050_v52 = vpop.eup %4049  ;;  %v1402_v41 = vadd.f32 %v1401_v48, %v5471_v26  ;;  %v1915_v16 = vpack.c.bf16 %v4048_v39, %v4040_v47  ;;  %4073 = vtanh.f32 %v1400_v27 }
 0x249   : > { %v1403_v36 = vpop.f32.mrb[95].mxu0  ;;  %v1516_v55 = vpop.f32.mrb[95].mxu1  ;;  %v1515_v56 = vadd.f32 %v1514_v51, %v5471_v26  ;;  %v1914_v57 = vpack.c.bf16 %v4050_v52, %v4042_v19  ;;  %4075 = vtanh.f32 %v1513_v45 }
 0x24a   : > { %v4052_v42 = vpop.eup %4051  ;;  %v1404_v59 = vadd.f32 %v1403_v36, %v5471_v26  ;;  %v1517_v1 = vadd.f32 %v1516_v55, %v5471_v26  ;;  %4077 = vtanh.f32 %v1402_v41  ;;  %v1553_v43 = vpop.f32.mrb[96].mxu0 }
 0x24b   : > { %v4054_v58 = vpop.eup %4053  ;;  %v1916_v60 = vpack.c.bf16 %v4052_v42, %v4044_v22  ;;  %2076 = vmatprep.subr.bf16.mxu0 %v1914_v57  ;;  %4079 = vtanh.f32 %v1515_v56  ;;  %v1666_v6 = vpop.f32.mrb[96].mxu1  ;;  %v1554_v8 = vadd.f32 %v1553_v43, %v5325_v50 }
 0x24c   : > { %v4056_v63 = vpop.eup %4055  ;;  %2077 = vmatpush1.bf16.msra.mxu0 %v1913_v30  ;;  %4081 = vtanh.f32 %v1404_v59  ;;  %v1667_v62 = vadd.f32 %v1666_v6, %v5325_v50  ;;  %v1555_v9 = vpop.f32.mrb[97].mxu0 }
 0x24d   : > { %v4058_v2 = vpop.eup %4057  ;;  %2189 = vmatprep.subr.bf16.mxu1 %v1916_v60  ;;  %v1668_v10 = vpop.f32.mrb[97].mxu1  ;;  %4083 = vtanh.f32 %v1517_v1  ;;  %v1556_v12 = vadd.f32 %v1555_v9, %v5325_v50 }
 0x24e   : > { %v4060_v5 = vpop.eup %4059  ;;  %2190 = vmatpush1.bf16.msra.mxu1 %v1915_v16  ;;  %v1669_v34 = vadd.f32 %v1668_v10, %v5325_v50  ;;  %v1557_v44 = vpop.f32.mrb[98].mxu0  ;;  %4085 = vtanh.f32 %v1554_v8 }
 0x24f   : > { %v4062_v7 = vpop.eup %4061  ;;  %v1670_v14 = vpop.f32.mrb[98].mxu1  ;;  %v1558_v54 = vadd.f32 %v1557_v44, %v5327_v32  ;;  %4087 = vtanh.f32 %v1667_v62  ;;  %v5500_v62 = vld [vmem:[%s6160_s2 + $0x40] sm:$0xff]  }
 0x250   : > { %v4064_v11 = vpop.eup %4063  ;;  %v1921_v15 = vpack.c.bf16 %v4062_v7, %v4054_v58  ;;  %v1559_v47 = vpop.f32.mrb[99].mxu0  ;;  %v1671_v28 = vadd.f32 %v1670_v14, %v5327_v32  ;;  %4089 = vtanh.f32 %v1556_v12 }
 0x251   : > { %v4066_v46 = vpop.eup %4065  ;;  %v1672_v18 = vpop.f32.mrb[99].mxu1  ;;  %v1923_v19 = vpack.c.bf16 %v4064_v11, %v4056_v63  ;;  %v1560_v17 = vadd.f32 %v1559_v47, %v5327_v32  ;;  %4091 = vtanh.f32 %v1669_v34 }
 0x252   : > { %v4068_v22 = vpop.eup %4067  ;;  %v1922_v31 = vpack.c.bf16 %v4066_v46, %v4058_v2  ;;  %v1673_v25 = vadd.f32 %v1672_v18, %v5327_v32  ;;  %4093 = vtanh.f32 %v1558_v54  ;;  %v1563_v27 = vpop.f32.mrb[100].mxu0 }
 0x253   : > { %v4070_v29 = vpop.eup %4069  ;;  %v1924_v50 = vpack.c.bf16 %v4068_v22, %v4060_v5  ;;  %4095 = vtanh.f32 %v1671_v28  ;;  %v1676_v45 = vpop.f32.mrb[100].mxu1  ;;  %v1564_v51 = vadd.f32 %v1563_v27, %v5336_v33 }
 0x254   : > { %v4072_v49 = vpop.eup %4071  ;;  %2078 = vmatprep.subr.bf16.mxu0 %v1922_v31  ;;  %4097 = vtanh.f32 %v1560_v17  ;;  %v1677_v30 = vadd.f32 %v1676_v45, %v5336_v33  ;;  %v1565_v52 = vpop.f32.mrb[101].mxu0 }
 0x255   : > { %v4074_v38 = vpop.eup %4073  ;;  %2191 = vmatprep.subr.bf16.mxu1 %v1924_v50  ;;  %2079 = vmatpush1.bf16.msra.mxu0 %v1921_v15  ;;  %v1678_v41 = vpop.f32.mrb[101].mxu1  ;;  %4099 = vtanh.f32 %v1673_v25  ;;  %v1566_v32 = vadd.f32 %v1565_v52, %v5336_v33 }
 0x256   : > { %v4076_v39 = vpop.eup %4075  ;;  %2192 = vmatpush1.bf16.msra.mxu1 %v1923_v19  ;;  %v1679_v55 = vadd.f32 %v1678_v41, %v5336_v33  ;;  %v1567_v16 = vpop.f32.mrb[102].mxu0  ;;  %4101 = vtanh.f32 %v1564_v51  ;;  %v5517_v51 = vld [vmem:[%s6160_s2 + $0x48] sm:$0xff]  }
 0x257   : > { %v4078_v48 = vpop.eup %4077  ;;  %v1680_v42 = vpop.f32.mrb[102].mxu1  ;;  %v1568_v58 = vadd.f32 %v1567_v16, %v5339_v4  ;;  %4103 = vtanh.f32 %v1677_v30 }
 0x258   : > { %v4080_v36 = vpop.eup %4079  ;;  %v1929_v56 = vpack.c.bf16 %v4078_v48, %v4070_v29  ;;  %v1569_v59 = vpop.f32.mrb[103].mxu0  ;;  %v1681_v2 = vadd.f32 %v1680_v42, %v5339_v4  ;;  %4105 = vtanh.f32 %v1566_v32 }
 0x259   : > { %v4082_v57 = vpop.eup %4081  ;;  %v1682_v60 = vpop.f32.mrb[103].mxu1  ;;  %v1931_v63 = vpack.c.bf16 %v4080_v36, %v4072_v49  ;;  %v1570_v6 = vadd.f32 %v1569_v59, %v5339_v4  ;;  %4107 = vtanh.f32 %v1679_v55 }
 0x25a   : > { %v4084_v1 = vpop.eup %4083  ;;  %v1930_v5 = vpack.c.bf16 %v4082_v57, %v4074_v38  ;;  %v1683_v8 = vadd.f32 %v1682_v60, %v5339_v4  ;;  %4109 = vtanh.f32 %v1568_v58  ;;  %v1573_v11 = vpop.f32.mrb[104].mxu0 }
 0x25b   : > { %v4086_v43 = vpop.eup %4085  ;;  %v1932_v33 = vpack.c.bf16 %v4084_v1, %v4076_v39  ;;  %4111 = vtanh.f32 %v1681_v2  ;;  %v1686_v12 = vpop.f32.mrb[104].mxu1  ;;  %v1574_v44 = vadd.f32 %v1573_v11, %v5361_v23 }
 0x25c   : > { %v4088_v7 = vpop.eup %4087  ;;  %2080 = vmatprep.subr.bf16.mxu0 %v1930_v5  ;;  %4113 = vtanh.f32 %v1570_v6  ;;  %v1687_v4 = vadd.f32 %v1686_v12, %v5361_v23  ;;  %v1575_v14 = vpop.f32.mrb[105].mxu0 }
 0x25d   : > { %v4090_v9 = vpop.eup %4089  ;;  %2193 = vmatprep.subr.bf16.mxu1 %v1932_v33  ;;  %2081 = vmatpush1.bf16.msra.mxu0 %v1929_v56  ;;  %v1688_v15 = vpop.f32.mrb[105].mxu1  ;;  %4115 = vtanh.f32 %v1683_v8  ;;  %v1576_v54 = vadd.f32 %v1575_v14, %v5361_v23 }
 0x25e   : > { %v4092_v10 = vpop.eup %4091  ;;  %2194 = vmatpush1.bf16.msra.mxu1 %v1931_v63  ;;  %v1689_v47 = vadd.f32 %v1688_v15, %v5361_v23  ;;  %v1577_v18 = vpop.f32.mrb[106].mxu0  ;;  %4117 = vtanh.f32 %v1574_v44 }
 0x25f   : > { %v4094_v34 = vpop.eup %4093  ;;  %v1690_v19 = vpop.f32.mrb[106].mxu1  ;;  %v1578_v31 = vadd.f32 %v1577_v18, %v5363_v24  ;;  %4119 = vtanh.f32 %v1687_v4 }
 0x260   : > { %v4096_v46 = vpop.eup %4095  ;;  %2099 = vmatmul.mubr.bf16.vlgmr.msra.gmra.mrb[128].mxu0 %v5500_v62  ;;  %v1877_v22 = vpack.c.bf16 %v4094_v34, %v4086_v43  ;;  %v1579_v29 = vpop.f32.mrb[107].mxu0  ;;  %v1691_v25 = vadd.f32 %v1690_v19, %v5363_v24  ;;  %4121 = vtanh.f32 %v1576_v54  ;;  %v5534_v34 = vld [vmem:[%s6160_s2 + $0x50] sm:$0xff]  }
 0x261   : > { %v4098_v28 = vpop.eup %4097  ;;  %2212 = vmatmul.mubr.bf16.vlgmr.msra.gmra.mrb[128].mxu1 %v5500_v62  ;;  %v1692_v17 = vpop.f32.mrb[107].mxu1  ;;  %v1879_v50 = vpack.c.bf16 %v4096_v46, %v4088_v7  ;;  %2108 = vmatprep.mubr.bf16.mxu0 %v4785_v0  ;;  %v1580_v39 = vadd.f32 %v1579_v29, %v5363_v24  ;;  %4123 = vtanh.f32 %v1689_v47 }
 0x262   : > { %v4100_v49 = vpop.eup %4099  ;;  %v1878_v38 = vpack.c.bf16 %v4098_v28, %v4090_v9  ;;  %2221 = vmatprep.mubr.bf16.mxu1 %v4785_v0  ;;  %v1693_v48 = vadd.f32 %v1692_v17, %v5363_v24  ;;  %4125 = vtanh.f32 %v1578_v31  ;;  %v1583_v41 = vpop.f32.mrb[108].mxu0 }
 0x263   : > { %v4102_v23 = vpop.eup %4101  ;;  %v1880_v27 = vpack.c.bf16 %v4100_v49, %v4092_v10  ;;  %4127 = vtanh.f32 %v1691_v25  ;;  %v1696_v36 = vpop.f32.mrb[108].mxu1  ;;  %v1584_v55 = vadd.f32 %v1583_v41, %v5386_v53 }
 0x264   : > { %v4104_v45 = vpop.eup %4103  ;;  %2292 = vmatprep.subr.bf16.mxu0 %v1878_v38  ;;  %4129 = vtanh.f32 %v1580_v39  ;;  %v1697_v24 = vadd.f32 %v1696_v36, %v5386_v53  ;;  %v1585_v16 = vpop.f32.mrb[109].mxu0  ;;  %v5551_v36 = vld [vmem:[%s6160_s2 + $0x58] sm:$0xff]  }
 0x265   : > { %v4106_v30 = vpop.eup %4105  ;;  %2405 = vmatprep.subr.bf16.mxu1 %v1880_v27  ;;  %2293 = vmatpush1.bf16.msra.mxu0 %v1877_v22  ;;  %v1698_v42 = vpop.f32.mrb[109].mxu1  ;;  %4131 = vtanh.f32 %v1693_v48  ;;  %v1586_v57 = vadd.f32 %v1585_v16, %v5386_v53 }
 0x266   : > { %v4108_v52 = vpop.eup %4107  ;;  %2406 = vmatpush1.bf16.msra.mxu1 %v1879_v50  ;;  %v1699_v58 = vadd.f32 %v1698_v42, %v5386_v53  ;;  %v1587_v59 = vpop.f32.mrb[110].mxu0  ;;  %4133 = vtanh.f32 %v1584_v55 }
 0x267   : > { %v4110_v32 = vpop.eup %4109  ;;  %v1700_v60 = vpop.f32.mrb[110].mxu1  ;;  %v1588_v2 = vadd.f32 %v1587_v59, %v5388_v3  ;;  %4135 = vtanh.f32 %v1697_v24 }
 0x268   : > { %v4112_v56 = vpop.eup %4111  ;;  %2109 = vmatmul.mubr.bf16.gmra.mrb[132].mxu0 %v5517_v51  ;;  %v1885_v63 = vpack.c.bf16 %v4110_v32, %v4102_v23  ;;  %v1589_v5 = vpop.f32.mrb[111].mxu0  ;;  %v1701_v7 = vadd.f32 %v1700_v60, %v5388_v3  ;;  %4137 = vtanh.f32 %v1586_v57 }
 0x269   : > { %v4114_v1 = vpop.eup %4113  ;;  %2222 = vmatmul.mubr.bf16.gmra.mrb[132].mxu1 %v5517_v51  ;;  %v1702_v43 = vpop.f32.mrb[111].mxu1  ;;  %v1887_v6 = vpack.c.bf16 %v4112_v56, %v4104_v45  ;;  %2118 = vmatprep.mubr.bf16.mxu0 %v4785_v0  ;;  %v1590_v9 = vadd.f32 %v1589_v5, %v5388_v3  ;;  %4139 = vtanh.f32 %v1699_v58 }
 0x26a   : > { %v4116_v33 = vpop.eup %4115  ;;  %v1886_v8 = vpack.c.bf16 %v4114_v1, %v4106_v30  ;;  %2231 = vmatprep.mubr.bf16.mxu1 %v4785_v0  ;;  %v1703_v12 = vadd.f32 %v1702_v43, %v5388_v3  ;;  %4141 = vtanh.f32 %v1588_v2  ;;  %v1593_v14 = vpop.f32.mrb[112].mxu0 }
 0x26b   : > { %v4118_v53 = vpop.eup %4117  ;;  %v1888_v10 = vpack.c.bf16 %v4116_v33, %v4108_v52  ;;  %4143 = vtanh.f32 %v1701_v7  ;;  %v1706_v15 = vpop.f32.mrb[112].mxu1  ;;  %v1594_v54 = vadd.f32 %v1593_v14, %v5416_v35  ;;  %v5568_v14 = vld [vmem:[%s6160_s2 + $0x60] sm:$0xff]  }
 0x26c   : > { %v4120_v11 = vpop.eup %4119  ;;  %2294 = vmatprep.subr.bf16.mxu0 %v1886_v8  ;;  %4145 = vtanh.f32 %v1590_v9  ;;  %v1707_v3 = vadd.f32 %v1706_v15, %v5416_v35  ;;  %v1595_v47 = vpop.f32.mrb[113].mxu0 }
 0x26d   : > { %v4122_v44 = vpop.eup %4121  ;;  %2407 = vmatprep.subr.bf16.mxu1 %v1888_v10  ;;  %2295 = vmatpush1.bf16.msra.mxu0 %v1885_v63  ;;  %v1708_v18 = vpop.f32.mrb[113].mxu1  ;;  %4147 = vtanh.f32 %v1703_v12  ;;  %v1596_v22 = vadd.f32 %v1595_v47, %v5416_v35 }
 0x26e   : > { %v4124_v4 = vpop.eup %4123  ;;  %2408 = vmatpush1.bf16.msra.mxu1 %v1887_v6  ;;  %v1709_v28 = vadd.f32 %v1708_v18, %v5416_v35  ;;  %v1597_v31 = vpop.f32.mrb[114].mxu0  ;;  %4149 = vtanh.f32 %v1594_v54 }
 0x26f   : > { %v4126_v46 = vpop.eup %4125  ;;  %v1710_v29 = vpop.f32.mrb[114].mxu1  ;;  %v1598_v49 = vadd.f32 %v1597_v31, %v5418_v40  ;;  %4151 = vtanh.f32 %v1707_v3 }
 0x270   : > { %v4128_v19 = vpop.eup %4127  ;;  %2119 = vmatmul.mubr.bf16.gmra.mrb[136].mxu0 %v5534_v34  ;;  %v1893_v17 = vpack.c.bf16 %v4126_v46, %v4118_v53  ;;  %v1599_v25 = vpop.f32.mrb[115].mxu0  ;;  %v1711_v27 = vadd.f32 %v1710_v29, %v5418_v40  ;;  %4153 = vtanh.f32 %v1596_v22 }
 0x271   : > { %v4130_v50 = vpop.eup %4129  ;;  %2232 = vmatmul.mubr.bf16.gmra.mrb[136].mxu1 %v5534_v34  ;;  %v1712_v38 = vpop.f32.mrb[115].mxu1  ;;  %v1895_v23 = vpack.c.bf16 %v4128_v19, %v4120_v11  ;;  %2128 = vmatprep.mubr.bf16.mxu0 %v4785_v0  ;;  %v1600_v48 = vadd.f32 %v1599_v25, %v5418_v40  ;;  %4155 = vtanh.f32 %v1709_v28 }
 0x272   : > { %v4132_v39 = vpop.eup %4131  ;;  %v1894_v45 = vpack.c.bf16 %v4130_v50, %v4122_v44  ;;  %2241 = vmatprep.mubr.bf16.mxu1 %v4785_v0  ;;  %v1713_v41 = vadd.f32 %v1712_v38, %v5418_v40  ;;  %4157 = vtanh.f32 %v1598_v49  ;;  %v1603_v24 = vpop.f32.mrb[116].mxu0 }
 0x273   : > { %v4134_v35 = vpop.eup %4133  ;;  %v1896_v30 = vpack.c.bf16 %v4132_v39, %v4124_v4  ;;  %4159 = vtanh.f32 %v1711_v27  ;;  %v1716_v16 = vpop.f32.mrb[116].mxu1  ;;  %v1604_v56 = vadd.f32 %v1603_v24, %v5442_v13 }
 0x274   : > { %v4136_v52 = vpop.eup %4135  ;;  %2296 = vmatprep.subr.bf16.mxu0 %v1894_v45  ;;  %4161 = vtanh.f32 %v1600_v48  ;;  %v1717_v40 = vadd.f32 %v1716_v16, %v5442_v13  ;;  %v1605_v57 = vpop.f32.mrb[117].mxu0 }
 0x275   : > { %v4138_v32 = vpop.eup %4137  ;;  %2409 = vmatprep.subr.bf16.mxu1 %v1896_v30  ;;  %2297 = vmatpush1.bf16.msra.mxu0 %v1893_v17  ;;  %v1718_v58 = vpop.f32.mrb[117].mxu1  ;;  %4163 = vtanh.f32 %v1713_v41  ;;  %v1606_v60 = vadd.f32 %v1605_v57, %v5442_v13 }
 0x276   : > { %v4140_v55 = vpop.eup %4139  ;;  %2410 = vmatpush1.bf16.msra.mxu1 %v1895_v23  ;;  %v1719_v63 = vadd.f32 %v1718_v58, %v5442_v13  ;;  %v1607_v1 = vpop.f32.mrb[118].mxu0  ;;  %4165 = vtanh.f32 %v1604_v56 }
 0x277   : > { %v4142_v42 = vpop.eup %4141  ;;  %v1720_v2 = vpop.f32.mrb[118].mxu1  ;;  %v1608_v6 = vadd.f32 %v1607_v1, %v5444_v37  ;;  %4167 = vtanh.f32 %v1717_v40 }
 0x278   : > { %v4144_v59 = vpop.eup %4143  ;;  %2129 = vmatmul.mubr.bf16.gmra.mrb[140].mxu0 %v5551_v36  ;;  %v1901_v5 = vpack.c.bf16 %v4142_v42, %v4134_v35  ;;  %v1609_v33 = vpop.f32.mrb[119].mxu0  ;;  %v1721_v9 = vadd.f32 %v1720_v2, %v5444_v37  ;;  %4169 = vtanh.f32 %v1606_v60 }
 0x279   : > { %v4146_v43 = vpop.eup %4145  ;;  %2242 = vmatmul.mubr.bf16.gmra.mrb[140].mxu1 %v5551_v36  ;;  %v1722_v7 = vpop.f32.mrb[119].mxu1  ;;  %v1903_v8 = vpack.c.bf16 %v4144_v59, %v4136_v52  ;;  %2138 = vmatprep.mubr.bf16.mxu0 %v4785_v0  ;;  %v1610_v11 = vadd.f32 %v1609_v33, %v5444_v37  ;;  %4171 = vtanh.f32 %v1719_v63 }
 0x27a   : > { %v4148_v53 = vpop.eup %4147  ;;  %v1902_v10 = vpack.c.bf16 %v4146_v43, %v4138_v32  ;;  %2251 = vmatprep.mubr.bf16.mxu1 %v4785_v0  ;;  %v1723_v4 = vadd.f32 %v1722_v7, %v5444_v37  ;;  %4173 = vtanh.f32 %v1608_v6  ;;  %v1613_v54 = vpop.f32.mrb[120].mxu0 }
 0x27b   : > { %v4150_v13 = vpop.eup %4149  ;;  %v1904_v12 = vpack.c.bf16 %v4148_v53, %v4140_v55  ;;  %4175 = vtanh.f32 %v1721_v9  ;;  %v1726_v3 = vpop.f32.mrb[120].mxu1  ;;  %v1614_v18 = vadd.f32 %v1613_v54, %v5457_v61  ;;  %v5585_v55 = vld [vmem:[%s6160_s2 + $0x68] sm:$0xff]  }
 0x27c   : > { %v4152_v44 = vpop.eup %4151  ;;  %2298 = vmatprep.subr.bf16.mxu0 %v1902_v10  ;;  %4177 = vtanh.f32 %v1610_v11  ;;  %v1727_v37 = vadd.f32 %v1726_v3, %v5457_v61  ;;  %v1615_v19 = vpop.f32.mrb[121].mxu0 }
 0x27d   : > { %v4154_v15 = vpop.eup %4153  ;;  %2411 = vmatprep.subr.bf16.mxu1 %v1904_v12  ;;  %2299 = vmatpush1.bf16.msra.mxu0 %v1901_v5  ;;  %v1728_v22 = vpop.f32.mrb[121].mxu1  ;;  %4179 = vtanh.f32 %v1723_v4  ;;  %v1616_v31 = vadd.f32 %v1615_v19, %v5457_v61 }
 0x27e   : > { %v4156_v46 = vpop.eup %4155  ;;  %2412 = vmatpush1.bf16.msra.mxu1 %v1903_v8  ;;  %v1729_v29 = vadd.f32 %v1728_v22, %v5457_v61  ;;  %v1617_v17 = vpop.f32.mrb[122].mxu0  ;;  %4181 = vtanh.f32 %v1614_v18 }
 0x27f   : > { %v4158_v47 = vpop.eup %4157  ;;  %v1730_v50 = vpop.f32.mrb[122].mxu1  ;;  %v1618_v38 = vadd.f32 %v1617_v17, %v5459_v21  ;;  %4183 = vtanh.f32 %v1727_v37  ;;  %v3948_v17 = vld [vmem:[%s6160_s2 + $0x78] sm:$0xff]  }
 0x280   : > { %v4160_v28 = vpop.eup %4159  ;;  %2139 = vmatmul.mubr.bf16.gmra.mrb[144].mxu0 %v5568_v14  ;;  %v1909_v49 = vpack.c.bf16 %v4158_v47, %v4150_v13  ;;  %v1619_v23 = vpop.f32.mrb[123].mxu0  ;;  %v1731_v35 = vadd.f32 %v1730_v50, %v5459_v21  ;;  %4185 = vtanh.f32 %v1616_v31 }
 0x281   : > { %v4162_v25 = vpop.eup %4161  ;;  %2252 = vmatmul.mubr.bf16.gmra.mrb[144].mxu1 %v5568_v14  ;;  %v1732_v39 = vpop.f32.mrb[123].mxu1  ;;  %v1911_v27 = vpack.c.bf16 %v4160_v28, %v4152_v44  ;;  %2148 = vmatprep.mubr.bf16.mxu0 %v4785_v0  ;;  %v1620_v30 = vadd.f32 %v1619_v23, %v5459_v21  ;;  %4187 = vtanh.f32 %v1729_v29 }
 0x282   : > { %v4164_v45 = vpop.eup %4163  ;;  %v1910_v48 = vpack.c.bf16 %v4162_v25, %v4154_v15  ;;  %2261 = vmatprep.mubr.bf16.mxu1 %v4785_v0  ;;  %v1733_v32 = vadd.f32 %v1732_v39, %v5459_v21  ;;  %4189 = vtanh.f32 %v1618_v38  ;;  %v1623_v42 = vpop.f32.mrb[124].mxu0  ;;  %v5602_v15 = vld [vmem:[%s6160_s2 + $0x70] sm:$0xff]  }
 0x283   : > { %v4166_v61 = vpop.eup %4165  ;;  %v1912_v52 = vpack.c.bf16 %v4164_v45, %v4156_v46  ;;  %4191 = vtanh.f32 %v1731_v35  ;;  %v1736_v56 = vpop.f32.mrb[124].mxu1  ;;  %v1624_v57 = vadd.f32 %v1623_v42, %v5469_v20 }
 0x284   : > { %v4168_v41 = vpop.eup %4167  ;;  %2300 = vmatprep.subr.bf16.mxu0 %v1910_v48  ;;  %4193 = vtanh.f32 %v1620_v30  ;;  %v1737_v21 = vadd.f32 %v1736_v56, %v5469_v20  ;;  %v1625_v58 = vpop.f32.mrb[125].mxu0 }
 0x285   : > { %v4170_v24 = vpop.eup %4169  ;;  %2413 = vmatprep.subr.bf16.mxu1 %v1912_v52  ;;  %2301 = vmatpush1.bf16.msra.mxu0 %v1909_v49  ;;  %v1738_v59 = vpop.f32.mrb[125].mxu1  ;;  %4195 = vtanh.f32 %v1733_v32  ;;  %v1626_v63 = vadd.f32 %v1625_v58, %v5469_v20 }
 0x286   : > { %v4172_v16 = vpop.eup %4171  ;;  %2414 = vmatpush1.bf16.msra.mxu1 %v1911_v27  ;;  %v1739_v1 = vadd.f32 %v1738_v59, %v5469_v20  ;;  %v1627_v2 = vpop.f32.mrb[126].mxu0  ;;  %4197 = vtanh.f32 %v1624_v57 }
 0x287   : > { %v4174_v40 = vpop.eup %4173  ;;  %v1740_v5 = vpop.f32.mrb[126].mxu1  ;;  %v1628_v33 = vadd.f32 %v1627_v2, %v5471_v26  ;;  %4199 = vtanh.f32 %v1737_v21 }
 0x288   : > { %v4176_v60 = vpop.eup %4175  ;;  %2149 = vmatmul.mubr.bf16.gmra.mrb[148].mxu0 %v5585_v55  ;;  %v1917_v43 = vpack.c.bf16 %v4174_v40, %v4166_v61  ;;  %v1629_v7 = vpop.f32.mrb[127].mxu0  ;;  %v1741_v10 = vadd.f32 %v1740_v5, %v5471_v26  ;;  %4201 = vtanh.f32 %v1626_v63 }
 0x289   : > { %v4178_v6 = vpop.eup %4177  ;;  %2262 = vmatmul.mubr.bf16.gmra.mrb[148].mxu1 %v5585_v55  ;;  %v1742_v8 = vpop.f32.mrb[127].mxu1  ;;  %v1919_v53 = vpack.c.bf16 %v4176_v60, %v4168_v41  ;;  %2158 = vmatprep.mubr.bf16.mxu0 %v4785_v0  ;;  %v1630_v11 = vadd.f32 %v1629_v7, %v5471_v26  ;;  %4203 = vtanh.f32 %v1739_v1 }
 0x28a   : > { %v4180_v9 = vpop.eup %4179  ;;  %v1918_v13 = vpack.c.bf16 %v4178_v6, %v4170_v24  ;;  %2271 = vmatprep.mubr.bf16.mxu1 %v4785_v0  ;;  %v1743_v4 = vadd.f32 %v1742_v8, %v5471_v26  ;;  %4205 = vtanh.f32 %v1628_v33 }
 0x28b   : > { %v4182_v20 = vpop.eup %4181  ;;  %v1920_v12 = vpack.c.bf16 %v4180_v9, %v4172_v16  ;;  %4207 = vtanh.f32 %v1741_v10 }
 0x28c   : > { %v4184_v44 = vpop.eup %4183  ;;  %2302 = vmatprep.subr.bf16.mxu0 %v1918_v13  ;;  %4209 = vtanh.f32 %v1630_v11 }
 0x28d   : > { %v4186_v46 = vpop.eup %4185  ;;  %2415 = vmatprep.subr.bf16.mxu1 %v1920_v12  ;;  %2303 = vmatpush1.bf16.msra.mxu0 %v1917_v43  ;;  %4211 = vtanh.f32 %v1743_v4 }
 0x28e   : > { %v4188_v54 = vpop.eup %4187  ;;  %2416 = vmatpush1.bf16.msra.mxu1 %v1919_v53 }
 0x28f   : > { %v4190_v3 = vpop.eup %4189 }
 0x290   : > { %v4192_v47 = vpop.eup %4191  ;;  %2159 = vmatmul.mubr.bf16.gmra.mrb[152].mxu0 %v5602_v15  ;;  %v1925_v26 = vpack.c.bf16 %v4190_v3, %v4182_v20 }
 0x291   : > { %v4194_v18 = vpop.eup %4193  ;;  %2272 = vmatmul.mubr.bf16.gmra.mrb[152].mxu1 %v5602_v15  ;;  %v1927_v37 = vpack.c.bf16 %v4192_v47, %v4184_v44  ;;  %2168 = vmatprep.mubr.bf16.mxu0 %v4785_v0 }
 0x292   : > { %v4196_v19 = vpop.eup %4195  ;;  %v1926_v22 = vpack.c.bf16 %v4194_v18, %v4186_v46  ;;  %2281 = vmatprep.mubr.bf16.mxu1 %v4785_v0 }
 0x293   : > { %v4198_v28 = vpop.eup %4197  ;;  %v1928_v31 = vpack.c.bf16 %v4196_v19, %v4188_v54 }
 0x294   : > { %v4200_v29 = vpop.eup %4199  ;;  %2304 = vmatprep.subr.bf16.mxu0 %v1926_v22 }
 0x295   : > { %v4202_v50 = vpop.eup %4201  ;;  %2417 = vmatprep.subr.bf16.mxu1 %v1928_v31  ;;  %2305 = vmatpush1.bf16.msra.mxu0 %v1925_v26 }
 0x296   : > { %v4204_v49 = vpop.eup %4203  ;;  %2418 = vmatpush1.bf16.msra.mxu1 %v1927_v37 }
 0x297   : > { %v4206_v25 = vpop.eup %4205 }
 0x298   : > { %v4208_v38 = vpop.eup %4207  ;;  %2169 = vmatmul.mubr.bf16.gmra.mrb[156].mxu0 %v3948_v17  ;;  %v1933_v23 = vpack.c.bf16 %v4206_v25, %v4198_v28 }
 0x299   : > { %v4210_v39 = vpop.eup %4209  ;;  %2282 = vmatmul.mubr.bf16.gmra.mrb[156].mxu1 %v3948_v17  ;;  %v1935_v27 = vpack.c.bf16 %v4208_v38, %v4200_v29  ;;  %2324 = vmatprep.mubr.bf16.mxu0 %v4785_v0 }
 0x29a   : > { %v4212_v45 = vpop.eup %4211  ;;  %v1934_v35 = vpack.c.bf16 %v4210_v39, %v4202_v50  ;;  %2437 = vmatprep.mubr.bf16.mxu1 %v4785_v0 }
 0x29b   : > { %v1936_v48 = vpack.c.bf16 %v4212_v45, %v4204_v49 }
 0x29c   : > { %2306 = vmatprep.subr.bf16.mxu0 %v1934_v35 }
 0x29d   : > { %2419 = vmatprep.subr.bf16.mxu1 %v1936_v48  ;;  %2307 = vmatpush1.bf16.msra.mxu0 %v1933_v23 }
 0x29e   : > { %2420 = vmatpush1.bf16.msra.mxu1 %v1935_v27 }
 0x2a0   : > { %2325 = vmatmul.mubr.bf16.vlgmr.msra.gmra.mrb[160].mxu0 %v5500_v62 }
 0x2a1   : > { %2438 = vmatmul.mubr.bf16.vlgmr.msra.gmra.mrb[160].mxu1 %v5500_v62  ;;  %2334 = vmatprep.mubr.bf16.mxu0 %v4785_v0  ;;  %v5643_v62 = vpop.permute.xlu1 %1955 }
 0x2a2   : > { %2447 = vmatprep.mubr.bf16.mxu1 %v4785_v0 }
 0x2a8   : > { %2335 = vmatmul.mubr.bf16.gmra.mrb[164].mxu0 %v5517_v51 }
 0x2a9   : > { %2448 = vmatmul.mubr.bf16.gmra.mrb[164].mxu1 %v5517_v51  ;;  %2344 = vmatprep.mubr.bf16.mxu0 %v4785_v0  ;;  %v5645_v51 = vpop.permute.xlu0 %1959 }
 0x2aa   : > { %2457 = vmatprep.mubr.bf16.mxu1 %v4785_v0 }
 0x2b0   : > { %2345 = vmatmul.mubr.bf16.gmra.mrb[168].mxu0 %v5534_v34 }
 0x2b1   : > { %2458 = vmatmul.mubr.bf16.gmra.mrb[168].mxu1 %v5534_v34  ;;  %2354 = vmatprep.mubr.bf16.mxu0 %v4785_v0  ;;  %v5647_v34 = vpop.permute.xlu1 %1963 }
 0x2b2   : > { %2467 = vmatprep.mubr.bf16.mxu1 %v4785_v0 }
 0x2b5   : > { %v5657_v59 = vpop.permute.xlu1 %1967 }
 0x2b8   : > { %2355 = vmatmul.mubr.bf16.gmra.mrb[172].mxu0 %v5551_v36 }
 0x2b9   : > { %2468 = vmatmul.mubr.bf16.gmra.mrb[172].mxu1 %v5551_v36  ;;  %2364 = vmatprep.mubr.bf16.mxu0 %v4785_v0  ;;  %v5669_v54 = vpop.permute.xlu1 %1975 }
 0x2ba   : > { %2477 = vmatprep.mubr.bf16.mxu1 %v4785_v0 }
 0x2c0   : > { %2365 = vmatmul.mubr.bf16.gmra.mrb[176].mxu0 %v5568_v14 }
 0x2c1   : > { %2478 = vmatmul.mubr.bf16.gmra.mrb[176].mxu1 %v5568_v14  ;;  %2374 = vmatprep.mubr.bf16.mxu0 %v4785_v0 }
 0x2c2   : > { %2487 = vmatprep.mubr.bf16.mxu1 %v4785_v0 }
 0x2c8   : > { %2375 = vmatmul.mubr.bf16.gmra.mrb[180].mxu0 %v5585_v55 }
 0x2c9   : > { %2488 = vmatmul.mubr.bf16.gmra.mrb[180].mxu1 %v5585_v55  ;;  %2384 = vmatprep.mubr.bf16.mxu0 %v4785_v0 }
 0x2ca   : > { %2497 = vmatprep.mubr.bf16.mxu1 %v4785_v0 }
 0x2d0   : > { %2385 = vmatmul.mubr.bf16.gmra.mrb[184].mxu0 %v5602_v15 }
 0x2d1   : > { %2498 = vmatmul.mubr.bf16.gmra.mrb[184].mxu1 %v5602_v15  ;;  %2394 = vmatprep.mubr.bf16.mxu0 %v4785_v0  ;;  %v5667_v15 = vpop.permute.xlu0 %1971 }
 0x2d2   : > { %2507 = vmatprep.mubr.bf16.mxu1 %v4785_v0 }
 0x2d8   : > { %2395 = vmatmul.mubr.bf16.gmra.mrb[188].mxu0 %v3948_v17 }
 0x2d9   : > { %2508 = vmatmul.mubr.bf16.gmra.mrb[188].mxu1 %v3948_v17  ;;  %2871 = vmatprep.mubr.bf16.mxu0 %v4785_v0 }
 0x2da   : > { %2984 = vmatprep.mubr.bf16.mxu1 %v4785_v0 }
 0x333   : > { %v2100_v36 = vpop.f32.mrb[128].mxu0 }
 0x334   : > { %v2101_v14 = vadd.f32 %v2100_v36, %v5643_v62  ;;  %v2213_v61 = vpop.f32.mrb[128].mxu1  ;;  %v2102_v30 = vpop.f32.mrb[129].mxu0 }
 0x335   : > { %v2214_v52 = vadd.f32 %v2213_v61, %v5643_v62  ;;  %v2103_v41 = vadd.f32 %v2102_v30, %v5643_v62  ;;  %v2215_v32 = vpop.f32.mrb[129].mxu1  ;;  %v2104_v55 = vpop.f32.mrb[130].mxu0 }
 0x336   : > { %4213 = vtanh.f32 %v2101_v14  ;;  %v2216_v24 = vadd.f32 %v2215_v32, %v5643_v62  ;;  %v2105_v16 = vadd.f32 %v2104_v55, %v5645_v51  ;;  %v2217_v42 = vpop.f32.mrb[130].mxu1  ;;  %v2106_v56 = vpop.f32.mrb[131].mxu0 }
 0x337   : > { %4215 = vtanh.f32 %v2214_v52  ;;  %v2218_v40 = vadd.f32 %v2217_v42, %v5645_v51  ;;  %v2219_v57 = vpop.f32.mrb[131].mxu1  ;;  %v2107_v21 = vadd.f32 %v2106_v56, %v5645_v51  ;;  %v5679_v32 = vpop.permute.xlu0 %1979 }
 0x338   : > { %4217 = vtanh.f32 %v2103_v41  ;;  %v2220_v58 = vadd.f32 %v2219_v57, %v5645_v51 }
 0x339   : > { %4219 = vtanh.f32 %v2216_v24  ;;  %v5681_v24 = vpop.permute.xlu1 %1983 }
 0x33a   : > { %4221 = vtanh.f32 %v2105_v16 }
 0x33b   : > { %4223 = vtanh.f32 %v2218_v40  ;;  %v2110_v60 = vpop.f32.mrb[132].mxu0 }
 0x33c   : > { %4225 = vtanh.f32 %v2107_v21  ;;  %v2111_v63 = vadd.f32 %v2110_v60, %v5647_v34  ;;  %v2223_v1 = vpop.f32.mrb[132].mxu1  ;;  %v2112_v2 = vpop.f32.mrb[133].mxu0 }
 0x33d   : > { %4227 = vtanh.f32 %v2220_v58  ;;  %v2224_v5 = vadd.f32 %v2223_v1, %v5647_v34  ;;  %v2113_v43 = vadd.f32 %v2112_v2, %v5647_v34  ;;  %v2225_v6 = vpop.f32.mrb[133].mxu1  ;;  %v2114_v33 = vpop.f32.mrb[134].mxu0 }
 0x33e   : > { %4229 = vtanh.f32 %v2111_v63  ;;  %v2226_v7 = vadd.f32 %v2225_v6, %v5647_v34  ;;  %v2115_v8 = vadd.f32 %v2114_v33, %v5657_v59  ;;  %v2227_v53 = vpop.f32.mrb[134].mxu1  ;;  %v2116_v9 = vpop.f32.mrb[135].mxu0 }
 0x33f   : > { %4231 = vtanh.f32 %v2224_v5  ;;  %v2228_v10 = vadd.f32 %v2227_v53, %v5657_v59  ;;  %v2229_v13 = vpop.f32.mrb[135].mxu1  ;;  %v2117_v11 = vadd.f32 %v2116_v9, %v5657_v59 }
 0x340   : > { %v4214_v20 = vpop.eup %4213  ;;  %4233 = vtanh.f32 %v2113_v43  ;;  %v2230_v44 = vadd.f32 %v2229_v13, %v5657_v59 }
 0x341   : > { %v4216_v12 = vpop.eup %4215  ;;  %4235 = vtanh.f32 %v2226_v7 }
 0x342   : > { %v4218_v4 = vpop.eup %4217  ;;  %4237 = vtanh.f32 %v2115_v8 }
 0x343   : > { %v4220_v46 = vpop.eup %4219  ;;  %4239 = vtanh.f32 %v2228_v10  ;;  %v2120_v3 = vpop.f32.mrb[136].mxu0 }
 0x344   : > { %v4222_v47 = vpop.eup %4221  ;;  %4241 = vtanh.f32 %v2117_v11  ;;  %v2121_v26 = vadd.f32 %v2120_v3, %v5667_v15  ;;  %v2233_v18 = vpop.f32.mrb[136].mxu1 }
 0x345   : > { %v2122_v37 = vpop.f32.mrb[137].mxu0  ;;  %v4224_v19 = vpop.eup %4223  ;;  %4243 = vtanh.f32 %v2230_v44  ;;  %v2234_v22 = vadd.f32 %v2233_v18, %v5667_v15  ;;  %v2646_v17 = vpack.c.bf16 %v4222_v47, %v4214_v20 }
 0x346   : > { %v2123_v28 = vadd.f32 %v2122_v37, %v5667_v15  ;;  %v2235_v31 = vpop.f32.mrb[137].mxu1  ;;  %v2124_v29 = vpop.f32.mrb[138].mxu0  ;;  %4245 = vtanh.f32 %v2121_v26  ;;  %v2648_v39 = vpack.c.bf16 %v4224_v19, %v4216_v12 }
 0x347   : > { %v4226_v50 = vpop.eup %4225  ;;  %v2236_v49 = vadd.f32 %v2235_v31, %v5667_v15  ;;  %v2125_v25 = vadd.f32 %v2124_v29, %v5669_v54  ;;  %v2237_v38 = vpop.f32.mrb[138].mxu1  ;;  %4247 = vtanh.f32 %v2234_v22 }
 0x348   : > { %v2126_v23 = vpop.f32.mrb[139].mxu0  ;;  %v4228_v27 = vpop.eup %4227  ;;  %v2238_v45 = vadd.f32 %v2237_v38, %v5669_v54  ;;  %v2647_v48 = vpack.c.bf16 %v4226_v50, %v4218_v4  ;;  %4249 = vtanh.f32 %v2123_v28 }
 0x349   : > { %v2239_v35 = vpop.f32.mrb[139].mxu1  ;;  %v4230_v36 = vpop.eup %4229  ;;  %v2127_v14 = vadd.f32 %v2126_v23, %v5669_v54  ;;  %v2649_v61 = vpack.c.bf16 %v4228_v27, %v4220_v46  ;;  %4251 = vtanh.f32 %v2236_v49 }
 0x34a   : > { %v4232_v30 = vpop.eup %4231  ;;  %v2240_v52 = vadd.f32 %v2239_v35, %v5669_v54  ;;  %2839 = vmatprep.subr.bf16.mxu0 %v2647_v48  ;;  %4253 = vtanh.f32 %v2125_v25  ;;  %v5691_v3 = vpop.permute.xlu0 %1987 }
 0x34b   : > { %v4234_v41 = vpop.eup %4233  ;;  %2952 = vmatprep.subr.bf16.mxu1 %v2649_v61  ;;  %2840 = vmatpush1.bf16.msra.mxu0 %v2646_v17  ;;  %4255 = vtanh.f32 %v2238_v45  ;;  %v2130_v16 = vpop.f32.mrb[140].mxu0 }
 0x34c   : > { %v4236_v55 = vpop.eup %4235  ;;  %2953 = vmatpush1.bf16.msra.mxu1 %v2648_v39  ;;  %4257 = vtanh.f32 %v2127_v14  ;;  %v2131_v56 = vadd.f32 %v2130_v16, %v5679_v32  ;;  %v2243_v40 = vpop.f32.mrb[140].mxu1 }
 0x34d   : > { %v4238_v42 = vpop.eup %4237  ;;  %v2132_v57 = vpop.f32.mrb[141].mxu0  ;;  %4259 = vtanh.f32 %v2240_v52  ;;  %v2244_v58 = vadd.f32 %v2243_v40, %v5679_v32 }
 0x34e   : > { %v4240_v21 = vpop.eup %4239  ;;  %v2133_v60 = vadd.f32 %v2132_v57, %v5679_v32  ;;  %v2245_v63 = vpop.f32.mrb[141].mxu1  ;;  %v2654_v2 = vpack.c.bf16 %v4238_v42, %v4230_v36  ;;  %4261 = vtanh.f32 %v2131_v56  ;;  %v4789_v42 = vmov 3  }
 0x34f   : > { %v2134_v1 = vpop.f32.mrb[142].mxu0  ;;  %v4242_v5 = vpop.eup %4241  ;;  %v2246_v43 = vadd.f32 %v2245_v63, %v5679_v32  ;;  %v2656_v8 = vpack.c.bf16 %v4240_v21, %v4232_v30  ;;  %4263 = vtanh.f32 %v2244_v58  ;;  %3918 = vset.pattern.permute.xlu1 %v4789_v42  ;;  %3917 = vset.pattern.permute.xlu0 %v4789_v42 }
 0x350   : > { %v2135_v6 = vadd.f32 %v2134_v1, %v5681_v24  ;;  %v2247_v33 = vpop.f32.mrb[142].mxu1  ;;  %v2136_v7 = vpop.f32.mrb[143].mxu0  ;;  %v2655_v13 = vpack.c.bf16 %v4242_v5, %v4234_v41  ;;  %4265 = vtanh.f32 %v2133_v60  ;;  %v4741_v5 = vld [vmem:[%s6162_s4 + $0x8] sm:$0xff] }
 0x351   : > { %v4244_v53 = vpop.eup %4243  ;;  %v2248_v9 = vadd.f32 %v2247_v33, %v5681_v24  ;;  %v2249_v10 = vpop.f32.mrb[143].mxu1  ;;  %v2137_v11 = vadd.f32 %v2136_v7, %v5681_v24  ;;  %4267 = vtanh.f32 %v2246_v43  ;;  %2732 = vperm.xlu1 %3918, %v4741_v5   ;;  %v4742_v43 = vld [vmem:[%s6162_s4] sm:$0xff] }
 0x352   : > { %v4246_v20 = vpop.eup %4245  ;;  %v2657_v12 = vpack.c.bf16 %v4244_v53, %v4236_v55  ;;  %v2250_v4 = vadd.f32 %v2249_v10, %v5681_v24  ;;  %2841 = vmatprep.subr.bf16.mxu0 %v2655_v13  ;;  %4269 = vtanh.f32 %v2135_v6  ;;  %v5693_v26 = vpop.permute.xlu1 %1991  ;;  %2728 = vperm.xlu0 %3917, %v4742_v43  }
 0x353   : > { %v4248_v44 = vpop.eup %4247  ;;  %2842 = vmatpush1.bf16.msra.mxu0 %v2654_v2  ;;  %4271 = vtanh.f32 %v2248_v9  ;;  %v2140_v18 = vpop.f32.mrb[144].mxu0 }
 0x354   : > { %v4250_v46 = vpop.eup %4249  ;;  %2954 = vmatprep.subr.bf16.mxu1 %v2657_v12  ;;  %4273 = vtanh.f32 %v2137_v11  ;;  %v2141_v19 = vadd.f32 %v2140_v18, %v5691_v3  ;;  %v2253_v22 = vpop.f32.mrb[144].mxu1 }
 0x355   : > { %v4252_v47 = vpop.eup %4251  ;;  %2955 = vmatpush1.bf16.msra.mxu1 %v2656_v8  ;;  %v2142_v28 = vpop.f32.mrb[145].mxu0  ;;  %4275 = vtanh.f32 %v2250_v4  ;;  %v2254_v29 = vadd.f32 %v2253_v22, %v5691_v3 }
 0x356   : > { %v4254_v37 = vpop.eup %4253  ;;  %v2143_v17 = vadd.f32 %v2142_v28, %v5691_v3  ;;  %v2255_v50 = vpop.f32.mrb[145].mxu1  ;;  %4277 = vtanh.f32 %v2141_v19  ;;  %v4743_v28 = vld [vmem:[%s6162_s4 + $0x10] sm:$0xff] }
 0x357   : > { %v4256_v31 = vpop.eup %4255  ;;  %v2144_v49 = vpop.f32.mrb[146].mxu0  ;;  %v2662_v25 = vpack.c.bf16 %v4254_v37, %v4246_v20  ;;  %v2256_v23 = vadd.f32 %v2255_v50, %v5691_v3  ;;  %4279 = vtanh.f32 %v2254_v29  ;;  %2736 = vperm.xlu1 %3918, %v4743_v28  }
 0x358   : > { %v4258_v38 = vpop.eup %4257  ;;  %v2145_v39 = vadd.f32 %v2144_v49, %v5693_v26  ;;  %v2257_v27 = vpop.f32.mrb[146].mxu1  ;;  %v2664_v35 = vpack.c.bf16 %v4256_v31, %v4248_v44  ;;  %4281 = vtanh.f32 %v2143_v17  ;;  %v4744_v31 = vld [vmem:[%s6162_s4 + $0x18] sm:$0xff] }
 0x359   : > { %v2146_v45 = vpop.f32.mrb[147].mxu0  ;;  %v4260_v48 = vpop.eup %4259  ;;  %v2258_v36 = vadd.f32 %v2257_v27, %v5693_v26  ;;  %v2663_v61 = vpack.c.bf16 %v4258_v38, %v4250_v46  ;;  %4283 = vtanh.f32 %v2256_v23  ;;  %2740 = vperm.xlu0 %3917, %v4744_v31  }
 0x35a   : > { %v2259_v14 = vpop.f32.mrb[147].mxu1  ;;  %v5701_v30 = vpop.eup %4261  ;;  %v2147_v52 = vadd.f32 %v2146_v45, %v5693_v26  ;;  %v2665_v41 = vpack.c.bf16 %v4260_v48, %v4252_v47  ;;  %4285 = vtanh.f32 %v2145_v39  ;;  %v4745_v48 = vld [vmem:[%s6162_s4 + $0x20] sm:$0xff] }
 0x35b   : > { %v5704_v55 = vpop.eup %4263  ;;  %v2260_v16 = vadd.f32 %v2259_v14, %v5693_v26  ;;  %2843 = vmatprep.subr.bf16.mxu0 %v2663_v61  ;;  %v5707_v40 = vpop.permute.xlu0 %1995  ;;  %4287 = vtanh.f32 %v2258_v36  ;;  %2744 = vperm.xlu1 %3918, %v4745_v48   ;;  %v4746_v36 = vld [vmem:[%s6162_s4 + $0x28] sm:$0xff] }
 0x35c   : > { %v4266_v56 = vpop.eup %4265  ;;  %2956 = vmatprep.subr.bf16.mxu1 %v2665_v41  ;;  %2844 = vmatpush1.bf16.msra.mxu0 %v2662_v25  ;;  %v5709_v21 = vpop.permute.xlu1 %1999  ;;  %4289 = vtanh.f32 %v2147_v52 }
 0x35d   : > { %v4268_v57 = vpop.eup %4267  ;;  %2957 = vmatpush1.bf16.msra.mxu1 %v2664_v35  ;;  %v2150_v58 = vpop.f32.mrb[148].mxu0  ;;  %4291 = vtanh.f32 %v2260_v16  ;;  %2748 = vperm.xlu0 %3917, %v4746_v36  }
 0x35e   : > { %v4270_v60 = vpop.eup %4269  ;;  %v2151_v63 = vadd.f32 %v2150_v58, %v5707_v40  ;;  %v2263_v1 = vpop.f32.mrb[148].mxu1 }
 0x35f   : > { %v2152_v2 = vpop.f32.mrb[149].mxu0  ;;  %v4272_v6 = vpop.eup %4271  ;;  %v2264_v33 = vadd.f32 %v2263_v1, %v5707_v40  ;;  %v2670_v9 = vpack.c.bf16 %v4270_v60, %v5701_v30 }
 0x360   : > { %v2153_v7 = vadd.f32 %v2152_v2, %v5707_v40  ;;  %v2265_v8 = vpop.f32.mrb[149].mxu1  ;;  %v2154_v53 = vpop.f32.mrb[150].mxu0  ;;  %4293 = vtanh.f32 %v2151_v63  ;;  %v2672_v44 = vpack.c.bf16 %v4272_v6, %v5704_v55 }
 0x361   : > { %v4274_v10 = vpop.eup %4273  ;;  %v2266_v13 = vadd.f32 %v2265_v8, %v5707_v40  ;;  %v2155_v20 = vadd.f32 %v2154_v53, %v5709_v21  ;;  %v2267_v11 = vpop.f32.mrb[150].mxu1  ;;  %4295 = vtanh.f32 %v2264_v33  ;;  %v4748_v8 = vld [vmem:[%s6162_s4 + $0x38] sm:$0xff] }
 0x362   : > { %v2156_v12 = vpop.f32.mrb[151].mxu0  ;;  %v4276_v4 = vpop.eup %4275  ;;  %v2268_v46 = vadd.f32 %v2267_v11, %v5709_v21  ;;  %v2671_v18 = vpack.c.bf16 %v4274_v10, %v4266_v56  ;;  %4297 = vtanh.f32 %v2153_v7  ;;  %v4747_v7 = vld [vmem:[%s6162_s4 + $0x30] sm:$0xff]  ;;  %2756 = vperm.xlu0 %3917, %v4748_v8  }
 0x363   : > { %v2269_v47 = vpop.f32.mrb[151].mxu1  ;;  %v5725_v37 = vpop.eup %4277  ;;  %v2157_v19 = vadd.f32 %v2156_v12, %v5709_v21  ;;  %v2673_v22 = vpack.c.bf16 %v4276_v4, %v4268_v57  ;;  %4299 = vtanh.f32 %v2266_v13  ;;  %2752 = vperm.xlu1 %3918, %v4747_v7  }
 0x364   : > { %v4280_v29 = vpop.eup %4279  ;;  %v2270_v17 = vadd.f32 %v2269_v47, %v5709_v21  ;;  %2845 = vmatprep.subr.bf16.mxu0 %v2671_v18  ;;  %v5735_v49 = vpop.permute.xlu0 %2003  ;;  %4301 = vtanh.f32 %v2155_v20  ;;  %v4749_v18 = vld [vmem:[%s6162_s4 + $0x40] sm:$0xff] }
 0x365   : > { %v4282_v50 = vpop.eup %4281  ;;  %2958 = vmatprep.subr.bf16.mxu1 %v2673_v22  ;;  %2846 = vmatpush1.bf16.msra.mxu0 %v2670_v9  ;;  %v5737_v38 = vpop.permute.xlu1 %2007  ;;  %4303 = vtanh.f32 %v2268_v46 }
 0x366   : > { %v4284_v25 = vpop.eup %4283  ;;  %2959 = vmatpush1.bf16.msra.mxu1 %v2672_v44  ;;  %v2160_v23 = vpop.f32.mrb[152].mxu0  ;;  %4305 = vtanh.f32 %v2157_v19 }
 0x367   : > { %v4286_v39 = vpop.eup %4285  ;;  %v2161_v27 = vadd.f32 %v2160_v23, %v5735_v49  ;;  %v2273_v45 = vpop.f32.mrb[152].mxu1  ;;  %4307 = vtanh.f32 %v2270_v17  ;;  %2760 = vperm.xlu1 %3918, %v4749_v18  }
 0x368   : > { %v2162_v35 = vpop.f32.mrb[153].mxu0  ;;  %v4288_v14 = vpop.eup %4287  ;;  %v2274_v61 = vadd.f32 %v2273_v45, %v5735_v49  ;;  %v2678_v55 = vpack.c.bf16 %v4286_v39, %v5725_v37  ;;  %v4750_v37 = vld [vmem:[%s6162_s4 + $0x48] sm:$0xff] }
 0x369   : > { %v2163_v30 = vadd.f32 %v2162_v35, %v5735_v49  ;;  %v2275_v52 = vpop.f32.mrb[153].mxu1  ;;  %v2164_v41 = vpop.f32.mrb[154].mxu0  ;;  %4309 = vtanh.f32 %v2161_v27  ;;  %v2680_v60 = vpack.c.bf16 %v4288_v14, %v4280_v29  ;;  %2764 = vperm.xlu0 %3917, %v4750_v37  }
 0x36a   : > { %v4290_v16 = vpop.eup %4289  ;;  %v2276_v42 = vadd.f32 %v2275_v52, %v5735_v49  ;;  %v2165_v56 = vadd.f32 %v2164_v41, %v5737_v38  ;;  %v2277_v57 = vpop.f32.mrb[154].mxu1  ;;  %4311 = vtanh.f32 %v2274_v61  ;;  %v4751_v41 = vld [vmem:[%s6162_s4 + $0x50] sm:$0xff] }
 0x36b   : > { %v2166_v58 = vpop.f32.mrb[155].mxu0  ;;  %v4292_v63 = vpop.eup %4291  ;;  %v2278_v1 = vadd.f32 %v2277_v57, %v5737_v38  ;;  %v2679_v5 = vpack.c.bf16 %v4290_v16, %v4282_v50  ;;  %4313 = vtanh.f32 %v2163_v30  ;;  %2768 = vperm.xlu1 %3918, %v4751_v41  }
 0x36c   : > { %v2279_v2 = vpop.f32.mrb[155].mxu1  ;;  %v5752_v43 = vpop.eup %4293  ;;  %v2167_v6 = vadd.f32 %v2166_v58, %v5737_v38  ;;  %v2681_v33 = vpack.c.bf16 %v4292_v63, %v4284_v25  ;;  %4315 = vtanh.f32 %v2276_v42 }
 0x36d   : > { %v4296_v53 = vpop.eup %4295  ;;  %v2280_v9 = vadd.f32 %v2279_v2, %v5737_v38  ;;  %2847 = vmatprep.subr.bf16.mxu0 %v2679_v5  ;;  %v5762_v13 = vpop.permute.xlu1 %2015  ;;  %4317 = vtanh.f32 %v2165_v56  ;;  %v4753_v5 = vld [vmem:[%s6162_s4 + $0x60] sm:$0xff] }
 0x36e   : > { %v4298_v10 = vpop.eup %4297  ;;  %2960 = vmatprep.subr.bf16.mxu1 %v2681_v33  ;;  %2848 = vmatpush1.bf16.msra.mxu0 %v2678_v55  ;;  %v5764_v11 = vpop.permute.xlu0 %2011  ;;  %4319 = vtanh.f32 %v2278_v1  ;;  %v4752_v55 = vld [vmem:[%s6162_s4 + $0x58] sm:$0xff] }
 0x36f   : > { %v4300_v20 = vpop.eup %4299  ;;  %2961 = vmatpush1.bf16.msra.mxu1 %v2680_v60  ;;  %v2170_v12 = vpop.f32.mrb[156].mxu0  ;;  %4321 = vtanh.f32 %v2167_v6  ;;  %2772 = vperm.xlu0 %3917, %v4752_v55  }
 0x370   : > { %v4302_v44 = vpop.eup %4301  ;;  %v2171_v4 = vadd.f32 %v2170_v12, %v5764_v11  ;;  %v2283_v46 = vpop.f32.mrb[156].mxu1  ;;  %4323 = vtanh.f32 %v2280_v9  ;;  %2776 = vperm.xlu1 %3918, %v4753_v5  }
 0x371   : > { %v2172_v47 = vpop.f32.mrb[157].mxu0  ;;  %v4304_v19 = vpop.eup %4303  ;;  %v2284_v22 = vadd.f32 %v2283_v46, %v5764_v11  ;;  %v2686_v17 = vpack.c.bf16 %v4302_v44, %v5752_v43  ;;  %v4754_v43 = vld [vmem:[%s6162_s4 + $0x68] sm:$0xff] }
 0x372   : > { %v2173_v28 = vadd.f32 %v2172_v47, %v5764_v11  ;;  %v2285_v31 = vpop.f32.mrb[157].mxu1  ;;  %v2174_v29 = vpop.f32.mrb[158].mxu0  ;;  %4325 = vtanh.f32 %v2171_v4  ;;  %v2688_v45 = vpack.c.bf16 %v4304_v19, %v4296_v53 }
 0x373   : > { %v4306_v50 = vpop.eup %4305  ;;  %v2286_v25 = vadd.f32 %v2285_v31, %v5764_v11  ;;  %v2175_v23 = vadd.f32 %v2174_v29, %v5762_v13  ;;  %v2287_v39 = vpop.f32.mrb[158].mxu1  ;;  %4327 = vtanh.f32 %v2284_v22  ;;  %2780 = vperm.xlu0 %3917, %v4754_v43   ;;  %v4756_v29 = vld [vmem:[%s6162_s4 + $0x78] sm:$0xff] }
 0x374   : > { %v2176_v27 = vpop.f32.mrb[159].mxu0  ;;  %v4308_v35 = vpop.eup %4307  ;;  %v2288_v48 = vadd.f32 %v2287_v39, %v5762_v13  ;;  %v2687_v14 = vpack.c.bf16 %v4306_v50, %v4298_v10  ;;  %4329 = vtanh.f32 %v2173_v28 }
 0x375   : > { %v2289_v36 = vpop.f32.mrb[159].mxu1  ;;  %v5779_v61 = vpop.eup %4309  ;;  %v2177_v30 = vadd.f32 %v2176_v27, %v5762_v13  ;;  %v2689_v52 = vpack.c.bf16 %v4308_v35, %v4300_v20  ;;  %4331 = vtanh.f32 %v2286_v25 }
 0x376   : > { %v4312_v16 = vpop.eup %4311  ;;  %v2290_v42 = vadd.f32 %v2289_v36, %v5762_v13  ;;  %2849 = vmatprep.subr.bf16.mxu0 %v2687_v14  ;;  %4333 = vtanh.f32 %v2175_v23  ;;  %v2326_v58 = vpop.f32.mrb[160].mxu0 }
 0x377   : > { %v4314_v56 = vpop.eup %4313  ;;  %2962 = vmatprep.subr.bf16.mxu1 %v2689_v52  ;;  %2850 = vmatpush1.bf16.msra.mxu0 %v2686_v17  ;;  %4335 = vtanh.f32 %v2288_v48  ;;  %v2327_v63 = vadd.f32 %v2326_v58, %v5643_v62  ;;  %v2439_v1 = vpop.f32.mrb[160].mxu1 }
 0x378   : > { %v4316_v57 = vpop.eup %4315  ;;  %2963 = vmatpush1.bf16.msra.mxu1 %v2688_v45  ;;  %4337 = vtanh.f32 %v2177_v30  ;;  %v2328_v2 = vpop.f32.mrb[161].mxu0  ;;  %v2440_v33 = vadd.f32 %v2439_v1, %v5643_v62  ;;  %2788 = vperm.xlu0 %3917, %v4756_v29  }
 0x379   : > { %v4318_v60 = vpop.eup %4317  ;;  %4339 = vtanh.f32 %v2290_v42  ;;  %v2329_v7 = vadd.f32 %v2328_v2, %v5643_v62  ;;  %v2441_v8 = vpop.f32.mrb[161].mxu1 }
 0x37a   : > { %v4320_v6 = vpop.eup %4319  ;;  %v2330_v53 = vpop.f32.mrb[162].mxu0  ;;  %v2694_v9 = vpack.c.bf16 %v4318_v60, %v5779_v61  ;;  %4341 = vtanh.f32 %v2327_v63  ;;  %v2442_v20 = vadd.f32 %v2441_v8, %v5643_v62  ;;  %v4755_v62 = vld [vmem:[%s6162_s4 + $0x70] sm:$0xff] }
 0x37b   : > { %v4322_v10 = vpop.eup %4321  ;;  %v2331_v12 = vadd.f32 %v2330_v53, %v5645_v51  ;;  %v2443_v44 = vpop.f32.mrb[162].mxu1  ;;  %v2696_v46 = vpack.c.bf16 %v4320_v6, %v4312_v16  ;;  %4343 = vtanh.f32 %v2440_v33  ;;  %2784 = vperm.xlu1 %3918, %v4755_v62   ;;  %v5823_v33 = vld [vmem:[%s6160_s2 + $0x80] sm:$0xff]  }
 0x37c   : > { %v2332_v4 = vpop.f32.mrb[163].mxu0  ;;  %v4324_v47 = vpop.eup %4323  ;;  %v2444_v18 = vadd.f32 %v2443_v44, %v5645_v51  ;;  %v2695_v19 = vpack.c.bf16 %v4322_v10, %v4314_v56  ;;  %4345 = vtanh.f32 %v2329_v7  ;;  %3920 = vset.pattern.permute.xlu0 %v4785_v0 }
 0x37d   : > { %v2445_v37 = vpop.f32.mrb[163].mxu1  ;;  %v4326_v22 = vpop.eup %4325  ;;  %v2333_v28 = vadd.f32 %v2332_v4, %v5645_v51  ;;  %v2697_v31 = vpack.c.bf16 %v4324_v47, %v4316_v57  ;;  %4347 = vtanh.f32 %v2442_v20 }
 0x37e   : > { %v4328_v17 = vpop.eup %4327  ;;  %v2446_v50 = vadd.f32 %v2445_v37, %v5645_v51  ;;  %2851 = vmatprep.subr.bf16.mxu0 %v2695_v19  ;;  %4349 = vtanh.f32 %v2331_v12  ;;  %v2336_v39 = vpop.f32.mrb[164].mxu0 }
 0x37f   : > { %v4330_v25 = vpop.eup %4329  ;;  %2964 = vmatprep.subr.bf16.mxu1 %v2697_v31  ;;  %2852 = vmatpush1.bf16.msra.mxu0 %v2694_v9  ;;  %4351 = vtanh.f32 %v2444_v18  ;;  %v2337_v45 = vadd.f32 %v2336_v39, %v5647_v34  ;;  %v2449_v35 = vpop.f32.mrb[164].mxu1 }
 0x380   : > { %v4332_v23 = vpop.eup %4331  ;;  %2965 = vmatpush1.bf16.msra.mxu1 %v2696_v46  ;;  %4353 = vtanh.f32 %v2333_v28  ;;  %v2338_v48 = vpop.f32.mrb[165].mxu0  ;;  %3919 = vset.pattern.permute.xlu1 %v4785_v0  ;;  %v2450_v36 = vadd.f32 %v2449_v35, %v5647_v34  ;;  %v5840_v35 = vld [vmem:[%s6160_s2 + $0x88] sm:$0xff]  }
 0x381   : > { %v4334_v27 = vpop.eup %4333  ;;  %4355 = vtanh.f32 %v2446_v50  ;;  %v2339_v14 = vadd.f32 %v2338_v48, %v5647_v34  ;;  %v2451_v61 = vpop.f32.mrb[165].mxu1 }
 0x382   : > { %v4336_v51 = vpop.eup %4335  ;;  %v2340_v30 = vpop.f32.mrb[166].mxu0  ;;  %v2702_v52 = vpack.c.bf16 %v4334_v27, %v4326_v22  ;;  %4357 = vtanh.f32 %v2337_v45  ;;  %v2452_v55 = vadd.f32 %v2451_v61, %v5647_v34 }
 0x383   : > { %v4338_v41 = vpop.eup %4337  ;;  %v2341_v16 = vadd.f32 %v2340_v30, %v5657_v59  ;;  %v2453_v42 = vpop.f32.mrb[166].mxu1  ;;  %v2704_v57 = vpack.c.bf16 %v4336_v51, %v4328_v17  ;;  %4359 = vtanh.f32 %v2450_v36 }
 0x384   : > { %v2342_v56 = vpop.f32.mrb[167].mxu0  ;;  %v4340_v58 = vpop.eup %4339  ;;  %v2454_v60 = vadd.f32 %v2453_v42, %v5657_v59  ;;  %v2703_v1 = vpack.c.bf16 %v4338_v41, %v4330_v25  ;;  %4361 = vtanh.f32 %v2339_v14 }
 0x385   : > { %v2455_v63 = vpop.f32.mrb[167].mxu1  ;;  %v4342_v2 = vpop.eup %4341  ;;  %v2343_v5 = vadd.f32 %v2342_v56, %v5657_v59  ;;  %v2705_v43 = vpack.c.bf16 %v4340_v58, %v4332_v23  ;;  %4363 = vtanh.f32 %v2452_v55 }
 0x386   : > { %v4344_v6 = vpop.eup %4343  ;;  %v2456_v34 = vadd.f32 %v2455_v63, %v5657_v59  ;;  %2853 = vmatprep.subr.bf16.mxu0 %v2703_v1  ;;  %4365 = vtanh.f32 %v2341_v16  ;;  %v2346_v53 = vpop.f32.mrb[168].mxu0 }
 0x387   : > { %v4346_v7 = vpop.eup %4345  ;;  %2966 = vmatprep.subr.bf16.mxu1 %v2705_v43  ;;  %2854 = vmatpush1.bf16.msra.mxu0 %v2702_v52  ;;  %4367 = vtanh.f32 %v2454_v60  ;;  %v2347_v10 = vadd.f32 %v2346_v53, %v5667_v15  ;;  %v2459_v20 = vpop.f32.mrb[168].mxu1 }
 0x388   : > { %v4348_v8 = vpop.eup %4347  ;;  %2967 = vmatpush1.bf16.msra.mxu1 %v2704_v57  ;;  %4369 = vtanh.f32 %v2343_v5  ;;  %v2348_v59 = vpop.f32.mrb[169].mxu0  ;;  %v2460_v44 = vadd.f32 %v2459_v20, %v5667_v15 }
 0x389   : > { %v4350_v9 = vpop.eup %4349  ;;  %4371 = vtanh.f32 %v2456_v34  ;;  %v2349_v4 = vadd.f32 %v2348_v59, %v5667_v15  ;;  %v2461_v46 = vpop.f32.mrb[169].mxu1 }
 0x38a   : > { %v4352_v12 = vpop.eup %4351  ;;  %2872 = vmatmul.mubr.bf16.vlgmr.msra.gmra.mrb[192].mxu0 %v5823_v33  ;;  %v2350_v47 = vpop.f32.mrb[170].mxu0  ;;  %v2650_v18 = vpack.c.bf16 %v4350_v9, %v4342_v2  ;;  %4373 = vtanh.f32 %v2347_v10  ;;  %v2462_v19 = vadd.f32 %v2461_v46, %v5667_v15  ;;  %v5857_v10 = vld [vmem:[%s6160_s2 + $0x90] sm:$0xff]  }
 0x38b   : > { %v4354_v37 = vpop.eup %4353  ;;  %2985 = vmatmul.mubr.bf16.vlgmr.msra.gmra.mrb[192].mxu1 %v5823_v33  ;;  %v2351_v22 = vadd.f32 %v2350_v47, %v5669_v54  ;;  %v2463_v28 = vpop.f32.mrb[170].mxu1  ;;  %v2652_v62 = vpack.c.bf16 %v4352_v12, %v4344_v6  ;;  %2881 = vmatprep.mubr.bf16.mxu0 %v4785_v0  ;;  %4375 = vtanh.f32 %v2460_v44 }
 0x38c   : > { %v2352_v31 = vpop.f32.mrb[171].mxu0  ;;  %v4356_v29 = vpop.eup %4355  ;;  %v2464_v17 = vadd.f32 %v2463_v28, %v5669_v54  ;;  %v2651_v25 = vpack.c.bf16 %v4354_v37, %v4346_v7  ;;  %2994 = vmatprep.mubr.bf16.mxu1 %v4785_v0  ;;  %4377 = vtanh.f32 %v2349_v4 }
 0x38d   : > { %v2465_v50 = vpop.f32.mrb[171].mxu1  ;;  %v4358_v23 = vpop.eup %4357  ;;  %v2353_v39 = vadd.f32 %v2352_v31, %v5669_v54  ;;  %v2653_v15 = vpack.c.bf16 %v4356_v29, %v4348_v8  ;;  %4379 = vtanh.f32 %v2462_v19 }
 0x38e   : > { %v4360_v27 = vpop.eup %4359  ;;  %v2466_v45 = vadd.f32 %v2465_v50, %v5669_v54  ;;  %3065 = vmatprep.subr.bf16.mxu0 %v2651_v25  ;;  %4381 = vtanh.f32 %v2351_v22  ;;  %v2356_v36 = vpop.f32.mrb[172].mxu0 }
 0x38f   : > { %v4362_v48 = vpop.eup %4361  ;;  %3178 = vmatprep.subr.bf16.mxu1 %v2653_v15  ;;  %3066 = vmatpush1.bf16.msra.mxu0 %v2650_v18  ;;  %4383 = vtanh.f32 %v2464_v17  ;;  %v2357_v61 = vadd.f32 %v2356_v36, %v5679_v32  ;;  %v2469_v30 = vpop.f32.mrb[172].mxu1 }
 0x390   : > { %v4364_v51 = vpop.eup %4363  ;;  %3179 = vmatpush1.bf16.msra.mxu1 %v2652_v62  ;;  %4385 = vtanh.f32 %v2353_v39  ;;  %v2358_v54 = vpop.f32.mrb[173].mxu0  ;;  %v2470_v41 = vadd.f32 %v2469_v30, %v5679_v32 }
 0x391   : > { %v4366_v14 = vpop.eup %4365  ;;  %4387 = vtanh.f32 %v2466_v45  ;;  %v2359_v55 = vadd.f32 %v2358_v54, %v5679_v32  ;;  %v2471_v16 = vpop.f32.mrb[173].mxu1 }
 0x392   : > { %v4368_v52 = vpop.eup %4367  ;;  %2882 = vmatmul.mubr.bf16.gmra.mrb[196].mxu0 %v5840_v35  ;;  %v2360_v42 = vpop.f32.mrb[174].mxu0  ;;  %v2658_v56 = vpack.c.bf16 %v4366_v14, %v4358_v23  ;;  %4389 = vtanh.f32 %v2357_v61  ;;  %v2472_v58 = vadd.f32 %v2471_v16, %v5679_v32  ;;  %v5874_v14 = vld [vmem:[%s6160_s2 + $0x98] sm:$0xff]  }
 0x393   : > { %v4370_v57 = vpop.eup %4369  ;;  %2995 = vmatmul.mubr.bf16.gmra.mrb[196].mxu1 %v5840_v35  ;;  %v2361_v60 = vadd.f32 %v2360_v42, %v5681_v24  ;;  %v2473_v63 = vpop.f32.mrb[174].mxu1  ;;  %v2660_v2 = vpack.c.bf16 %v4368_v52, %v4360_v27  ;;  %2891 = vmatprep.mubr.bf16.mxu0 %v4785_v0  ;;  %4391 = vtanh.f32 %v2470_v41 }
 0x394   : > { %v2362_v1 = vpop.f32.mrb[175].mxu0  ;;  %v4372_v5 = vpop.eup %4371  ;;  %v2474_v43 = vadd.f32 %v2473_v63, %v5681_v24  ;;  %v2659_v34 = vpack.c.bf16 %v4370_v57, %v4362_v48  ;;  %3004 = vmatprep.mubr.bf16.mxu1 %v4785_v0  ;;  %4393 = vtanh.f32 %v2359_v55 }
 0x395   : > { %v2475_v6 = vpop.f32.mrb[175].mxu1  ;;  %v4374_v7 = vpop.eup %4373  ;;  %v2363_v8 = vadd.f32 %v2362_v1, %v5681_v24  ;;  %v2661_v32 = vpack.c.bf16 %v4372_v5, %v4364_v51  ;;  %4395 = vtanh.f32 %v2472_v58 }
 0x396   : > { %v4376_v53 = vpop.eup %4375  ;;  %v2476_v9 = vadd.f32 %v2475_v6, %v5681_v24  ;;  %3067 = vmatprep.subr.bf16.mxu0 %v2659_v34  ;;  %4397 = vtanh.f32 %v2361_v60  ;;  %v2366_v12 = vpop.f32.mrb[176].mxu0 }
 0x397   : > { %v4378_v20 = vpop.eup %4377  ;;  %3180 = vmatprep.subr.bf16.mxu1 %v2661_v32  ;;  %3068 = vmatpush1.bf16.msra.mxu0 %v2658_v56  ;;  %4399 = vtanh.f32 %v2474_v43  ;;  %v2367_v4 = vadd.f32 %v2366_v12, %v5691_v3  ;;  %v2479_v46 = vpop.f32.mrb[176].mxu1  ;;  %v5891_v12 = vld [vmem:[%s6160_s2 + $0xa0] sm:$0xff]  }
 0x398   : > { %v4380_v59 = vpop.eup %4379  ;;  %3181 = vmatpush1.bf16.msra.mxu1 %v2660_v2  ;;  %4401 = vtanh.f32 %v2363_v8  ;;  %v2368_v24 = vpop.f32.mrb[177].mxu0  ;;  %v2480_v18 = vadd.f32 %v2479_v46, %v5691_v3 }
 0x399   : > { %v4382_v44 = vpop.eup %4381  ;;  %4403 = vtanh.f32 %v2476_v9  ;;  %v2369_v37 = vadd.f32 %v2368_v24, %v5691_v3  ;;  %v2481_v19 = vpop.f32.mrb[177].mxu1 }
 0x39a   : > { %v4384_v47 = vpop.eup %4383  ;;  %2892 = vmatmul.mubr.bf16.gmra.mrb[200].mxu0 %v5857_v10  ;;  %v2370_v22 = vpop.f32.mrb[178].mxu0  ;;  %v2666_v28 = vpack.c.bf16 %v4382_v44, %v4374_v7  ;;  %4405 = vtanh.f32 %v2367_v4  ;;  %v2482_v62 = vadd.f32 %v2481_v19, %v5691_v3 }
 0x39b   : > { %v4386_v31 = vpop.eup %4385  ;;  %3005 = vmatmul.mubr.bf16.gmra.mrb[200].mxu1 %v5857_v10  ;;  %v2371_v29 = vadd.f32 %v2370_v22, %v5693_v26  ;;  %v2483_v17 = vpop.f32.mrb[178].mxu1  ;;  %v2668_v25 = vpack.c.bf16 %v4384_v47, %v4376_v53  ;;  %2901 = vmatprep.mubr.bf16.mxu0 %v4785_v0  ;;  %4407 = vtanh.f32 %v2480_v18 }
 0x39c   : > { %v2372_v50 = vpop.f32.mrb[179].mxu0  ;;  %v4388_v23 = vpop.eup %4387  ;;  %v2484_v39 = vadd.f32 %v2483_v17, %v5693_v26  ;;  %v2667_v27 = vpack.c.bf16 %v4386_v31, %v4378_v20  ;;  %3014 = vmatprep.mubr.bf16.mxu1 %v4785_v0  ;;  %4409 = vtanh.f32 %v2369_v37 }
 0x39d   : > { %v2485_v15 = vpop.f32.mrb[179].mxu1  ;;  %v4390_v45 = vpop.eup %4389  ;;  %v2373_v48 = vadd.f32 %v2372_v50, %v5693_v26  ;;  %v2669_v3 = vpack.c.bf16 %v4388_v23, %v4380_v59  ;;  %4411 = vtanh.f32 %v2482_v62 }
 0x39e   : > { %v4392_v51 = vpop.eup %4391  ;;  %v2486_v36 = vadd.f32 %v2485_v15, %v5693_v26  ;;  %3069 = vmatprep.subr.bf16.mxu0 %v2667_v27  ;;  %4413 = vtanh.f32 %v2371_v29  ;;  %v2376_v54 = vpop.f32.mrb[180].mxu0 }
 0x39f   : > { %v4394_v61 = vpop.eup %4393  ;;  %3182 = vmatprep.subr.bf16.mxu1 %v2669_v3  ;;  %3070 = vmatpush1.bf16.msra.mxu0 %v2666_v28  ;;  %4415 = vtanh.f32 %v2484_v39  ;;  %v2377_v41 = vadd.f32 %v2376_v54, %v5707_v40  ;;  %v2489_v55 = vpop.f32.mrb[180].mxu1 }
 0x3a0   : > { %v4396_v30 = vpop.eup %4395  ;;  %3183 = vmatpush1.bf16.msra.mxu1 %v2668_v25  ;;  %4417 = vtanh.f32 %v2373_v48  ;;  %v2378_v26 = vpop.f32.mrb[181].mxu0  ;;  %v2490_v42 = vadd.f32 %v2489_v55, %v5707_v40 }
 0x3a1   : > { %v4398_v52 = vpop.eup %4397  ;;  %4419 = vtanh.f32 %v2486_v36  ;;  %v2379_v56 = vadd.f32 %v2378_v26, %v5707_v40  ;;  %v2491_v57 = vpop.f32.mrb[181].mxu1 }
 0x3a2   : > { %v4400_v16 = vpop.eup %4399  ;;  %2902 = vmatmul.mubr.bf16.gmra.mrb[204].mxu0 %v5874_v14  ;;  %v2380_v58 = vpop.f32.mrb[182].mxu0  ;;  %v2674_v60 = vpack.c.bf16 %v4398_v52, %v4390_v45  ;;  %4421 = vtanh.f32 %v2377_v41  ;;  %v2492_v1 = vadd.f32 %v2491_v57, %v5707_v40 }
 0x3a3   : > { %v4402_v63 = vpop.eup %4401  ;;  %3015 = vmatmul.mubr.bf16.gmra.mrb[204].mxu1 %v5874_v14  ;;  %v2381_v2 = vadd.f32 %v2380_v58, %v5709_v21  ;;  %v2493_v5 = vpop.f32.mrb[182].mxu1  ;;  %v2676_v6 = vpack.c.bf16 %v4400_v16, %v4392_v51  ;;  %2911 = vmatprep.mubr.bf16.mxu0 %v4785_v0  ;;  %4423 = vtanh.f32 %v2490_v42 }
 0x3a4   : > { %v2382_v43 = vpop.f32.mrb[183].mxu0  ;;  %v4404_v34 = vpop.eup %4403  ;;  %v2494_v7 = vadd.f32 %v2493_v5, %v5709_v21  ;;  %v2675_v32 = vpack.c.bf16 %v4402_v63, %v4394_v61  ;;  %3024 = vmatprep.mubr.bf16.mxu1 %v4785_v0  ;;  %4425 = vtanh.f32 %v2379_v56 }
 0x3a5   : > { %v2495_v8 = vpop.f32.mrb[183].mxu1  ;;  %v4406_v53 = vpop.eup %4405  ;;  %v2383_v9 = vadd.f32 %v2382_v43, %v5709_v21  ;;  %v2677_v40 = vpack.c.bf16 %v4404_v34, %v4396_v30  ;;  %4427 = vtanh.f32 %v2492_v1  ;;  %v5908_v30 = vld [vmem:[%s6160_s2 + $0xa8] sm:$0xff]  }
 0x3a6   : > { %v4408_v20 = vpop.eup %4407  ;;  %v2496_v59 = vadd.f32 %v2495_v8, %v5709_v21  ;;  %3071 = vmatprep.subr.bf16.mxu0 %v2675_v32  ;;  %4429 = vtanh.f32 %v2381_v2  ;;  %v2386_v46 = vpop.f32.mrb[184].mxu0 }
 0x3a7   : > { %v4410_v44 = vpop.eup %4409  ;;  %3184 = vmatprep.subr.bf16.mxu1 %v2677_v40  ;;  %3072 = vmatpush1.bf16.msra.mxu0 %v2674_v60  ;;  %4431 = vtanh.f32 %v2494_v7  ;;  %v2387_v47 = vadd.f32 %v2386_v46, %v5735_v49  ;;  %v2499_v18 = vpop.f32.mrb[184].mxu1 }
 0x3a8   : > { %v4412_v4 = vpop.eup %4411  ;;  %3185 = vmatpush1.bf16.msra.mxu1 %v2676_v6  ;;  %4433 = vtanh.f32 %v2383_v9  ;;  %v2388_v21 = vpop.f32.mrb[185].mxu0  ;;  %v2500_v19 = vadd.f32 %v2499_v18, %v5735_v49 }
 0x3a9   : > { %v4414_v24 = vpop.eup %4413  ;;  %4435 = vtanh.f32 %v2496_v59  ;;  %v2389_v22 = vadd.f32 %v2388_v21, %v5735_v49  ;;  %v2501_v28 = vpop.f32.mrb[185].mxu1 }
 0x3aa   : > { %v4416_v37 = vpop.eup %4415  ;;  %2912 = vmatmul.mubr.bf16.gmra.mrb[208].mxu0 %v5891_v12  ;;  %v2390_v31 = vpop.f32.mrb[186].mxu0  ;;  %v2682_v62 = vpack.c.bf16 %v4414_v24, %v4406_v53  ;;  %4437 = vtanh.f32 %v2387_v47  ;;  %v2502_v17 = vadd.f32 %v2501_v28, %v5735_v49 }
 0x3ab   : > { %v4418_v29 = vpop.eup %4417  ;;  %3025 = vmatmul.mubr.bf16.gmra.mrb[208].mxu1 %v5891_v12  ;;  %v2391_v50 = vadd.f32 %v2390_v31, %v5737_v38  ;;  %v2503_v25 = vpop.f32.mrb[186].mxu1  ;;  %v2684_v39 = vpack.c.bf16 %v4416_v37, %v4408_v20  ;;  %2921 = vmatprep.mubr.bf16.mxu0 %v4785_v0  ;;  %4439 = vtanh.f32 %v2500_v19 }
 0x3ac   : > { %v2392_v23 = vpop.f32.mrb[187].mxu0  ;;  %v4420_v15 = vpop.eup %4419  ;;  %v2504_v27 = vadd.f32 %v2503_v25, %v5737_v38  ;;  %v2683_v48 = vpack.c.bf16 %v4418_v29, %v4410_v44  ;;  %3034 = vmatprep.mubr.bf16.mxu1 %v4785_v0  ;;  %4441 = vtanh.f32 %v2389_v22  ;;  %v5925_v44 = vld [vmem:[%s6160_s2 + $0xb0] sm:$0xff]  }
 0x3ad   : > { %v2505_v45 = vpop.f32.mrb[187].mxu1  ;;  %v4422_v3 = vpop.eup %4421  ;;  %v2393_v51 = vadd.f32 %v2392_v23, %v5737_v38  ;;  %v2685_v49 = vpack.c.bf16 %v4420_v15, %v4412_v4  ;;  %4443 = vtanh.f32 %v2502_v17 }
 0x3ae   : > { %v4424_v36 = vpop.eup %4423  ;;  %v2506_v61 = vadd.f32 %v2505_v45, %v5737_v38  ;;  %3073 = vmatprep.subr.bf16.mxu0 %v2683_v48  ;;  %4445 = vtanh.f32 %v2391_v50  ;;  %v2396_v41 = vpop.f32.mrb[188].mxu0 }
 0x3af   : > { %v4426_v54 = vpop.eup %4425  ;;  %3186 = vmatprep.subr.bf16.mxu1 %v2685_v49  ;;  %3074 = vmatpush1.bf16.msra.mxu0 %v2682_v62  ;;  %4447 = vtanh.f32 %v2504_v27  ;;  %v2397_v26 = vadd.f32 %v2396_v41, %v5764_v11  ;;  %v2509_v16 = vpop.f32.mrb[188].mxu1  ;;  %v3956_v62 = vld [vmem:[%s6160_s2 + $0xb8] sm:$0xff]  }
 0x3b0   : > { %v4428_v52 = vpop.eup %4427  ;;  %3187 = vmatpush1.bf16.msra.mxu1 %v2684_v39  ;;  %4449 = vtanh.f32 %v2393_v51  ;;  %v2398_v38 = vpop.f32.mrb[189].mxu0  ;;  %v2510_v56 = vadd.f32 %v2509_v16, %v5764_v11 }
 0x3b1   : > { %v4430_v55 = vpop.eup %4429  ;;  %4451 = vtanh.f32 %v2506_v61  ;;  %v2399_v57 = vadd.f32 %v2398_v38, %v5764_v11  ;;  %v2511_v58 = vpop.f32.mrb[189].mxu1 }
 0x3b2   : > { %v4432_v42 = vpop.eup %4431  ;;  %2922 = vmatmul.mubr.bf16.gmra.mrb[212].mxu0 %v5908_v30  ;;  %v2400_v60 = vpop.f32.mrb[190].mxu0  ;;  %v2690_v63 = vpack.c.bf16 %v4430_v55, %v4422_v3  ;;  %4453 = vtanh.f32 %v2397_v26  ;;  %v2512_v2 = vadd.f32 %v2511_v58, %v5764_v11 }
 0x3b3   : > { %v4434_v1 = vpop.eup %4433  ;;  %3035 = vmatmul.mubr.bf16.gmra.mrb[212].mxu1 %v5908_v30  ;;  %v2401_v5 = vadd.f32 %v2400_v60, %v5762_v13  ;;  %v2513_v43 = vpop.f32.mrb[190].mxu1  ;;  %v2692_v34 = vpack.c.bf16 %v4432_v42, %v4424_v36  ;;  %2931 = vmatprep.mubr.bf16.mxu0 %v4785_v0  ;;  %4455 = vtanh.f32 %v2510_v56 }
 0x3b4   : > { %v2402_v6 = vpop.f32.mrb[191].mxu0  ;;  %v4436_v7 = vpop.eup %4435  ;;  %v2514_v8 = vadd.f32 %v2513_v43, %v5762_v13  ;;  %v2691_v53 = vpack.c.bf16 %v4434_v1, %v4426_v54  ;;  %3044 = vmatprep.mubr.bf16.mxu1 %v4785_v0  ;;  %4457 = vtanh.f32 %v2399_v57 }
 0x3b5   : > { %v2515_v32 = vpop.f32.mrb[191].mxu1  ;;  %v4438_v9 = vpop.eup %4437  ;;  %v2403_v40 = vadd.f32 %v2402_v6, %v5762_v13  ;;  %v2693_v11 = vpack.c.bf16 %v4436_v7, %v4428_v52  ;;  %4459 = vtanh.f32 %v2512_v2 }
 0x3b6   : > { %v4440_v20 = vpop.eup %4439  ;;  %v2516_v59 = vadd.f32 %v2515_v32, %v5762_v13  ;;  %3075 = vmatprep.subr.bf16.mxu0 %v2691_v53  ;;  %4461 = vtanh.f32 %v2401_v5 }
 0x3b7   : > { %v4442_v4 = vpop.eup %4441  ;;  %3188 = vmatprep.subr.bf16.mxu1 %v2693_v11  ;;  %3076 = vmatpush1.bf16.msra.mxu0 %v2690_v63  ;;  %4463 = vtanh.f32 %v2514_v8 }
 0x3b8   : > { %v4444_v46 = vpop.eup %4443  ;;  %3189 = vmatpush1.bf16.msra.mxu1 %v2692_v34  ;;  %4465 = vtanh.f32 %v2403_v40 }
 0x3b9   : > { %v4446_v24 = vpop.eup %4445  ;;  %4467 = vtanh.f32 %v2516_v59 }
 0x3ba   : > { %v4448_v47 = vpop.eup %4447  ;;  %2932 = vmatmul.mubr.bf16.gmra.mrb[216].mxu0 %v5925_v44  ;;  %v2698_v13 = vpack.c.bf16 %v4446_v24, %v4438_v9 }
 0x3bb   : > { %v4450_v18 = vpop.eup %4449  ;;  %3045 = vmatmul.mubr.bf16.gmra.mrb[216].mxu1 %v5925_v44  ;;  %v2700_v21 = vpack.c.bf16 %v4448_v47, %v4440_v20  ;;  %2941 = vmatprep.mubr.bf16.mxu0 %v4785_v0 }
 0x3bc   : > { %v4452_v37 = vpop.eup %4451  ;;  %v2699_v19 = vpack.c.bf16 %v4450_v18, %v4442_v4  ;;  %3054 = vmatprep.mubr.bf16.mxu1 %v4785_v0 }
 0x3bd   : > { %v4454_v22 = vpop.eup %4453  ;;  %v2701_v28 = vpack.c.bf16 %v4452_v37, %v4444_v46 }
 0x3be   : > { %v4456_v31 = vpop.eup %4455  ;;  %3077 = vmatprep.subr.bf16.mxu0 %v2699_v19 }
 0x3bf   : > { %v4458_v29 = vpop.eup %4457  ;;  %3190 = vmatprep.subr.bf16.mxu1 %v2701_v28  ;;  %3078 = vmatpush1.bf16.msra.mxu0 %v2698_v13 }
 0x3c0   : > { %v4460_v17 = vpop.eup %4459  ;;  %3191 = vmatpush1.bf16.msra.mxu1 %v2700_v21 }
 0x3c1   : > { %v4462_v50 = vpop.eup %4461 }
 0x3c2   : > { %v4464_v25 = vpop.eup %4463  ;;  %2942 = vmatmul.mubr.bf16.gmra.mrb[220].mxu0 %v3956_v62  ;;  %v2706_v23 = vpack.c.bf16 %v4462_v50, %v4454_v22 }
 0x3c3   : > { %v4466_v39 = vpop.eup %4465  ;;  %3055 = vmatmul.mubr.bf16.gmra.mrb[220].mxu1 %v3956_v62  ;;  %v2708_v15 = vpack.c.bf16 %v4464_v25, %v4456_v31  ;;  %3097 = vmatprep.mubr.bf16.mxu0 %v4785_v0 }
 0x3c4   : > { %v4468_v27 = vpop.eup %4467  ;;  %v2707_v45 = vpack.c.bf16 %v4466_v39, %v4458_v29  ;;  %3210 = vmatprep.mubr.bf16.mxu1 %v4785_v0 }
 0x3c5   : > { %v2709_v48 = vpack.c.bf16 %v4468_v27, %v4460_v17  ;;  %v3484_v27 = vld [vmem:[%s6163_s5] sm:$0x7] }
 0x3c6   : > { %3079 = vmatprep.subr.bf16.mxu0 %v2707_v45  ;;  %3487 = vperm.xlu1 %3919, %v3484_v27  }
 0x3c7   : > { %3192 = vmatprep.subr.bf16.mxu1 %v2709_v48  ;;  %3080 = vmatpush1.bf16.msra.mxu0 %v2706_v23 }
 0x3c8   : > { %3193 = vmatpush1.bf16.msra.mxu1 %v2708_v15 }
 0x3ca   : > { %3098 = vmatmul.mubr.bf16.vlgmr.msra.gmra.mrb[224].mxu0 %v5823_v33 }
 0x3cb   : > { %3211 = vmatmul.mubr.bf16.vlgmr.msra.gmra.mrb[224].mxu1 %v5823_v33  ;;  %3107 = vmatprep.mubr.bf16.mxu0 %v4785_v0 }
 0x3cc   : > { %3220 = vmatprep.mubr.bf16.mxu1 %v4785_v0 }
 0x3d1   : > { %v5966_v33 = vpop.permute.xlu0 %2728 }
 0x3d2   : > { %3108 = vmatmul.mubr.bf16.gmra.mrb[228].mxu0 %v5840_v35 }
 0x3d3   : > { %3221 = vmatmul.mubr.bf16.gmra.mrb[228].mxu1 %v5840_v35  ;;  %3117 = vmatprep.mubr.bf16.mxu0 %v4785_v0 }
 0x3d4   : > { %3230 = vmatprep.mubr.bf16.mxu1 %v4785_v0 }
 0x3d8   : > { %v5980_v57 = vpop.permute.xlu0 %2740 }
 0x3da   : > { %3118 = vmatmul.mubr.bf16.gmra.mrb[232].mxu0 %v5857_v10 }
 0x3db   : > { %3231 = vmatmul.mubr.bf16.gmra.mrb[232].mxu1 %v5857_v10  ;;  %3127 = vmatprep.mubr.bf16.mxu0 %v4785_v0  ;;  %v5968_v10 = vpop.permute.xlu1 %2732 }
 0x3dc   : > { %3240 = vmatprep.mubr.bf16.mxu1 %v4785_v0  ;;  %v5992_v46 = vpop.permute.xlu0 %2748 }
 0x3df   : > { %v5977_v38 = vpop.permute.xlu1 %2736 }
 0x3e2   : > { %3128 = vmatmul.mubr.bf16.gmra.mrb[236].mxu0 %v5874_v14 }
 0x3e3   : > { %3241 = vmatmul.mubr.bf16.gmra.mrb[236].mxu1 %v5874_v14  ;;  %3137 = vmatprep.mubr.bf16.mxu0 %v4785_v0  ;;  %v5989_v20 = vpop.permute.xlu1 %2744 }
 0x3e4   : > { %3250 = vmatprep.mubr.bf16.mxu1 %v4785_v0 }
 0x3ea   : > { %3138 = vmatmul.mubr.bf16.gmra.mrb[240].mxu0 %v5891_v12 }
 0x3eb   : > { %3251 = vmatmul.mubr.bf16.gmra.mrb[240].mxu1 %v5891_v12  ;;  %3147 = vmatprep.mubr.bf16.mxu0 %v4785_v0 }
 0x3ec   : > { %3260 = vmatprep.mubr.bf16.mxu1 %v4785_v0 }
 0x3f2   : > { %3148 = vmatmul.mubr.bf16.gmra.mrb[244].mxu0 %v5908_v30 }
 0x3f3   : > { %3261 = vmatmul.mubr.bf16.gmra.mrb[244].mxu1 %v5908_v30  ;;  %3157 = vmatprep.mubr.bf16.mxu0 %v4785_v0 }
 0x3f4   : > { %3270 = vmatprep.mubr.bf16.mxu1 %v4785_v0 }
 0x3fa   : > { %3158 = vmatmul.mubr.bf16.gmra.mrb[248].mxu0 %v5925_v44 }
 0x3fb   : > { %3271 = vmatmul.mubr.bf16.gmra.mrb[248].mxu1 %v5925_v44  ;;  %3167 = vmatprep.mubr.bf16.mxu0 %v4785_v0 }
 0x3fc   : > { %3280 = vmatprep.mubr.bf16.mxu1 %v4785_v0 }
 0x402   : > { %3168 = vmatmul.mubr.bf16.gmra.mrb[252].mxu0 %v3956_v62 }
 0x403   : > { %3281 = vmatmul.mubr.bf16.gmra.mrb[252].mxu1 %v3956_v62  ;;  %3522 = vmatprep.mubr.bf16.mxu0 %v4785_v0 }
 0x404   : > { %3563 = vmatprep.mubr.bf16.mxu1 %v4785_v0 }
 0x45d   : > { %v2873_v35 = vpop.f32.mrb[192].mxu0 }
 0x45e   : > { %v2986_v14 = vpop.f32.mrb[192].mxu1  ;;  %v2875_v12 = vpop.f32.mrb[193].mxu0  ;;  %v2874_v3 = vadd.f32 %v2873_v35, %v5966_v33 }
 0x45f   : > { %v2988_v51 = vpop.f32.mrb[193].mxu1  ;;  %v2877_v49 = vpop.f32.mrb[194].mxu0  ;;  %v2876_v36 = vadd.f32 %v2875_v12, %v5966_v33  ;;  %v2987_v16 = vadd.f32 %v2986_v14, %v5966_v33 }
 0x460   : > { %v2990_v61 = vpop.f32.mrb[194].mxu1  ;;  %v2879_v30 = vpop.f32.mrb[195].mxu0  ;;  %v2989_v54 = vadd.f32 %v2988_v51, %v5966_v33  ;;  %4469 = vtanh.f32 %v2874_v3  ;;  %v2878_v55 = vadd.f32 %v2877_v49, %v5968_v10 }
 0x461   : > { %v2880_v52 = vadd.f32 %v2879_v30, %v5968_v10  ;;  %v2992_v41 = vpop.f32.mrb[195].mxu1  ;;  %4471 = vtanh.f32 %v2876_v36  ;;  %v2991_v42 = vadd.f32 %v2990_v61, %v5968_v10  ;;  %v6004_v49 = vpop.permute.xlu1 %2752 }
 0x462   : > { %v2993_v26 = vadd.f32 %v2992_v41, %v5968_v10  ;;  %4473 = vtanh.f32 %v2989_v54  ;;  %v6007_v54 = vpop.permute.xlu0 %2756 }
 0x463   : > { %4475 = vtanh.f32 %v2880_v52 }
 0x464   : > { %4477 = vtanh.f32 %v2993_v26 }
 0x465   : > { %v2883_v56 = vpop.f32.mrb[196].mxu0  ;;  %4479 = vtanh.f32 %v2878_v55 }
 0x466   : > { %v2996_v58 = vpop.f32.mrb[196].mxu1  ;;  %v2885_v60 = vpop.f32.mrb[197].mxu0  ;;  %4481 = vtanh.f32 %v2987_v16  ;;  %v2884_v63 = vadd.f32 %v2883_v56, %v5977_v38 }
 0x467   : > { %v2998_v1 = vpop.f32.mrb[197].mxu1  ;;  %v2887_v2 = vpop.f32.mrb[198].mxu0  ;;  %4483 = vtanh.f32 %v2991_v42  ;;  %v2886_v5 = vadd.f32 %v2885_v60, %v5977_v38  ;;  %v2997_v40 = vadd.f32 %v2996_v58, %v5977_v38 }
 0x468   : > { %v3000_v43 = vpop.f32.mrb[198].mxu1  ;;  %v2889_v6 = vpop.f32.mrb[199].mxu0  ;;  %v2999_v34 = vadd.f32 %v2998_v1, %v5977_v38  ;;  %4485 = vtanh.f32 %v2884_v63  ;;  %v2888_v32 = vadd.f32 %v2887_v2, %v5980_v57 }
 0x469   : > { %v2890_v7 = vadd.f32 %v2889_v6, %v5980_v57  ;;  %v3002_v8 = vpop.f32.mrb[199].mxu1  ;;  %4487 = vtanh.f32 %v2886_v5  ;;  %v3001_v59 = vadd.f32 %v3000_v43, %v5980_v57 }
 0x46a   : > { %v4470_v53 = vpop.eup %4469  ;;  %v3003_v9 = vadd.f32 %v3002_v8, %v5980_v57  ;;  %4489 = vtanh.f32 %v2999_v34 }
 0x46b   : > { %v4472_v11 = vpop.eup %4471  ;;  %4491 = vtanh.f32 %v2890_v7 }
 0x46c   : > { %v4474_v44 = vpop.eup %4473  ;;  %4493 = vtanh.f32 %v3003_v9 }
 0x46d   : > { %v4476_v4 = vpop.eup %4475  ;;  %v2893_v24 = vpop.f32.mrb[200].mxu0  ;;  %4495 = vtanh.f32 %v2888_v32 }
 0x46e   : > { %v4478_v47 = vpop.eup %4477  ;;  %v2894_v13 = vadd.f32 %v2893_v24, %v5989_v20  ;;  %v3006_v18 = vpop.f32.mrb[200].mxu1  ;;  %v3420_v37 = vpack.c.bf16 %v4476_v4, %v4472_v11  ;;  %4497 = vtanh.f32 %v2997_v40 }
 0x46f   : > { %v2895_v21 = vpop.f32.mrb[201].mxu0  ;;  %v4480_v19 = vpop.eup %4479  ;;  %v3007_v22 = vadd.f32 %v3006_v18, %v5989_v20  ;;  %v3422_v29 = vpack.c.bf16 %v4478_v47, %v4474_v44  ;;  %4499 = vtanh.f32 %v3001_v59 }
 0x470   : > { %v2896_v28 = vadd.f32 %v2895_v21, %v5989_v20  ;;  %v3008_v31 = vpop.f32.mrb[201].mxu1  ;;  %v2897_v62 = vpop.f32.mrb[202].mxu0  ;;  %4501 = vtanh.f32 %v2894_v13  ;;  %3490 = vmatprep.subr.bf16.mxu0 %v3420_v37  ;;  %v3419_v15 = vpack.c.bf16 %v4480_v19, %v4470_v53 }
 0x471   : > { %v4482_v17 = vpop.eup %4481  ;;  %v3009_v50 = vadd.f32 %v3008_v31, %v5989_v20  ;;  %v2898_v25 = vadd.f32 %v2897_v62, %v5992_v46  ;;  %v3010_v23 = vpop.f32.mrb[202].mxu1  ;;  %4503 = vtanh.f32 %v3007_v22  ;;  %3531 = vmatprep.subr.bf16.mxu1 %v3422_v29 }
 0x472   : > { %v2899_v39 = vpop.f32.mrb[203].mxu0  ;;  %v4484_v45 = vpop.eup %4483  ;;  %v3011_v48 = vadd.f32 %v3010_v23, %v5992_v46  ;;  %4505 = vtanh.f32 %v2896_v28  ;;  %3491 = vmatpush1.bf16.msra.mxu0 %v3419_v15 }
 0x473   : > { %v3012_v35 = vpop.f32.mrb[203].mxu1  ;;  %v4486_v14 = vpop.eup %4485  ;;  %v2900_v12 = vadd.f32 %v2899_v39, %v5992_v46  ;;  %v3421_v3 = vpack.c.bf16 %v4484_v45, %v4482_v17  ;;  %4507 = vtanh.f32 %v3009_v50 }
 0x474   : > { %v4488_v51 = vpop.eup %4487  ;;  %v3013_v36 = vadd.f32 %v3012_v35, %v5992_v46  ;;  %4509 = vtanh.f32 %v2898_v25  ;;  %v6016_v4 = vpop.permute.xlu1 %2760 }
 0x475   : > { %v4490_v61 = vpop.eup %4489  ;;  %3532 = vmatpush1.bf16.msra.mxu1 %v3421_v3  ;;  %4511 = vtanh.f32 %v3011_v48  ;;  %v2903_v52 = vpop.f32.mrb[204].mxu0 }
 0x476   : > { %v4492_v30 = vpop.eup %4491  ;;  %4513 = vtanh.f32 %v2900_v12  ;;  %v2904_v55 = vadd.f32 %v2903_v52, %v6004_v49  ;;  %v3016_v26 = vpop.f32.mrb[204].mxu1 }
 0x477   : > { %v4494_v41 = vpop.eup %4493  ;;  %v2905_v16 = vpop.f32.mrb[205].mxu0  ;;  %v3428_v42 = vpack.c.bf16 %v4492_v30, %v4488_v51  ;;  %4515 = vtanh.f32 %v3013_v36  ;;  %v3017_v58 = vadd.f32 %v3016_v26, %v6004_v49 }
 0x478   : > { %v4496_v56 = vpop.eup %4495  ;;  %v2906_v60 = vadd.f32 %v2905_v16, %v6004_v49  ;;  %v3018_v63 = vpop.f32.mrb[205].mxu1  ;;  %v3430_v2 = vpack.c.bf16 %v4494_v41, %v4490_v61  ;;  %4517 = vtanh.f32 %v2904_v55 }
 0x479   : > { %v2907_v1 = vpop.f32.mrb[206].mxu0  ;;  %v4498_v5 = vpop.eup %4497  ;;  %v3019_v43 = vadd.f32 %v3018_v63, %v6004_v49  ;;  %3492 = vmatprep.subr.bf16.mxu0 %v3428_v42  ;;  %v3427_v8 = vpack.c.bf16 %v4496_v56, %v4486_v14  ;;  %4519 = vtanh.f32 %v3017_v58 }
 0x47a   : > { %v2908_v6 = vadd.f32 %v2907_v1, %v6007_v54  ;;  %v3020_v34 = vpop.f32.mrb[206].mxu1  ;;  %v2909_v7 = vpop.f32.mrb[207].mxu0  ;;  %3533 = vmatprep.subr.bf16.mxu1 %v3430_v2  ;;  %4521 = vtanh.f32 %v2906_v60 }
 0x47b   : > { %v4500_v32 = vpop.eup %4499  ;;  %v3021_v53 = vadd.f32 %v3020_v34, %v6007_v54  ;;  %v3022_v9 = vpop.f32.mrb[207].mxu1  ;;  %v2910_v11 = vadd.f32 %v2909_v7, %v6007_v54  ;;  %3493 = vmatpush1.bf16.msra.mxu0 %v3427_v8  ;;  %4523 = vtanh.f32 %v3019_v43 }
 0x47c   : > { %v4502_v40 = vpop.eup %4501  ;;  %v3429_v59 = vpack.c.bf16 %v4500_v32, %v4498_v5  ;;  %v3023_v24 = vadd.f32 %v3022_v9, %v6007_v54  ;;  %4525 = vtanh.f32 %v2908_v6  ;;  %v6019_v18 = vpop.permute.xlu0 %2764 }
 0x47d   : > { %v4504_v44 = vpop.eup %4503  ;;  %4527 = vtanh.f32 %v3021_v53  ;;  %v2913_v21 = vpop.f32.mrb[208].mxu0 }
 0x47e   : > { %v4506_v47 = vpop.eup %4505  ;;  %3534 = vmatpush1.bf16.msra.mxu1 %v3429_v59  ;;  %4529 = vtanh.f32 %v2910_v11  ;;  %v2914_v19 = vadd.f32 %v2913_v21, %v6016_v4  ;;  %v3026_v22 = vpop.f32.mrb[208].mxu1 }
 0x47f   : > { %v4508_v13 = vpop.eup %4507  ;;  %v2915_v28 = vpop.f32.mrb[209].mxu0  ;;  %4531 = vtanh.f32 %v3023_v24  ;;  %v3027_v62 = vadd.f32 %v3026_v22, %v6016_v4 }
 0x480   : > { %v4510_v37 = vpop.eup %4509  ;;  %v2916_v29 = vadd.f32 %v2915_v28, %v6016_v4  ;;  %v3028_v17 = vpop.f32.mrb[209].mxu1  ;;  %4533 = vtanh.f32 %v2914_v19 }
 0x481   : > { %v4512_v31 = vpop.eup %4511  ;;  %v2917_v50 = vpop.f32.mrb[210].mxu0  ;;  %v3435_v25 = vpack.c.bf16 %v4510_v37, %v4502_v40  ;;  %v3029_v39 = vadd.f32 %v3028_v17, %v6016_v4  ;;  %4535 = vtanh.f32 %v3027_v62 }
 0x482   : > { %v4514_v23 = vpop.eup %4513  ;;  %v2918_v15 = vadd.f32 %v2917_v50, %v6019_v18  ;;  %v3030_v27 = vpop.f32.mrb[210].mxu1  ;;  %v3437_v48 = vpack.c.bf16 %v4512_v31, %v4504_v44  ;;  %4537 = vtanh.f32 %v2916_v29 }
 0x483   : > { %v2919_v45 = vpop.f32.mrb[211].mxu0  ;;  %v4516_v35 = vpop.eup %4515  ;;  %v3031_v14 = vadd.f32 %v3030_v27, %v6019_v18  ;;  %v3436_v3 = vpack.c.bf16 %v4514_v23, %v4506_v47  ;;  %4539 = vtanh.f32 %v3029_v39 }
 0x484   : > { %v3032_v12 = vpop.f32.mrb[211].mxu1  ;;  %v4518_v51 = vpop.eup %4517  ;;  %v2920_v36 = vadd.f32 %v2919_v45, %v6019_v18  ;;  %v3438_v61 = vpack.c.bf16 %v4516_v35, %v4508_v13  ;;  %4541 = vtanh.f32 %v2918_v15 }
 0x485   : > { %v4520_v30 = vpop.eup %4519  ;;  %v6028_v52 = vpop.permute.xlu1 %2768  ;;  %v3033_v41 = vadd.f32 %v3032_v12, %v6019_v18  ;;  %3494 = vmatprep.subr.bf16.mxu0 %v3436_v3  ;;  %4543 = vtanh.f32 %v3031_v14 }
 0x486   : > { %v4522_v55 = vpop.eup %4521  ;;  %3535 = vmatprep.subr.bf16.mxu1 %v3438_v61  ;;  %3495 = vmatpush1.bf16.msra.mxu0 %v3435_v25  ;;  %v6031_v16 = vpop.permute.xlu0 %2772  ;;  %4545 = vtanh.f32 %v2920_v36 }
 0x487   : > { %v4524_v26 = vpop.eup %4523  ;;  %3536 = vmatpush1.bf16.msra.mxu1 %v3437_v48  ;;  %v2923_v42 = vpop.f32.mrb[212].mxu0  ;;  %4547 = vtanh.f32 %v3033_v41 }
 0x488   : > { %v4526_v56 = vpop.eup %4525  ;;  %v2924_v58 = vadd.f32 %v2923_v42, %v6028_v52  ;;  %v3036_v60 = vpop.f32.mrb[212].mxu1 }
 0x489   : > { %v2925_v63 = vpop.f32.mrb[213].mxu0  ;;  %v4528_v1 = vpop.eup %4527  ;;  %v3037_v2 = vadd.f32 %v3036_v60, %v6028_v52  ;;  %v3443_v34 = vpack.c.bf16 %v4526_v56, %v4518_v51 }
 0x48a   : > { %v2926_v5 = vadd.f32 %v2925_v63, %v6028_v52  ;;  %v3038_v43 = vpop.f32.mrb[213].mxu1  ;;  %v2927_v6 = vpop.f32.mrb[214].mxu0  ;;  %4549 = vtanh.f32 %v2924_v58  ;;  %v3445_v40 = vpack.c.bf16 %v4528_v1, %v4520_v30 }
 0x48b   : > { %v4530_v7 = vpop.eup %4529  ;;  %v3039_v8 = vadd.f32 %v3038_v43, %v6028_v52  ;;  %v2928_v32 = vadd.f32 %v2927_v6, %v6031_v16  ;;  %v3040_v53 = vpop.f32.mrb[214].mxu1  ;;  %4551 = vtanh.f32 %v3037_v2 }
 0x48c   : > { %v2929_v9 = vpop.f32.mrb[215].mxu0  ;;  %v4532_v11 = vpop.eup %4531  ;;  %v3041_v59 = vadd.f32 %v3040_v53, %v6031_v16  ;;  %v3444_v24 = vpack.c.bf16 %v4530_v7, %v4522_v55  ;;  %4553 = vtanh.f32 %v2926_v5 }
 0x48d   : > { %v3042_v44 = vpop.f32.mrb[215].mxu1  ;;  %v4534_v47 = vpop.eup %4533  ;;  %v2930_v13 = vadd.f32 %v2929_v9, %v6031_v16  ;;  %v3446_v21 = vpack.c.bf16 %v4532_v11, %v4524_v26  ;;  %4555 = vtanh.f32 %v3039_v8 }
 0x48e   : > { %v4536_v37 = vpop.eup %4535  ;;  %v6040_v19 = vpop.permute.xlu1 %2776  ;;  %v3043_v22 = vadd.f32 %v3042_v44, %v6031_v16  ;;  %3496 = vmatprep.subr.bf16.mxu0 %v3444_v24  ;;  %4557 = vtanh.f32 %v2928_v32 }
 0x48f   : > { %v4538_v28 = vpop.eup %4537  ;;  %3537 = vmatprep.subr.bf16.mxu1 %v3446_v21  ;;  %3497 = vmatpush1.bf16.msra.mxu0 %v3443_v34  ;;  %v6043_v62 = vpop.permute.xlu0 %2780  ;;  %4559 = vtanh.f32 %v3041_v59 }
 0x490   : > { %v4540_v31 = vpop.eup %4539  ;;  %3538 = vmatpush1.bf16.msra.mxu1 %v3445_v40  ;;  %v2933_v29 = vpop.f32.mrb[216].mxu0  ;;  %4561 = vtanh.f32 %v2930_v13 }
 0x491   : > { %v4542_v17 = vpop.eup %4541  ;;  %v2934_v50 = vadd.f32 %v2933_v29, %v6040_v19  ;;  %v3046_v25 = vpop.f32.mrb[216].mxu1  ;;  %4563 = vtanh.f32 %v3043_v22 }
 0x492   : > { %v2935_v23 = vpop.f32.mrb[217].mxu0  ;;  %v4544_v39 = vpop.eup %4543  ;;  %v3047_v15 = vadd.f32 %v3046_v25, %v6040_v19  ;;  %v3451_v35 = vpack.c.bf16 %v4542_v17, %v4534_v47 }
 0x493   : > { %v2936_v27 = vadd.f32 %v2935_v23, %v6040_v19  ;;  %v3048_v45 = vpop.f32.mrb[217].mxu1  ;;  %v2937_v48 = vpop.f32.mrb[218].mxu0  ;;  %4565 = vtanh.f32 %v2934_v50  ;;  %v3453_v61 = vpack.c.bf16 %v4544_v39, %v4536_v37 }
 0x494   : > { %v4546_v14 = vpop.eup %4545  ;;  %v3049_v12 = vadd.f32 %v3048_v45, %v6040_v19  ;;  %v2938_v3 = vadd.f32 %v2937_v48, %v6043_v62  ;;  %v3050_v51 = vpop.f32.mrb[218].mxu1  ;;  %4567 = vtanh.f32 %v3047_v15 }
 0x495   : > { %v2939_v36 = vpop.f32.mrb[219].mxu0  ;;  %v4548_v30 = vpop.eup %4547  ;;  %v3051_v41 = vadd.f32 %v3050_v51, %v6043_v62  ;;  %v3452_v26 = vpack.c.bf16 %v4546_v14, %v4538_v28  ;;  %4569 = vtanh.f32 %v2936_v27 }
 0x496   : > { %v3052_v55 = vpop.f32.mrb[219].mxu1  ;;  %v4550_v42 = vpop.eup %4549  ;;  %v2940_v56 = vadd.f32 %v2939_v36, %v6043_v62  ;;  %v3454_v58 = vpack.c.bf16 %v4548_v30, %v4540_v31  ;;  %4571 = vtanh.f32 %v3049_v12 }
 0x497   : > { %v4552_v60 = vpop.eup %4551  ;;  %v6052_v63 = vpop.permute.xlu1 %2784  ;;  %v3053_v1 = vadd.f32 %v3052_v55, %v6043_v62  ;;  %3498 = vmatprep.subr.bf16.mxu0 %v3452_v26  ;;  %4573 = vtanh.f32 %v2938_v3 }
 0x498   : > { %v4554_v2 = vpop.eup %4553  ;;  %3539 = vmatprep.subr.bf16.mxu1 %v3454_v58  ;;  %3499 = vmatpush1.bf16.msra.mxu0 %v3451_v35  ;;  %v6055_v43 = vpop.permute.xlu0 %2788  ;;  %4575 = vtanh.f32 %v3051_v41 }
 0x499   : > { %v4556_v5 = vpop.eup %4555  ;;  %3540 = vmatpush1.bf16.msra.mxu1 %v3453_v61  ;;  %v2943_v6 = vpop.f32.mrb[220].mxu0  ;;  %4577 = vtanh.f32 %v2940_v56 }
 0x49a   : > { %v4558_v34 = vpop.eup %4557  ;;  %v2944_v7 = vadd.f32 %v2943_v6, %v6052_v63  ;;  %v3056_v8 = vpop.f32.mrb[220].mxu1  ;;  %4579 = vtanh.f32 %v3053_v1 }
 0x49b   : > { %v2945_v32 = vpop.f32.mrb[221].mxu0  ;;  %v4560_v53 = vpop.eup %4559  ;;  %v3057_v9 = vadd.f32 %v3056_v8, %v6052_v63  ;;  %v3459_v44 = vpack.c.bf16 %v4558_v34, %v4550_v42 }
 0x49c   : > { %v2946_v40 = vadd.f32 %v2945_v32, %v6052_v63  ;;  %v3058_v11 = vpop.f32.mrb[221].mxu1  ;;  %v2947_v59 = vpop.f32.mrb[222].mxu0  ;;  %4581 = vtanh.f32 %v2944_v7  ;;  %v3461_v22 = vpack.c.bf16 %v4560_v53, %v4552_v60 }
 0x49d   : > { %v4562_v24 = vpop.eup %4561  ;;  %v3059_v47 = vadd.f32 %v3058_v11, %v6052_v63  ;;  %v2948_v13 = vadd.f32 %v2947_v59, %v6055_v43  ;;  %v3060_v21 = vpop.f32.mrb[222].mxu1  ;;  %4583 = vtanh.f32 %v3057_v9 }
 0x49e   : > { %v2949_v37 = vpop.f32.mrb[223].mxu0  ;;  %v4564_v28 = vpop.eup %4563  ;;  %v3061_v31 = vadd.f32 %v3060_v21, %v6055_v43  ;;  %v3460_v17 = vpack.c.bf16 %v4562_v24, %v4554_v2  ;;  %4585 = vtanh.f32 %v2946_v40 }
 0x49f   : > { %v3062_v29 = vpop.f32.mrb[223].mxu1  ;;  %v4566_v50 = vpop.eup %4565  ;;  %v2950_v25 = vadd.f32 %v2949_v37, %v6055_v43  ;;  %v3462_v23 = vpack.c.bf16 %v4564_v28, %v4556_v5  ;;  %4587 = vtanh.f32 %v3059_v47 }
 0x4a0   : > { %v4568_v39 = vpop.eup %4567  ;;  %v3063_v15 = vadd.f32 %v3062_v29, %v6055_v43  ;;  %3500 = vmatprep.subr.bf16.mxu0 %v3460_v17  ;;  %4589 = vtanh.f32 %v2948_v13  ;;  %v3099_v48 = vpop.f32.mrb[224].mxu0 }
 0x4a1   : > { %v4570_v27 = vpop.eup %4569  ;;  %3541 = vmatprep.subr.bf16.mxu1 %v3462_v23  ;;  %3501 = vmatpush1.bf16.msra.mxu0 %v3459_v44  ;;  %4591 = vtanh.f32 %v3061_v31  ;;  %v3100_v14 = vadd.f32 %v3099_v48, %v5966_v33  ;;  %v3212_v12 = vpop.f32.mrb[224].mxu1 }
 0x4a2   : > { %v4572_v45 = vpop.eup %4571  ;;  %3542 = vmatpush1.bf16.msra.mxu1 %v3461_v22  ;;  %4593 = vtanh.f32 %v2950_v25  ;;  %v3101_v3 = vpop.f32.mrb[225].mxu0  ;;  %v3213_v36 = vadd.f32 %v3212_v12, %v5966_v33 }
 0x4a3   : > { %v4574_v35 = vpop.eup %4573  ;;  %4595 = vtanh.f32 %v3063_v15  ;;  %v3102_v61 = vadd.f32 %v3101_v3, %v5966_v33  ;;  %v3214_v30 = vpop.f32.mrb[225].mxu1 }
 0x4a4   : > { %v4576_v51 = vpop.eup %4575  ;;  %v3103_v41 = vpop.f32.mrb[226].mxu0  ;;  %v3467_v55 = vpack.c.bf16 %v4574_v35, %v4566_v50  ;;  %4597 = vtanh.f32 %v3100_v14  ;;  %v3215_v42 = vadd.f32 %v3214_v30, %v5966_v33 }
 0x4a5   : > { %v4578_v26 = vpop.eup %4577  ;;  %v3104_v56 = vadd.f32 %v3103_v41, %v5968_v10  ;;  %v3216_v58 = vpop.f32.mrb[226].mxu1  ;;  %v3469_v1 = vpack.c.bf16 %v4576_v51, %v4568_v39  ;;  %4599 = vtanh.f32 %v3213_v36  ;;  %v6084_v51 = vld [vmem:[%s6161_s3] sm:$0x3] }
 0x4a6   : > { %v3105_v60 = vpop.f32.mrb[227].mxu0  ;;  %v4580_v2 = vpop.eup %4579  ;;  %v3217_v5 = vadd.f32 %v3216_v58, %v5968_v10  ;;  %v3468_v34 = vpack.c.bf16 %v4578_v26, %v4570_v27  ;;  %4601 = vtanh.f32 %v3102_v61 }
 0x4a7   : > { %v3218_v6 = vpop.f32.mrb[227].mxu1  ;;  %v4582_v7 = vpop.eup %4581  ;;  %v3106_v8 = vadd.f32 %v3105_v60, %v5968_v10  ;;  %v3470_v32 = vpack.c.bf16 %v4580_v2, %v4572_v45  ;;  %4603 = vtanh.f32 %v3215_v42 }
 0x4a8   : > { %v4584_v53 = vpop.eup %4583  ;;  %v3219_v33 = vadd.f32 %v3218_v6, %v5968_v10  ;;  %3502 = vmatprep.subr.bf16.mxu0 %v3468_v34  ;;  %4605 = vtanh.f32 %v3104_v56  ;;  %v3109_v11 = vpop.f32.mrb[228].mxu0 }
 0x4a9   : > { %v4586_v9 = vpop.eup %4585  ;;  %3543 = vmatprep.subr.bf16.mxu1 %v3470_v32  ;;  %3503 = vmatpush1.bf16.msra.mxu0 %v3467_v55  ;;  %4607 = vtanh.f32 %v3217_v5  ;;  %v3110_v44 = vadd.f32 %v3109_v11, %v5977_v38  ;;  %v3222_v24 = vpop.f32.mrb[228].mxu1 }
 0x4aa   : > { %v4588_v40 = vpop.eup %4587  ;;  %3544 = vmatpush1.bf16.msra.mxu1 %v3469_v1  ;;  %4609 = vtanh.f32 %v3106_v8  ;;  %v3111_v47 = vpop.f32.mrb[229].mxu0  ;;  %v3223_v21 = vadd.f32 %v3222_v24, %v5977_v38 }
 0x4ab   : > { %v4590_v59 = vpop.eup %4589  ;;  %4611 = vtanh.f32 %v3219_v33  ;;  %v3112_v10 = vadd.f32 %v3111_v47, %v5977_v38  ;;  %v3224_v37 = vpop.f32.mrb[229].mxu1 }
 0x4ac   : > { %v4592_v13 = vpop.eup %4591  ;;  %v3113_v22 = vpop.f32.mrb[230].mxu0  ;;  %v3475_v28 = vpack.c.bf16 %v4590_v59, %v4582_v7  ;;  %4613 = vtanh.f32 %v3110_v44  ;;  %v3225_v29 = vadd.f32 %v3224_v37, %v5977_v38 }
 0x4ad   : > { %v4594_v31 = vpop.eup %4593  ;;  %v3114_v17 = vadd.f32 %v3113_v22, %v5980_v57  ;;  %v3226_v50 = vpop.f32.mrb[230].mxu1  ;;  %v3477_v23 = vpack.c.bf16 %v4592_v13, %v4584_v53  ;;  %4615 = vtanh.f32 %v3223_v21 }
 0x4ae   : > { %v3115_v25 = vpop.f32.mrb[231].mxu0  ;;  %v4596_v39 = vpop.eup %4595  ;;  %v3227_v15 = vadd.f32 %v3226_v50, %v5980_v57  ;;  %v3476_v45 = vpack.c.bf16 %v4594_v31, %v4586_v9  ;;  %4617 = vtanh.f32 %v3112_v10 }
 0x4af   : > { %v3228_v27 = vpop.f32.mrb[231].mxu1  ;;  %v4598_v48 = vpop.eup %4597  ;;  %v3116_v35 = vadd.f32 %v3115_v25, %v5980_v57  ;;  %v3478_v14 = vpack.c.bf16 %v4596_v39, %v4588_v40  ;;  %4619 = vtanh.f32 %v3225_v29 }
 0x4b0   : > { %v4600_v12 = vpop.eup %4599  ;;  %v3229_v38 = vadd.f32 %v3228_v27, %v5980_v57  ;;  %3504 = vmatprep.subr.bf16.mxu0 %v3476_v45  ;;  %4621 = vtanh.f32 %v3114_v17  ;;  %v3119_v61 = vpop.f32.mrb[232].mxu0 }
 0x4b1   : > { %v4602_v3 = vpop.eup %4601  ;;  %3545 = vmatprep.subr.bf16.mxu1 %v3478_v14  ;;  %3505 = vmatpush1.bf16.msra.mxu0 %v3475_v28  ;;  %4623 = vtanh.f32 %v3227_v15  ;;  %v3120_v41 = vadd.f32 %v3119_v61, %v5989_v20  ;;  %v3232_v55 = vpop.f32.mrb[232].mxu1 }
 0x4b2   : > { %v4604_v36 = vpop.eup %4603  ;;  %3546 = vmatpush1.bf16.msra.mxu1 %v3477_v23  ;;  %4625 = vtanh.f32 %v3116_v35  ;;  %v3121_v57 = vpop.f32.mrb[233].mxu0  ;;  %v3233_v42 = vadd.f32 %v3232_v55, %v5989_v20 }
 0x4b3   : > { %v4606_v30 = vpop.eup %4605  ;;  %4627 = vtanh.f32 %v3229_v38  ;;  %v3122_v56 = vadd.f32 %v3121_v57, %v5989_v20  ;;  %v3234_v58 = vpop.f32.mrb[233].mxu1 }
 0x4b4   : > { %v4608_v26 = vpop.eup %4607  ;;  %v3123_v60 = vpop.f32.mrb[234].mxu0  ;;  %3523 = vmatmul.mubr.bf16.vlgmr.msra.gmra.mrb[0].mxu0 %v6084_v51  ;;  %v3423_v1 = vpack.c.bf16 %v4606_v30, %v4598_v48  ;;  %4629 = vtanh.f32 %v3120_v41  ;;  %v3235_v5 = vadd.f32 %v3234_v58, %v5989_v20 }
 0x4b5   : > { %v4610_v2 = vpop.eup %4609  ;;  %v3124_v6 = vadd.f32 %v3123_v60, %v5992_v46  ;;  %v3236_v34 = vpop.f32.mrb[234].mxu1  ;;  %3564 = vmatmul.mubr.bf16.vlgmr.msra.gmra.mrb[0].mxu1 %v6084_v51  ;;  %v3425_v8 = vpack.c.bf16 %v4608_v26, %v4600_v12  ;;  %3604 = vmatprep.mubr.bf16.mxu0 %v4785_v0  ;;  %4631 = vtanh.f32 %v3233_v42 }
 0x4b6   : > { %v3125_v7 = vpop.f32.mrb[235].mxu0  ;;  %v4612_v32 = vpop.eup %4611  ;;  %v3237_v53 = vadd.f32 %v3236_v34, %v5992_v46  ;;  %v3424_v9 = vpack.c.bf16 %v4610_v2, %v4602_v3  ;;  %3645 = vmatprep.mubr.bf16.mxu1 %v4785_v0  ;;  %4633 = vtanh.f32 %v3122_v56 }
 0x4b7   : > { %v3238_v33 = vpop.f32.mrb[235].mxu1  ;;  %v4614_v40 = vpop.eup %4613  ;;  %v3126_v20 = vadd.f32 %v3125_v7, %v5992_v46  ;;  %v3426_v11 = vpack.c.bf16 %v4612_v32, %v4604_v36  ;;  %4635 = vtanh.f32 %v3235_v5 }
 0x4b8   : > { %v4616_v59 = vpop.eup %4615  ;;  %v3239_v44 = vadd.f32 %v3238_v33, %v5992_v46  ;;  %3572 = vmatprep.subr.bf16.mxu0 %v3424_v9  ;;  %4637 = vtanh.f32 %v3124_v6  ;;  %v3129_v13 = vpop.f32.mrb[236].mxu0 }
 0x4b9   : > { %v4618_v24 = vpop.eup %4617  ;;  %3613 = vmatprep.subr.bf16.mxu1 %v3426_v11  ;;  %3573 = vmatpush1.bf16.msra.mxu0 %v3423_v1  ;;  %4639 = vtanh.f32 %v3237_v53  ;;  %v3130_v0 = vadd.f32 %v3129_v13, %v6004_v49  ;;  %v3242_v10 = vpop.f32.mrb[236].mxu1 }
 0x4ba   : > { %v4620_v47 = vpop.eup %4619  ;;  %3614 = vmatpush1.bf16.msra.mxu1 %v3425_v8  ;;  %4641 = vtanh.f32 %v3126_v20  ;;  %v3131_v37 = vpop.f32.mrb[237].mxu0  ;;  %v3243_v28 = vadd.f32 %v3242_v10, %v6004_v49 }
 0x4bb   : > { %v4622_v21 = vpop.eup %4621  ;;  %4643 = vtanh.f32 %v3239_v44  ;;  %v3132_v46 = vadd.f32 %v3131_v37, %v6004_v49  ;;  %v3244_v31 = vpop.f32.mrb[237].mxu1 }
 0x4bc   : > { %v4624_v22 = vpop.eup %4623  ;;  %v3133_v29 = vpop.f32.mrb[238].mxu0  ;;  %v3431_v17 = vpack.c.bf16 %v4622_v21, %v4614_v40  ;;  %4645 = vtanh.f32 %v3130_v0  ;;  %v3245_v25 = vadd.f32 %v3244_v31, %v6004_v49 }
 0x4bd   : > { %v4626_v50 = vpop.eup %4625  ;;  %v3134_v23 = vadd.f32 %v3133_v29, %v6007_v54  ;;  %v3246_v39 = vpop.f32.mrb[238].mxu1  ;;  %v3433_v27 = vpack.c.bf16 %v4624_v22, %v4616_v59  ;;  %4647 = vtanh.f32 %v3243_v28 }
 0x4be   : > { %v3135_v15 = vpop.f32.mrb[239].mxu0  ;;  %v4628_v45 = vpop.eup %4627  ;;  %v3247_v48 = vadd.f32 %v3246_v39, %v6007_v54  ;;  %v3432_v14 = vpack.c.bf16 %v4626_v50, %v4618_v24  ;;  %4649 = vtanh.f32 %v3132_v46 }
 0x4bf   : > { %v3248_v35 = vpop.f32.mrb[239].mxu1  ;;  %v4630_v12 = vpop.eup %4629  ;;  %v3136_v38 = vadd.f32 %v3135_v15, %v6007_v54  ;;  %v3434_v3 = vpack.c.bf16 %v4628_v45, %v4620_v47  ;;  %4651 = vtanh.f32 %v3245_v25 }
 0x4c0   : > { %v4632_v36 = vpop.eup %4631  ;;  %v3249_v49 = vadd.f32 %v3248_v35, %v6007_v54  ;;  %3574 = vmatprep.subr.bf16.mxu0 %v3432_v14  ;;  %4653 = vtanh.f32 %v3134_v23  ;;  %v3139_v41 = vpop.f32.mrb[240].mxu0 }
 0x4c1   : > { %v4634_v61 = vpop.eup %4633  ;;  %3615 = vmatprep.subr.bf16.mxu1 %v3434_v3  ;;  %3575 = vmatpush1.bf16.msra.mxu0 %v3431_v17  ;;  %4655 = vtanh.f32 %v3247_v48  ;;  %v3140_v57 = vadd.f32 %v3139_v41, %v6016_v4  ;;  %v3252_v26 = vpop.f32.mrb[240].mxu1 }
 0x4c2   : > { %v4636_v30 = vpop.eup %4635  ;;  %3616 = vmatpush1.bf16.msra.mxu1 %v3433_v27  ;;  %4657 = vtanh.f32 %v3136_v38  ;;  %v3141_v42 = vpop.f32.mrb[241].mxu0  ;;  %v3253_v58 = vadd.f32 %v3252_v26, %v6016_v4 }
 0x4c3   : > { %v4638_v55 = vpop.eup %4637  ;;  %4659 = vtanh.f32 %v3249_v49  ;;  %v3142_v54 = vadd.f32 %v3141_v42, %v6016_v4  ;;  %v3254_v60 = vpop.f32.mrb[241].mxu1 }
 0x4c4   : > { %v4640_v56 = vpop.eup %4639  ;;  %v3143_v1 = vpop.f32.mrb[242].mxu0  ;;  %v3439_v2 = vpack.c.bf16 %v4638_v55, %v4630_v12  ;;  %4661 = vtanh.f32 %v3140_v57  ;;  %v3255_v6 = vadd.f32 %v3254_v60, %v6016_v4 }
 0x4c5   : > { %v4642_v5 = vpop.eup %4641  ;;  %v3144_v34 = vadd.f32 %v3143_v1, %v6019_v18  ;;  %v3256_v7 = vpop.f32.mrb[242].mxu1  ;;  %v3441_v32 = vpack.c.bf16 %v4640_v56, %v4632_v36  ;;  %4663 = vtanh.f32 %v3253_v58 }
 0x4c6   : > { %v3145_v8 = vpop.f32.mrb[243].mxu0  ;;  %v4644_v53 = vpop.eup %4643  ;;  %v3257_v33 = vadd.f32 %v3256_v7, %v6019_v18  ;;  %v3440_v40 = vpack.c.bf16 %v4642_v5, %v4634_v61  ;;  %4665 = vtanh.f32 %v3142_v54 }
 0x4c7   : > { %v3258_v9 = vpop.f32.mrb[243].mxu1  ;;  %v4646_v20 = vpop.eup %4645  ;;  %v3146_v11 = vadd.f32 %v3145_v8, %v6019_v18  ;;  %v3442_v59 = vpack.c.bf16 %v4644_v53, %v4636_v30  ;;  %4667 = vtanh.f32 %v3255_v6 }
 0x4c8   : > { %v4648_v44 = vpop.eup %4647  ;;  %v3259_v4 = vadd.f32 %v3258_v9, %v6019_v18  ;;  %3576 = vmatprep.subr.bf16.mxu0 %v3440_v40  ;;  %4669 = vtanh.f32 %v3144_v34  ;;  %v3149_v13 = vpop.f32.mrb[244].mxu0 }
 0x4c9   : > { %v4650_v24 = vpop.eup %4649  ;;  %3617 = vmatprep.subr.bf16.mxu1 %v3442_v59  ;;  %3577 = vmatpush1.bf16.msra.mxu0 %v3439_v2  ;;  %4671 = vtanh.f32 %v3257_v33  ;;  %v3150_v0 = vadd.f32 %v3149_v13, %v6028_v52  ;;  %v3262_v10 = vpop.f32.mrb[244].mxu1 }
 0x4ca   : > { %v4652_v47 = vpop.eup %4651  ;;  %3618 = vmatpush1.bf16.msra.mxu1 %v3441_v32  ;;  %4673 = vtanh.f32 %v3146_v11  ;;  %v3151_v37 = vpop.f32.mrb[245].mxu0  ;;  %v3263_v28 = vadd.f32 %v3262_v10, %v6028_v52 }
 0x4cb   : > { %v4654_v21 = vpop.eup %4653  ;;  %4675 = vtanh.f32 %v3259_v4  ;;  %v3152_v18 = vadd.f32 %v3151_v37, %v6028_v52  ;;  %v3264_v46 = vpop.f32.mrb[245].mxu1 }
 0x4cc   : > { %v4656_v22 = vpop.eup %4655  ;;  %v3153_v31 = vpop.f32.mrb[246].mxu0  ;;  %v3447_v29 = vpack.c.bf16 %v4654_v21, %v4646_v20  ;;  %4677 = vtanh.f32 %v3150_v0  ;;  %v3265_v50 = vadd.f32 %v3264_v46, %v6028_v52 }
 0x4cd   : > { %v4658_v17 = vpop.eup %4657  ;;  %v3154_v25 = vadd.f32 %v3153_v31, %v6031_v16  ;;  %v3266_v23 = vpop.f32.mrb[246].mxu1  ;;  %v3449_v15 = vpack.c.bf16 %v4656_v22, %v4648_v44  ;;  %4679 = vtanh.f32 %v3263_v28 }
 0x4ce   : > { %v3155_v39 = vpop.f32.mrb[247].mxu0  ;;  %v4660_v27 = vpop.eup %4659  ;;  %v3267_v45 = vadd.f32 %v3266_v23, %v6031_v16  ;;  %v3448_v35 = vpack.c.bf16 %v4658_v17, %v4650_v24  ;;  %4681 = vtanh.f32 %v3152_v18 }
 0x4cf   : > { %v3268_v48 = vpop.f32.mrb[247].mxu1  ;;  %v4662_v14 = vpop.eup %4661  ;;  %v3156_v12 = vadd.f32 %v3155_v39, %v6031_v16  ;;  %v3450_v38 = vpack.c.bf16 %v4660_v27, %v4652_v47  ;;  %4683 = vtanh.f32 %v3265_v50 }
 0x4d0   : > { %v4664_v3 = vpop.eup %4663  ;;  %v3269_v52 = vadd.f32 %v3268_v48, %v6031_v16  ;;  %3578 = vmatprep.subr.bf16.mxu0 %v3448_v35  ;;  %4685 = vtanh.f32 %v3154_v25  ;;  %v3159_v61 = vpop.f32.mrb[248].mxu0 }
 0x4d1   : > { %v4666_v36 = vpop.eup %4665  ;;  %3619 = vmatprep.subr.bf16.mxu1 %v3450_v38  ;;  %3579 = vmatpush1.bf16.msra.mxu0 %v3447_v29  ;;  %4687 = vtanh.f32 %v3267_v45  ;;  %v3160_v41 = vadd.f32 %v3159_v61, %v6040_v19  ;;  %v3272_v55 = vpop.f32.mrb[248].mxu1 }
 0x4d2   : > { %v4668_v49 = vpop.eup %4667  ;;  %3620 = vmatpush1.bf16.msra.mxu1 %v3449_v15  ;;  %4689 = vtanh.f32 %v3156_v12  ;;  %v3161_v57 = vpop.f32.mrb[249].mxu0  ;;  %v3273_v42 = vadd.f32 %v3272_v55, %v6040_v19 }
 0x4d3   : > { %v4670_v30 = vpop.eup %4669  ;;  %4691 = vtanh.f32 %v3269_v52  ;;  %v3162_v16 = vadd.f32 %v3161_v57, %v6040_v19  ;;  %v3274_v56 = vpop.f32.mrb[249].mxu1 }
 0x4d4   : > { %v4672_v26 = vpop.eup %4671  ;;  %v3163_v58 = vpop.f32.mrb[250].mxu0  ;;  %v3455_v54 = vpack.c.bf16 %v4670_v30, %v4662_v14  ;;  %4693 = vtanh.f32 %v3160_v41  ;;  %v3275_v1 = vadd.f32 %v3274_v56, %v6040_v19 }
 0x4d5   : > { %v4674_v60 = vpop.eup %4673  ;;  %v3164_v2 = vadd.f32 %v3163_v58, %v6043_v62  ;;  %v3276_v5 = vpop.f32.mrb[250].mxu1  ;;  %v3457_v34 = vpack.c.bf16 %v4672_v26, %v4664_v3  ;;  %4695 = vtanh.f32 %v3273_v42 }
 0x4d6   : > { %v3165_v6 = vpop.f32.mrb[251].mxu0  ;;  %v4676_v7 = vpop.eup %4675  ;;  %v3277_v8 = vadd.f32 %v3276_v5, %v6043_v62  ;;  %v3456_v53 = vpack.c.bf16 %v4674_v60, %v4666_v36  ;;  %4697 = vtanh.f32 %v3162_v16 }
 0x4d7   : > { %v3278_v32 = vpop.f32.mrb[251].mxu1  ;;  %v4678_v33 = vpop.eup %4677  ;;  %v3166_v9 = vadd.f32 %v3165_v6, %v6043_v62  ;;  %v3458_v40 = vpack.c.bf16 %v4676_v7, %v4668_v49  ;;  %4699 = vtanh.f32 %v3275_v1 }
 0x4d8   : > { %v4680_v20 = vpop.eup %4679  ;;  %v3279_v19 = vadd.f32 %v3278_v32, %v6043_v62  ;;  %3580 = vmatprep.subr.bf16.mxu0 %v3456_v53  ;;  %4701 = vtanh.f32 %v3164_v2  ;;  %v3169_v44 = vpop.f32.mrb[252].mxu0 }
 0x4d9   : > { %v4682_v11 = vpop.eup %4681  ;;  %3621 = vmatprep.subr.bf16.mxu1 %v3458_v40  ;;  %3581 = vmatpush1.bf16.msra.mxu0 %v3455_v54  ;;  %4703 = vtanh.f32 %v3277_v8  ;;  %v3170_v24 = vadd.f32 %v3169_v44, %v6052_v63  ;;  %v3282_v47 = vpop.f32.mrb[252].mxu1  ;;  %v4757_v44 = vld [vmem:[%s4855_s28] sm:$0x77] }
 0x4da   : > { %v4684_v59 = vpop.eup %4683  ;;  %3622 = vmatpush1.bf16.msra.mxu1 %v3457_v34  ;;  %4705 = vtanh.f32 %v3166_v9  ;;  %v3171_v13 = vpop.f32.mrb[253].mxu0  ;;  %v3283_v0 = vadd.f32 %v3282_v47, %v6052_v63 }
 0x4db   : > { %v4686_v4 = vpop.eup %4685  ;;  %4707 = vtanh.f32 %v3279_v19  ;;  %v3172_v62 = vadd.f32 %v3171_v13, %v6052_v63  ;;  %v3284_v10 = vpop.f32.mrb[253].mxu1 }
 0x4dc   : > { %v4688_v21 = vpop.eup %4687  ;;  %v3173_v37 = vpop.f32.mrb[254].mxu0  ;;  %v3463_v22 = vpack.c.bf16 %v4686_v4, %v4678_v33  ;;  %4709 = vtanh.f32 %v3170_v24  ;;  %v3285_v18 = vadd.f32 %v3284_v10, %v6052_v63  ;;  %v4758_v4 = vld [vmem:[%s4855_s28 + $0x8] sm:$0x77] }
 0x4dd   : > { %v4690_v28 = vpop.eup %4689  ;;  %v3174_v46 = vadd.f32 %v3173_v37, %v6055_v43  ;;  %v3286_v31 = vpop.f32.mrb[254].mxu1  ;;  %v3465_v17 = vpack.c.bf16 %v4688_v21, %v4680_v20  ;;  %4711 = vtanh.f32 %v3283_v0 }
 0x4de   : > { %v3175_v29 = vpop.f32.mrb[255].mxu0  ;;  %v4692_v50 = vpop.eup %4691  ;;  %v3287_v25 = vadd.f32 %v3286_v31, %v6055_v43  ;;  %v3464_v39 = vpack.c.bf16 %v4690_v28, %v4682_v11  ;;  %4713 = vtanh.f32 %v3172_v62 }
 0x4df   : > { %v3288_v23 = vpop.f32.mrb[255].mxu1  ;;  %v4694_v15 = vpop.eup %4693  ;;  %v3176_v27 = vadd.f32 %v3175_v29, %v6055_v43  ;;  %v3466_v45 = vpack.c.bf16 %v4692_v50, %v4684_v59  ;;  %4715 = vtanh.f32 %v3285_v18 }
 0x4e0   : > { %v4696_v48 = vpop.eup %4695  ;;  %v3289_v63 = vadd.f32 %v3288_v23, %v6055_v43  ;;  %3582 = vmatprep.subr.bf16.mxu0 %v3464_v39  ;;  %4717 = vtanh.f32 %v3174_v46  ;;  %v3488_v2 = vpop.permute.xlu1 %3487 }
 0x4e1   : > { %v4698_v35 = vpop.eup %4697  ;;  %3623 = vmatprep.subr.bf16.mxu1 %v3466_v45  ;;  %3583 = vmatpush1.bf16.msra.mxu0 %v3463_v22  ;;  %4719 = vtanh.f32 %v3287_v25  ;;  %v4760_v45 = vld [vmem:[%s4855_s28 + $0x18] sm:$0x77] }
 0x4e2   : > { %v4700_v14 = vpop.eup %4699  ;;  %3624 = vmatpush1.bf16.msra.mxu1 %v3465_v17  ;;  %4721 = vtanh.f32 %v3176_v27 }
 0x4e3   : > { %v4702_v12 = vpop.eup %4701  ;;  %4723 = vtanh.f32 %v3289_v63 }
 0x4e4   : > { %v4704_v38 = vpop.eup %4703  ;;  %v3471_v3 = vpack.c.bf16 %v4702_v12, %v4694_v15  ;;  %v4759_v15 = vld [vmem:[%s4855_s28 + $0x10] sm:$0x77] }
 0x4e5   : > { %v4706_v52 = vpop.eup %4705  ;;  %v3473_v36 = vpack.c.bf16 %v4704_v38, %v4696_v48 }
 0x4e6   : > { %v4708_v49 = vpop.eup %4707  ;;  %v3472_v61 = vpack.c.bf16 %v4706_v52, %v4698_v35 }
 0x4e7   : > { %v4710_v30 = vpop.eup %4709  ;;  %v3474_v41 = vpack.c.bf16 %v4708_v49, %v4700_v14 }
 0x4e8   : > { %v4712_v43 = vpop.eup %4711  ;;  %3584 = vmatprep.subr.bf16.mxu0 %v3472_v61 }
 0x4e9   : > { %v4714_v55 = vpop.eup %4713  ;;  %3625 = vmatprep.subr.bf16.mxu1 %v3474_v41  ;;  %3585 = vmatpush1.bf16.msra.mxu0 %v3471_v3 }
 0x4ea   : > { %v4716_v57 = vpop.eup %4715  ;;  %3626 = vmatpush1.bf16.msra.mxu1 %v3473_v36 }
 0x4eb   : > { %v4718_v26 = vpop.eup %4717 }
 0x4ec   : > { %v4720_v42 = vpop.eup %4719  ;;  %v3479_v16 = vpack.c.bf16 %v4718_v26, %v4710_v30 }
 0x4ed   : > { %v4722_v56 = vpop.eup %4721  ;;  %v3481_v58 = vpack.c.bf16 %v4720_v42, %v4712_v43 }
 0x4ee   : > { %v4724_v54 = vpop.eup %4723  ;;  %v3480_v60 = vpack.c.bf16 %v4722_v56, %v4714_v55 }
 0x4ef   : > { %v3482_v1 = vpack.c.bf16 %v4724_v54, %v4716_v57 }
 0x4f0   : > { %3586 = vmatprep.subr.bf16.mxu0 %v3480_v60 }
 0x4f1   : > { %3627 = vmatprep.subr.bf16.mxu1 %v3482_v1  ;;  %3587 = vmatpush1.bf16.msra.mxu0 %v3479_v16 }
 0x4f2   : > { %3628 = vmatpush1.bf16.msra.mxu1 %v3481_v58 }
 0x4f4   : > { %3605 = vmatmul.mubr.bf16.vlgmr.msra.gmra.mrb[4].mxu0 %v6084_v51 }
 0x4f5   : > { %3646 = vmatmul.mubr.bf16.vlgmr.msra.gmra.mrb[4].mxu1 %v6084_v51 }
 0x587   : > { %v3524_v5 = vpop.f32.mrb[0].mxu0 }
 0x588   : > { %v3565_v6 = vpop.f32.mrb[0].mxu1  ;;  %v3526_v34 = vpop.f32.mrb[1].mxu0  ;;  %v3525_v7 = vadd.f32 %v3524_v5, %v3488_v2 }
 0x589   : > { %v3567_v8 = vpop.f32.mrb[1].mxu1  ;;  %v3528_v32 = vpop.f32.mrb[2].mxu0  ;;  %v3527_v53 = vadd.f32 %v3526_v34, %v3488_v2  ;;  %v3566_v33 = vadd.f32 %v3565_v6, %v3488_v2 }
 0x58a   : > { %v3569_v9 = vpop.f32.mrb[2].mxu1  ;;  %v3568_v40 = vadd.f32 %v3567_v8, %v3488_v2  ;;  %v3529_v20 = vpop.f32.mrb[3].mxu0 }
 0x58b   : > { %v3662_v19 = vcombine.low %v3525_v7, %v3527_v53  ;;  %v3570_v11 = vpop.f32.mrb[3].mxu1 }
 0x58c   : > { %v3663_v59 = vcombine.low %v3566_v33, %v3568_v40 }
 0x58d   : > { %v3670_v51 = vadd.f32 %v4757_v44, %v3662_v19 }
 0x58e   : > { %v3671_v24 = vadd.f32 %v4758_v4, %v3663_v59 }
 0x58f   : > { %v3674_v47 = vmax.f32 %v3670_v51, 0.0 }
 0x590   : > { %v3675_v13 = vmax.f32 %v3671_v24, 0.0 }
 0x591   : > { %v3678_v21 = vmin.f32 %v3674_v47, 1.0 }
 0x592   : > { %v3679_v0 = vmin.f32 %v3675_v13, 1.0 }
 0x593   : > { %3682 = vst [vmem:[%s289_s9] sm:$0x77] %v3678_v21 }
 0x594   : > { %3683 = vst [vmem:[%s289_s9 + $0x8] sm:$0x77] %v3679_v0 }
 0x5c7   : > { %v3606_v62 = vpop.f32.mrb[4].mxu0 }
 0x5c8   : > { %v3607_v10 = vadd.f32 %v3606_v62, %v3488_v2  ;;  %v3647_v37 = vpop.f32.mrb[4].mxu1  ;;  %v3608_v22 = vpop.f32.mrb[5].mxu0 }
 0x5c9   : > { %v3648_v28 = vadd.f32 %v3647_v37, %v3488_v2  ;;  %v3609_v18 = vadd.f32 %v3608_v22, %v3488_v2  ;;  %v3649_v46 = vpop.f32.mrb[5].mxu1  ;;  %v3610_v31 = vpop.f32.mrb[6].mxu0 }
 0x5ca   : > { %v3650_v29 = vadd.f32 %v3649_v46, %v3488_v2  ;;  %v3651_v17 = vpop.f32.mrb[6].mxu1  ;;  %v3611_v50 = vpop.f32.mrb[7].mxu0 }
 0x5cb   : > { %v3664_v25 = vcombine.low %v3607_v10, %v3609_v18  ;;  %v3652_v23 = vpop.f32.mrb[7].mxu1 }
 0x5cc   : > { %v3665_v39 = vcombine.low %v3648_v28, %v3650_v29 }
 0x5cd   : > { %v3672_v27 = vadd.f32 %v4759_v15, %v3664_v25 }
 0x5ce   : > { %v3673_v48 = vadd.f32 %v4760_v45, %v3665_v39 }
 0x5cf   : > { %v3676_v63 = vmax.f32 %v3672_v27, 0.0 }
 0x5d0   : > { %v3677_v35 = vmax.f32 %v3673_v48, 0.0 }
 0x5d1   : > { %v3680_v14 = vmin.f32 %v3676_v63, 1.0 }
 0x5d2   : > { %v3681_v12 = vmin.f32 %v3677_v35, 1.0 }
 0x5d3   : > { %3684 = vst [vmem:[%s289_s9 + $0x10] sm:$0x77] %v3680_v14 }
 0x5d4   : > { %3685 = vst [vmem:[%s289_s9 + $0x18] sm:$0x77] %v3681_v12 }
 0x5d5 PF: > { %s16_s23 = sadd.s32 1, %s4783_s23   ;;  %s6165_s21 = smov %s4779_s22 }
 0x5d6   : > { %p13_p5 = scmp.ge.s32.totalorder %s16_s23, 4   ;;  %s6166_s22 = smov %s6168_s24 }
 0x5d8   :  { %15 = sbr.rel (!%p13_p5) target bundleno = 2 (0x2), region = 76 }

</bundles_post_ra>
